<compile_context>
chip_gen: v7x
topology: tpu7x:2x2x1
jax: 0.10.0
libtpu: 0.0.40
codegen_flags: <defaults>
</compile_context>

<pallas_src>
import functools

import jax
import jax.numpy as jnp
import numpy as np
from jax.experimental import pallas as pl
from jax.experimental.pallas import tpu as pltpu

RNNDIM = 64


def _vmem_spec():
    return pl.BlockSpec(memory_space=pltpu.MemorySpace.VMEM)


# ---------------------------------------------------------------------------
# The single fused kernel
# ---------------------------------------------------------------------------
def _herdr_kernel(cols1_ref, act_ref, s2_ref, w32_ref, w64_ref, w128_ref,
                  w256_ref, w16_ref, bias_ref, out_ref, h_all_ref, *,
                  b_img, b_act, b_act_pad, horizon, hidden):
    f32 = jnp.float32
    bf16 = jnp.bfloat16
    H = hidden
    P = b_act_pad

    biases = bias_ref[...]                      # (16, 256) f32, one bias per row

    def bias(i, n):
        return biases[i:i + 1, :n]

    def dense(x, w, b_row, relu=False):
        y = jnp.dot(x.astype(bf16), w, preferred_element_type=f32) + b_row
        return jnp.maximum(y, 0.0) if relu else y

    # ---- conv1 (im2col matmul, all images at once) ------------------------
    w1 = w32_ref[0:128, :]                       # (128, 32) bf16, /255 folded in
    b1 = bias(0, 32)
    y1 = jnp.dot(cols1_ref[...], w1, preferred_element_type=f32)  # (B*3200, 32)

    s2 = s2_ref[...]                             # (576, 200) bf16 0/1 gather matrix
    w2_taps = w64_ref[0:288, :]                  # conv2 taps, rows (tap, cin)
    w3_taps = w64_ref[288:864, :]                # conv3 taps, rows (pos, cin)
    b2 = bias(1, 64)
    b3 = bias(2, 64)

    obs_rows = []
    for b in range(b_img):
        base = b * 3200
        # maxpool(4, stride 2): fold over 16 aligned 200-row window groups.
        m1 = y1[base:base + 200, :]
        for w in range(1, 16):
            m1 = jnp.maximum(m1, y1[base + w * 200: base + w * 200 + 200, :])
        p1 = jnp.maximum(m1 + b1, 0.0).astype(bf16)           # (200, 32)

        # conv2 + maxpool(2, 2) + ReLU: in-kernel window extraction via a
        # 0/1 selection matmul (MXU gather), then 9 per-tap (32->64) matmuls.
        gath = jnp.dot(s2, p1, preferred_element_type=f32)     # (576, 32)
        acc2 = jnp.zeros((64, 64), f32)                        # rows (window*16+q)
        for t in range(9):
            acc2 = acc2 + jnp.dot(gath[t * 64:(t + 1) * 64, :].astype(bf16),
                                  w2_taps[t * 32:(t + 1) * 32, :],
                                  preferred_element_type=f32)
        m2 = jnp.maximum(jnp.maximum(acc2[0:16, :], acc2[16:32, :]),
                         jnp.maximum(acc2[32:48, :], acc2[48:64, :]))
        p2 = jnp.maximum(m2 + b2, 0.0).astype(bf16)            # (16, 64); rows 0..8 real

        # conv3 (3x3 kernel over the 3x3 map -> 1x1): 9 accumulated M=1 matmuls.
        acc3 = jnp.zeros((1, 64), f32)
        for q in range(9):
            acc3 = acc3 + jnp.dot(p2[q:q + 1, :],
                                  w3_taps[q * 64:(q + 1) * 64, :],
                                  preferred_element_type=f32)
        obs_rows.append(jnp.maximum(acc3 + b3, 0.0))           # (1, 64)

    obs = obs_rows[0] if b_img == 1 else jnp.concatenate(obs_rows, axis=0)

    # ---- observation tail: fc1 -> fc2 -> init_hidden ----------------------
    obs = dense(obs, w256_ref[0:64, :], bias(3, 256), relu=True)      # LazyLinear(256)
    obs = dense(obs, w128_ref[0:256, :], bias(4, 128))                # Linear(256,128)
    obs = dense(obs, w128_ref[256:384, :], bias(5, 128), relu=True)   # init_hidden[0]
    obs = dense(obs, w128_ref[384:512, :], bias(6, 128))              # init_hidden[2]
    hx = obs[:, 0:H]
    cx = obs[:, H:2 * H]
    if b_img == 1:
        h = jnp.broadcast_to(hx, (b_act, H))     # in-kernel h0/c0 broadcast
        c = jnp.broadcast_to(cx, (b_act, H))
    else:
        h, c = hx, cx

    # ---- action_pre + LSTM input-gate precompute (seq-major padded rows) --
    a = dense(act_ref[...], w16_ref[0:8, :], bias(7, 16), relu=True)  # Linear(2,16)
    a = dense(a, w16_ref[8:24, :], bias(8, 16))                       # Linear(16,16)
    gx = dense(a, w256_ref[64:80, :], bias(9, 4 * H))                 # x@Wih^T + (b_ih+b_hh)

    whh = w256_ref[80:144, :]                                          # (H, 4H) bf16

    # ---- statically unrolled LSTM recurrence (gate order i, f, g, o) ------
    # Zero-init so the padded rows read by the hoisted model_out are defined.
    h_all_ref[...] = jnp.zeros((horizon * P, H), f32)
    for t in range(horizon):
        g = gx[t * P: t * P + b_act, :] + jnp.dot(
            h.astype(bf16), whh, preferred_element_type=f32)           # (b_act, 4H)
        sg = 1.0 / (1.0 + jnp.exp(-g))            # f32 sigmoid (saturates, no NaN)
        gg = jnp.tanh(g[:, 2 * H:3 * H])          # tanh only on the g gate
        c = sg[:, H:2 * H] * c + sg[:, 0:H] * gg
        h = sg[:, 3 * H:4 * H] * jnp.tanh(c)
        h_all_ref[t * P: t * P + b_act, :] = h    # aligned group start (P mult of 8)

    # ---- model_out hoisted out of the recurrence --------------------------
    y = dense(h_all_ref[...], w32_ref[128:192, :], bias(10, 32), relu=True)  # (T*P, 32)
    mo2 = w32_ref[192:193, :].astype(f32)                                    # (1, 32)
    out_ref[...] = jnp.sum(y * mo2, axis=1, keepdims=True) + bias(11, 1)     # 32->1 on VPU/XLU


# ---------------------------------------------------------------------------
# Parameters (deterministic synthetic init; shapes per HERDR.__init__)
# ---------------------------------------------------------------------------
def init_params(key, rnndim=RNNDIM):
    keys = jax.random.split(key, 26)

    def w(k, shape, scale=0.1):
        return (scale * jax.random.normal(k, shape)).astype(jnp.float32)

    p = {}
    # obs_pre convs (torch layout: (Cout, Cin, kh, kw))
    p["conv1_w"] = w(keys[0], (32, 3, 5, 5));    p["conv1_b"] = w(keys[1], (32,))
    p["conv2_w"] = w(keys[2], (64, 32, 3, 3));   p["conv2_b"] = w(keys[3], (64,))
    p["conv3_w"] = w(keys[4], (64, 64, 3, 3));   p["conv3_b"] = w(keys[5], (64,))
    # LazyLinear(256): with 64x64 inputs, flattened conv features = 64
    p["fc1_w"] = w(keys[6], (64, 256));          p["fc1_b"] = w(keys[7], (256,))
    p["fc2_w"] = w(keys[8], (256, 128));         p["fc2_b"] = w(keys[9], (128,))
    # init_hidden
    p["ih1_w"] = w(keys[10], (128, 128));        p["ih1_b"] = w(keys[11], (128,))
    p["ih2_w"] = w(keys[12], (128, 2 * rnndim)); p["ih2_b"] = w(keys[13], (2 * rnndim,))
    # action_pre (stored pre-transposed: x @ W^T)
    p["ap1_w"] = w(keys[14], (2, 16));           p["ap1_b"] = w(keys[15], (16,))
    p["ap2_w"] = w(keys[16], (16, 16));          p["ap2_b"] = w(keys[17], (16,))
    # model_out
    p["mo1_w"] = w(keys[18], (rnndim, 32));      p["mo1_b"] = w(keys[19], (32,))
    p["mo2_w"] = w(keys[20], (32, 1));           p["mo2_b"] = w(keys[21], (1,))
    # LSTM (stored pre-transposed: x @ W_ih^T, h @ W_hh^T; gate order i,f,g,o)
    p["lstm_wih"] = w(keys[22], (16, 4 * rnndim))
    p["lstm_whh"] = w(keys[23], (rnndim, 4 * rnndim))
    p["lstm_b"] = (w(keys[24], (4 * rnndim,)) + w(keys[25], (4 * rnndim,)))
    return p


def _conv2_pool2_select():
    """0/1 gather matrix for conv2(k3,s2)+maxpool(2,2) over the 14x14 pool1 map.
       Rows ordered (tap t=(kh,kw)) * 64 + (pool window d=(di,dj)) * 16 + (out q=(pi,pj));
       columns index rows of the (200, 32) p1 block (196 real + 4 zero-pad)."""
    s = np.zeros((9 * 64, 200), np.float32)
    for t in range(9):
        kh, kw = divmod(t, 3)
        for d in range(4):
            di, dj = divmod(d, 2)
            for q in range(9):
                pi, pj = divmod(q, 3)
                r = (4 * pi + 2 * di + kh) * 14 + (4 * pj + 2 * dj + kw)
                s[t * 64 + d * 16 + q, r] = 1.0
    return s


def prepare_params(p, rnndim=RNNDIM):
    """One-time host-side packing: pre-transpose, fold the /255 - 0.5
    normalization into conv1, cast all MXU operands to bf16, and concatenate
    the many small weights into a few lane-width-grouped blobs."""
    assert rnndim == 64, "weight-blob packing below assumes RnnDim == 64"
    f32, bf16 = jnp.float32, jnp.bfloat16

    c1w = np.asarray(p["conv1_w"], np.float32)                 # (32, 3, 5, 5)
    w1 = (c1w / 255.0).reshape(32, 75).T                       # (75, 32), feats (cin,kh,kw)
    w1 = np.pad(w1, ((0, 53), (0, 0)))                         # contraction padded 75 -> 128
    b1 = np.asarray(p["conv1_b"], np.float32) - 0.5 * c1w.sum(axis=(1, 2, 3))

    w2 = np.asarray(p["conv2_w"], np.float32).transpose(2, 3, 1, 0).reshape(288, 64)
    w3 = np.asarray(p["conv3_w"], np.float32).transpose(2, 3, 1, 0).reshape(576, 64)

    mo1 = np.asarray(p["mo1_w"], np.float32)                   # (64, 32)
    mo2 = np.asarray(p["mo2_w"], np.float32).T                 # (1, 32)

    w32 = np.concatenate([w1, mo1, np.pad(mo2, ((0, 7), (0, 0)))], axis=0)     # (200, 32)
    w64 = np.concatenate([w2, w3], axis=0)                                      # (864, 64)
    w128 = np.concatenate([np.asarray(p["fc2_w"], np.float32),
                           np.asarray(p["ih1_w"], np.float32),
                           np.asarray(p["ih2_w"], np.float32)], axis=0)         # (512, 128)
    w256 = np.concatenate([np.asarray(p["fc1_w"], np.float32),
                           np.asarray(p["lstm_wih"], np.float32),
                           np.asarray(p["lstm_whh"], np.float32)], axis=0)      # (144, 256)
    w16 = np.concatenate([np.pad(np.asarray(p["ap1_w"], np.float32), ((0, 6), (0, 0))),
                          np.asarray(p["ap2_w"], np.float32)], axis=0)          # (24, 16)

    bias_rows = [b1, p["conv2_b"], p["conv3_b"], p["fc1_b"], p["fc2_b"],
                 p["ih1_b"], p["ih2_b"], p["ap1_b"], p["ap2_b"], p["lstm_b"],
                 p["mo1_b"], p["mo2_b"]]
    bias = np.zeros((16, 256), np.float32)
    for i, v in enumerate(bias_rows):
        v = np.asarray(v, np.float32)
        bias[i, :v.shape[0]] = v

    return {
        "s2": jnp.asarray(_conv2_pool2_select(), bf16),
        "w32": jnp.asarray(w32, bf16),
        "w64": jnp.asarray(w64, bf16),
        "w128": jnp.asarray(w128, bf16),
        "w256": jnp.asarray(w256, bf16),
        "w16": jnp.asarray(w16, bf16),
        "bias": jnp.asarray(bias, f32),
    }


# ---------------------------------------------------------------------------
# XLA glue: composite im2col for conv1(k5,s2)+maxpool(4,2)
# ---------------------------------------------------------------------------
def _conv1_pool1_cols(img):
    """Rows ordered (image, pool_window, out_pos); each 196-row group padded to
       200 (8-sublane aligned); features (cin, kh, kw) zero-padded 75 -> 128."""
    B = img.shape[0]
    sl = [img[:, :, kh:kh + 59:2, kw:kw + 59:2]
          for kh in range(5) for kw in range(5)]               # each (B, 3, 30, 30)
    cols = jnp.stack(sl, axis=2)                               # (B, 3, 25, 30, 30)
    cols = cols.transpose(0, 3, 4, 1, 2).reshape(B, 30, 30, 75)
    wins = jnp.stack([cols[:, di:di + 27:2, dj:dj + 27:2, :]
                      for di in range(4) for dj in range(4)], axis=1)  # (B,16,14,14,75)
    wins = wins.reshape(B, 16, 196, 75)
    wins = jnp.pad(wins, ((0, 0), (0, 0), (0, 4), (0, 53)))
    return wins.reshape(B * 3200, 128).astype(jnp.bfloat16)


# ---------------------------------------------------------------------------
# Forward pass (mirrors HERDR.forward)
# ---------------------------------------------------------------------------
def herdr_forward(prep, img, action, rnndim=RNNDIM):
    B = img.shape[0]
    b_act, horizon = action.shape[0], action.shape[1]
    if B != 1 and B != b_act:
        raise ValueError("image batch must be 1 or equal to the action batch")
    P = ((b_act + 7) // 8) * 8          # per-timestep row group, 8-sublane aligned

    cols1 = _conv1_pool1_cols(img.astype(jnp.float32))

    # actions: seq-major (t, b) rows, groups padded to P rows, features 2 -> 8
    act = action.astype(jnp.float32).transpose(1, 0, 2)
    act = jnp.pad(act, ((0, 0), (0, P - b_act), (0, 6))).reshape(horizon * P, 8)

    out = pl.pallas_call(
        functools.partial(_herdr_kernel, b_img=B, b_act=b_act, b_act_pad=P,
                          horizon=horizon, hidden=rnndim),
        out_shape=jax.ShapeDtypeStruct((horizon * P, 1), jnp.float32),
        in_specs=[_vmem_spec()] * 9,
        out_specs=_vmem_spec(),
        scratch_shapes=[pltpu.VMEM((horizon * P, rnndim), jnp.float32)],
    )(cols1, act, prep["s2"], prep["w32"], prep["w64"], prep["w128"],
      prep["w256"], prep["w16"], prep["bias"])

    # rows are (t, b_padded): keep real action rows, reorder to (batch, T, 1)
    out = out.reshape(horizon, P, 1)[:, :b_act, :]
    return out.transpose(1, 0, 2)


if __name__ == "__main__":
    key = jax.random.PRNGKey(0)
    kp, ki, ka = jax.random.split(key, 3)
    params = init_params(kp)
    prep = prepare_params(params)       # one-time host-side packing (not per call)

    # 64x64 is the smallest spatial size that survives the conv/pool stack.
    img = jax.random.uniform(ki, (1, 3, 64, 64), minval=0.0, maxval=255.0,
                             dtype=jnp.float32)
    action = jax.random.normal(ka, (4, 8, 2), dtype=jnp.float32)  # (batch, horizon, 2)

    fwd = jax.jit(herdr_forward)
    out = jax.block_until_ready(fwd(prep, img, action))
    assert out.shape == (4, 8, 1), out.shape
    assert bool(jnp.all(jnp.isfinite(out)))
    print("KERNEL_OK")
</pallas_src>

<mosaic_0001>
module attributes {stable_mosaic.version = 11 : i64} {
  func.func @_herdr_kernel(%arg0: memref<3200x128xbf16, #tpu.memory_space<vmem>>, %arg1: memref<64x8xf32, #tpu.memory_space<vmem>>, %arg2: memref<576x200xbf16, #tpu.memory_space<vmem>>, %arg3: memref<200x32xbf16, #tpu.memory_space<vmem>>, %arg4: memref<864x64xbf16, #tpu.memory_space<vmem>>, %arg5: memref<512x128xbf16, #tpu.memory_space<vmem>>, %arg6: memref<144x256xbf16, #tpu.memory_space<vmem>>, %arg7: memref<24x16xbf16, #tpu.memory_space<vmem>>, %arg8: memref<16x256xf32, #tpu.memory_space<vmem>>, %arg9: memref<64x1xf32, #tpu.memory_space<vmem>>, %arg10: memref<64x64xf32, #tpu.memory_space<vmem>>) attributes {dimension_semantics = [], scalar_prefetch = 0 : i64, scratch_operands = 1 : i64, tpu.core_type = #tpu.core_type<tc>} {
    %c0 = arith.constant 0 : index
    %c0_0 = arith.constant 0 : index
    %0 = vector.load %arg8[%c0, %c0_0] : memref<16x256xf32, #tpu.memory_space<vmem>>, vector<16x256xf32>
    %c0_1 = arith.constant 0 : index
    %c0_2 = arith.constant 0 : index
    %1 = vector.load %arg3[%c0_1, %c0_2] : memref<200x32xbf16, #tpu.memory_space<vmem>>, vector<128x32xbf16>
    %2 = vector.extract_strided_slice %0 {offsets = [0, 0], sizes = [1, 32], strides = [1, 1]} : vector<16x256xf32> to vector<1x32xf32>
    %c0_3 = arith.constant 0 : index
    %c0_4 = arith.constant 0 : index
    %3 = vector.load %arg0[%c0_3, %c0_4] : memref<3200x128xbf16, #tpu.memory_space<vmem>>, vector<3200x128xbf16>
    %cst = arith.constant dense<0.000000e+00> : vector<3200x32xf32>
    %4 = tpu.matmul %3, %1, %cst {dimension_numbers = #tpu.dot_dimension_numbers<[1], [0], [0], [1], [0, 0, 1, 1], [], []>} : vector<3200x128xbf16>, vector<128x32xbf16>, vector<3200x32xf32> -> vector<3200x32xf32>
    %c0_5 = arith.constant 0 : index
    %c0_6 = arith.constant 0 : index
    %5 = vector.load %arg2[%c0_5, %c0_6] : memref<576x200xbf16, #tpu.memory_space<vmem>>, vector<576x200xbf16>
    %c0_7 = arith.constant 0 : index
    %c0_8 = arith.constant 0 : index
    %6 = vector.load %arg4[%c0_7, %c0_8] : memref<864x64xbf16, #tpu.memory_space<vmem>>, vector<288x64xbf16>
    %c288 = arith.constant 288 : index
    %c0_9 = arith.constant 0 : index
    %7 = vector.load %arg4[%c288, %c0_9] : memref<864x64xbf16, #tpu.memory_space<vmem>>, vector<576x64xbf16>
    %8 = vector.extract_strided_slice %0 {offsets = [1, 0], sizes = [1, 64], strides = [1, 1]} : vector<16x256xf32> to vector<1x64xf32>
    %9 = vector.extract_strided_slice %0 {offsets = [2, 0], sizes = [1, 64], strides = [1, 1]} : vector<16x256xf32> to vector<1x64xf32>
    %10 = vector.extract_strided_slice %4 {offsets = [0, 0], sizes = [200, 32], strides = [1, 1]} : vector<3200x32xf32> to vector<200x32xf32>
    %11 = vector.extract_strided_slice %4 {offsets = [200, 0], sizes = [200, 32], strides = [1, 1]} : vector<3200x32xf32> to vector<200x32xf32>
    %12 = arith.maximumf %10, %11 : vector<200x32xf32>
    %13 = vector.extract_strided_slice %4 {offsets = [400, 0], sizes = [200, 32], strides = [1, 1]} : vector<3200x32xf32> to vector<200x32xf32>
    %14 = arith.maximumf %12, %13 : vector<200x32xf32>
    %15 = vector.extract_strided_slice %4 {offsets = [600, 0], sizes = [200, 32], strides = [1, 1]} : vector<3200x32xf32> to vector<200x32xf32>
    %16 = arith.maximumf %14, %15 : vector<200x32xf32>
    %17 = vector.extract_strided_slice %4 {offsets = [800, 0], sizes = [200, 32], strides = [1, 1]} : vector<3200x32xf32> to vector<200x32xf32>
    %18 = arith.maximumf %16, %17 : vector<200x32xf32>
    %19 = vector.extract_strided_slice %4 {offsets = [1000, 0], sizes = [200, 32], strides = [1, 1]} : vector<3200x32xf32> to vector<200x32xf32>
    %20 = arith.maximumf %18, %19 : vector<200x32xf32>
    %21 = vector.extract_strided_slice %4 {offsets = [1200, 0], sizes = [200, 32], strides = [1, 1]} : vector<3200x32xf32> to vector<200x32xf32>
    %22 = arith.maximumf %20, %21 : vector<200x32xf32>
    %23 = vector.extract_strided_slice %4 {offsets = [1400, 0], sizes = [200, 32], strides = [1, 1]} : vector<3200x32xf32> to vector<200x32xf32>
    %24 = arith.maximumf %22, %23 : vector<200x32xf32>
    %25 = vector.extract_strided_slice %4 {offsets = [1600, 0], sizes = [200, 32], strides = [1, 1]} : vector<3200x32xf32> to vector<200x32xf32>
    %26 = arith.maximumf %24, %25 : vector<200x32xf32>
    %27 = vector.extract_strided_slice %4 {offsets = [1800, 0], sizes = [200, 32], strides = [1, 1]} : vector<3200x32xf32> to vector<200x32xf32>
    %28 = arith.maximumf %26, %27 : vector<200x32xf32>
    %29 = vector.extract_strided_slice %4 {offsets = [2000, 0], sizes = [200, 32], strides = [1, 1]} : vector<3200x32xf32> to vector<200x32xf32>
    %30 = arith.maximumf %28, %29 : vector<200x32xf32>
    %31 = vector.extract_strided_slice %4 {offsets = [2200, 0], sizes = [200, 32], strides = [1, 1]} : vector<3200x32xf32> to vector<200x32xf32>
    %32 = arith.maximumf %30, %31 : vector<200x32xf32>
    %33 = vector.extract_strided_slice %4 {offsets = [2400, 0], sizes = [200, 32], strides = [1, 1]} : vector<3200x32xf32> to vector<200x32xf32>
    %34 = arith.maximumf %32, %33 : vector<200x32xf32>
    %35 = vector.extract_strided_slice %4 {offsets = [2600, 0], sizes = [200, 32], strides = [1, 1]} : vector<3200x32xf32> to vector<200x32xf32>
    %36 = arith.maximumf %34, %35 : vector<200x32xf32>
    %37 = vector.extract_strided_slice %4 {offsets = [2800, 0], sizes = [200, 32], strides = [1, 1]} : vector<3200x32xf32> to vector<200x32xf32>
    %38 = arith.maximumf %36, %37 : vector<200x32xf32>
    %39 = vector.extract_strided_slice %4 {offsets = [3000, 0], sizes = [200, 32], strides = [1, 1]} : vector<3200x32xf32> to vector<200x32xf32>
    %40 = arith.maximumf %38, %39 : vector<200x32xf32>
    %41 = vector.broadcast %2 : vector<1x32xf32> to vector<200x32xf32>
    %42 = arith.addf %40, %41 : vector<200x32xf32>
    %cst_10 = arith.constant 0.000000e+00 : f32
    %43 = vector.broadcast %cst_10 : f32 to vector<200x32xf32>
    %44 = arith.maximumf %42, %43 : vector<200x32xf32>
    %45 = arith.truncf %44 : vector<200x32xf32> to vector<200x32xbf16>
    %cst_11 = arith.constant dense<0.000000e+00> : vector<576x32xf32>
    %46 = tpu.matmul %5, %45, %cst_11 {dimension_numbers = #tpu.dot_dimension_numbers<[1], [0], [0], [1], [0, 0, 1, 1], [], []>} : vector<576x200xbf16>, vector<200x32xbf16>, vector<576x32xf32> -> vector<576x32xf32>
    %cst_12 = arith.constant 0.000000e+00 : f32
    %47 = vector.broadcast %cst_12 : f32 to vector<64x64xf32>
    %48 = vector.extract_strided_slice %46 {offsets = [0, 0], sizes = [64, 32], strides = [1, 1]} : vector<576x32xf32> to vector<64x32xf32>
    %49 = arith.truncf %48 : vector<64x32xf32> to vector<64x32xbf16>
    %50 = vector.extract_strided_slice %6 {offsets = [0, 0], sizes = [32, 64], strides = [1, 1]} : vector<288x64xbf16> to vector<32x64xbf16>
    %cst_13 = arith.constant dense<0.000000e+00> : vector<64x64xf32>
    %51 = tpu.matmul %49, %50, %cst_13 {dimension_numbers = #tpu.dot_dimension_numbers<[1], [0], [0], [1], [0, 0, 1, 1], [], []>} : vector<64x32xbf16>, vector<32x64xbf16>, vector<64x64xf32> -> vector<64x64xf32>
    %52 = arith.addf %47, %51 : vector<64x64xf32>
    %53 = vector.extract_strided_slice %46 {offsets = [64, 0], sizes = [64, 32], strides = [1, 1]} : vector<576x32xf32> to vector<64x32xf32>
    %54 = arith.truncf %53 : vector<64x32xf32> to vector<64x32xbf16>
    %55 = vector.extract_strided_slice %6 {offsets = [32, 0], sizes = [32, 64], strides = [1, 1]} : vector<288x64xbf16> to vector<32x64xbf16>
    %cst_14 = arith.constant dense<0.000000e+00> : vector<64x64xf32>
    %56 = tpu.matmul %54, %55, %cst_14 {dimension_numbers = #tpu.dot_dimension_numbers<[1], [0], [0], [1], [0, 0, 1, 1], [], []>} : vector<64x32xbf16>, vector<32x64xbf16>, vector<64x64xf32> -> vector<64x64xf32>
    %57 = arith.addf %52, %56 : vector<64x64xf32>
    %58 = vector.extract_strided_slice %46 {offsets = [128, 0], sizes = [64, 32], strides = [1, 1]} : vector<576x32xf32> to vector<64x32xf32>
    %59 = arith.truncf %58 : vector<64x32xf32> to vector<64x32xbf16>
    %60 = vector.extract_strided_slice %6 {offsets = [64, 0], sizes = [32, 64], strides = [1, 1]} : vector<288x64xbf16> to vector<32x64xbf16>
    %cst_15 = arith.constant dense<0.000000e+00> : vector<64x64xf32>
    %61 = tpu.matmul %59, %60, %cst_15 {dimension_numbers = #tpu.dot_dimension_numbers<[1], [0], [0], [1], [0, 0, 1, 1], [], []>} : vector<64x32xbf16>, vector<32x64xbf16>, vector<64x64xf32> -> vector<64x64xf32>
    %62 = arith.addf %57, %61 : vector<64x64xf32>
    %63 = vector.extract_strided_slice %46 {offsets = [192, 0], sizes = [64, 32], strides = [1, 1]} : vector<576x32xf32> to vector<64x32xf32>
    %64 = arith.truncf %63 : vector<64x32xf32> to vector<64x32xbf16>
    %65 = vector.extract_strided_slice %6 {offsets = [96, 0], sizes = [32, 64], strides = [1, 1]} : vector<288x64xbf16> to vector<32x64xbf16>
    %cst_16 = arith.constant dense<0.000000e+00> : vector<64x64xf32>
    %66 = tpu.matmul %64, %65, %cst_16 {dimension_numbers = #tpu.dot_dimension_numbers<[1], [0], [0], [1], [0, 0, 1, 1], [], []>} : vector<64x32xbf16>, vector<32x64xbf16>, vector<64x64xf32> -> vector<64x64xf32>
    %67 = arith.addf %62, %66 : vector<64x64xf32>
    %68 = vector.extract_strided_slice %46 {offsets = [256, 0], sizes = [64, 32], strides = [1, 1]} : vector<576x32xf32> to vector<64x32xf32>
    %69 = arith.truncf %68 : vector<64x32xf32> to vector<64x32xbf16>
    %70 = vector.extract_strided_slice %6 {offsets = [128, 0], sizes = [32, 64], strides = [1, 1]} : vector<288x64xbf16> to vector<32x64xbf16>
    %cst_17 = arith.constant dense<0.000000e+00> : vector<64x64xf32>
    %71 = tpu.matmul %69, %70, %cst_17 {dimension_numbers = #tpu.dot_dimension_numbers<[1], [0], [0], [1], [0, 0, 1, 1], [], []>} : vector<64x32xbf16>, vector<32x64xbf16>, vector<64x64xf32> -> vector<64x64xf32>
    %72 = arith.addf %67, %71 : vector<64x64xf32>
    %73 = vector.extract_strided_slice %46 {offsets = [320, 0], sizes = [64, 32], strides = [1, 1]} : vector<576x32xf32> to vector<64x32xf32>
    %74 = arith.truncf %73 : vector<64x32xf32> to vector<64x32xbf16>
    %75 = vector.extract_strided_slice %6 {offsets = [160, 0], sizes = [32, 64], strides = [1, 1]} : vector<288x64xbf16> to vector<32x64xbf16>
    %cst_18 = arith.constant dense<0.000000e+00> : vector<64x64xf32>
    %76 = tpu.matmul %74, %75, %cst_18 {dimension_numbers = #tpu.dot_dimension_numbers<[1], [0], [0], [1], [0, 0, 1, 1], [], []>} : vector<64x32xbf16>, vector<32x64xbf16>, vector<64x64xf32> -> vector<64x64xf32>
    %77 = arith.addf %72, %76 : vector<64x64xf32>
    %78 = vector.extract_strided_slice %46 {offsets = [384, 0], sizes = [64, 32], strides = [1, 1]} : vector<576x32xf32> to vector<64x32xf32>
    %79 = arith.truncf %78 : vector<64x32xf32> to vector<64x32xbf16>
    %80 = vector.extract_strided_slice %6 {offsets = [192, 0], sizes = [32, 64], strides = [1, 1]} : vector<288x64xbf16> to vector<32x64xbf16>
    %cst_19 = arith.constant dense<0.000000e+00> : vector<64x64xf32>
    %81 = tpu.matmul %79, %80, %cst_19 {dimension_numbers = #tpu.dot_dimension_numbers<[1], [0], [0], [1], [0, 0, 1, 1], [], []>} : vector<64x32xbf16>, vector<32x64xbf16>, vector<64x64xf32> -> vector<64x64xf32>
    %82 = arith.addf %77, %81 : vector<64x64xf32>
    %83 = vector.extract_strided_slice %46 {offsets = [448, 0], sizes = [64, 32], strides = [1, 1]} : vector<576x32xf32> to vector<64x32xf32>
    %84 = arith.truncf %83 : vector<64x32xf32> to vector<64x32xbf16>
    %85 = vector.extract_strided_slice %6 {offsets = [224, 0], sizes = [32, 64], strides = [1, 1]} : vector<288x64xbf16> to vector<32x64xbf16>
    %cst_20 = arith.constant dense<0.000000e+00> : vector<64x64xf32>
    %86 = tpu.matmul %84, %85, %cst_20 {dimension_numbers = #tpu.dot_dimension_numbers<[1], [0], [0], [1], [0, 0, 1, 1], [], []>} : vector<64x32xbf16>, vector<32x64xbf16>, vector<64x64xf32> -> vector<64x64xf32>
    %87 = arith.addf %82, %86 : vector<64x64xf32>
    %88 = vector.extract_strided_slice %46 {offsets = [512, 0], sizes = [64, 32], strides = [1, 1]} : vector<576x32xf32> to vector<64x32xf32>
    %89 = arith.truncf %88 : vector<64x32xf32> to vector<64x32xbf16>
    %90 = vector.extract_strided_slice %6 {offsets = [256, 0], sizes = [32, 64], strides = [1, 1]} : vector<288x64xbf16> to vector<32x64xbf16>
    %cst_21 = arith.constant dense<0.000000e+00> : vector<64x64xf32>
    %91 = tpu.matmul %89, %90, %cst_21 {dimension_numbers = #tpu.dot_dimension_numbers<[1], [0], [0], [1], [0, 0, 1, 1], [], []>} : vector<64x32xbf16>, vector<32x64xbf16>, vector<64x64xf32> -> vector<64x64xf32>
    %92 = arith.addf %87, %91 : vector<64x64xf32>
    %93 = vector.extract_strided_slice %92 {offsets = [0, 0], sizes = [16, 64], strides = [1, 1]} : vector<64x64xf32> to vector<16x64xf32>
    %94 = vector.extract_strided_slice %92 {offsets = [16, 0], sizes = [16, 64], strides = [1, 1]} : vector<64x64xf32> to vector<16x64xf32>
    %95 = arith.maximumf %93, %94 : vector<16x64xf32>
    %96 = vector.extract_strided_slice %92 {offsets = [32, 0], sizes = [16, 64], strides = [1, 1]} : vector<64x64xf32> to vector<16x64xf32>
    %97 = vector.extract_strided_slice %92 {offsets = [48, 0], sizes = [16, 64], strides = [1, 1]} : vector<64x64xf32> to vector<16x64xf32>
    %98 = arith.maximumf %96, %97 : vector<16x64xf32>
    %99 = arith.maximumf %95, %98 : vector<16x64xf32>
    %100 = vector.broadcast %8 : vector<1x64xf32> to vector<16x64xf32>
    %101 = arith.addf %99, %100 : vector<16x64xf32>
    %cst_22 = arith.constant 0.000000e+00 : f32
    %102 = vector.broadcast %cst_22 : f32 to vector<16x64xf32>
    %103 = arith.maximumf %101, %102 : vector<16x64xf32>
    %104 = arith.truncf %103 : vector<16x64xf32> to vector<16x64xbf16>
    %cst_23 = arith.constant 0.000000e+00 : f32
    %105 = vector.broadcast %cst_23 : f32 to vector<1x64xf32>
    %106 = vector.extract_strided_slice %104 {offsets = [0, 0], sizes = [1, 64], strides = [1, 1]} : vector<16x64xbf16> to vector<1x64xbf16>
    %107 = vector.extract_strided_slice %7 {offsets = [0, 0], sizes = [64, 64], strides = [1, 1]} : vector<576x64xbf16> to vector<64x64xbf16>
    %cst_24 = arith.constant dense<0.000000e+00> : vector<1x64xf32>
    %108 = tpu.matmul %106, %107, %cst_24 {dimension_numbers = #tpu.dot_dimension_numbers<[1], [0], [0], [1], [0, 0, 1, 1], [], []>} : vector<1x64xbf16>, vector<64x64xbf16>, vector<1x64xf32> -> vector<1x64xf32>
    %109 = arith.addf %105, %108 : vector<1x64xf32>
    %110 = vector.extract_strided_slice %104 {offsets = [1, 0], sizes = [1, 64], strides = [1, 1]} : vector<16x64xbf16> to vector<1x64xbf16>
    %111 = vector.extract_strided_slice %7 {offsets = [64, 0], sizes = [64, 64], strides = [1, 1]} : vector<576x64xbf16> to vector<64x64xbf16>
    %cst_25 = arith.constant dense<0.000000e+00> : vector<1x64xf32>
    %112 = tpu.matmul %110, %111, %cst_25 {dimension_numbers = #tpu.dot_dimension_numbers<[1], [0], [0], [1], [0, 0, 1, 1], [], []>} : vector<1x64xbf16>, vector<64x64xbf16>, vector<1x64xf32> -> vector<1x64xf32>
    %113 = arith.addf %109, %112 : vector<1x64xf32>
    %114 = vector.extract_strided_slice %104 {offsets = [2, 0], sizes = [1, 64], strides = [1, 1]} : vector<16x64xbf16> to vector<1x64xbf16>
    %115 = vector.extract_strided_slice %7 {offsets = [128, 0], sizes = [64, 64], strides = [1, 1]} : vector<576x64xbf16> to vector<64x64xbf16>
    %cst_26 = arith.constant dense<0.000000e+00> : vector<1x64xf32>
    %116 = tpu.matmul %114, %115, %cst_26 {dimension_numbers = #tpu.dot_dimension_numbers<[1], [0], [0], [1], [0, 0, 1, 1], [], []>} : vector<1x64xbf16>, vector<64x64xbf16>, vector<1x64xf32> -> vector<1x64xf32>
    %117 = arith.addf %113, %116 : vector<1x64xf32>
    %118 = vector.extract_strided_slice %104 {offsets = [3, 0], sizes = [1, 64], strides = [1, 1]} : vector<16x64xbf16> to vector<1x64xbf16>
    %119 = vector.extract_strided_slice %7 {offsets = [192, 0], sizes = [64, 64], strides = [1, 1]} : vector<576x64xbf16> to vector<64x64xbf16>
    %cst_27 = arith.constant dense<0.000000e+00> : vector<1x64xf32>
    %120 = tpu.matmul %118, %119, %cst_27 {dimension_numbers = #tpu.dot_dimension_numbers<[1], [0], [0], [1], [0, 0, 1, 1], [], []>} : vector<1x64xbf16>, vector<64x64xbf16>, vector<1x64xf32> -> vector<1x64xf32>
    %121 = arith.addf %117, %120 : vector<1x64xf32>
    %122 = vector.extract_strided_slice %104 {offsets = [4, 0], sizes = [1, 64], strides = [1, 1]} : vector<16x64xbf16> to vector<1x64xbf16>
    %123 = vector.extract_strided_slice %7 {offsets = [256, 0], sizes = [64, 64], strides = [1, 1]} : vector<576x64xbf16> to vector<64x64xbf16>
    %cst_28 = arith.constant dense<0.000000e+00> : vector<1x64xf32>
    %124 = tpu.matmul %122, %123, %cst_28 {dimension_numbers = #tpu.dot_dimension_numbers<[1], [0], [0], [1], [0, 0, 1, 1], [], []>} : vector<1x64xbf16>, vector<64x64xbf16>, vector<1x64xf32> -> vector<1x64xf32>
    %125 = arith.addf %121, %124 : vector<1x64xf32>
    %126 = vector.extract_strided_slice %104 {offsets = [5, 0], sizes = [1, 64], strides = [1, 1]} : vector<16x64xbf16> to vector<1x64xbf16>
    %127 = vector.extract_strided_slice %7 {offsets = [320, 0], sizes = [64, 64], strides = [1, 1]} : vector<576x64xbf16> to vector<64x64xbf16>
    %cst_29 = arith.constant dense<0.000000e+00> : vector<1x64xf32>
    %128 = tpu.matmul %126, %127, %cst_29 {dimension_numbers = #tpu.dot_dimension_numbers<[1], [0], [0], [1], [0, 0, 1, 1], [], []>} : vector<1x64xbf16>, vector<64x64xbf16>, vector<1x64xf32> -> vector<1x64xf32>
    %129 = arith.addf %125, %128 : vector<1x64xf32>
    %130 = vector.extract_strided_slice %104 {offsets = [6, 0], sizes = [1, 64], strides = [1, 1]} : vector<16x64xbf16> to vector<1x64xbf16>
    %131 = vector.extract_strided_slice %7 {offsets = [384, 0], sizes = [64, 64], strides = [1, 1]} : vector<576x64xbf16> to vector<64x64xbf16>
    %cst_30 = arith.constant dense<0.000000e+00> : vector<1x64xf32>
    %132 = tpu.matmul %130, %131, %cst_30 {dimension_numbers = #tpu.dot_dimension_numbers<[1], [0], [0], [1], [0, 0, 1, 1], [], []>} : vector<1x64xbf16>, vector<64x64xbf16>, vector<1x64xf32> -> vector<1x64xf32>
    %133 = arith.addf %129, %132 : vector<1x64xf32>
    %134 = vector.extract_strided_slice %104 {offsets = [7, 0], sizes = [1, 64], strides = [1, 1]} : vector<16x64xbf16> to vector<1x64xbf16>
    %135 = vector.extract_strided_slice %7 {offsets = [448, 0], sizes = [64, 64], strides = [1, 1]} : vector<576x64xbf16> to vector<64x64xbf16>
    %cst_31 = arith.constant dense<0.000000e+00> : vector<1x64xf32>
    %136 = tpu.matmul %134, %135, %cst_31 {dimension_numbers = #tpu.dot_dimension_numbers<[1], [0], [0], [1], [0, 0, 1, 1], [], []>} : vector<1x64xbf16>, vector<64x64xbf16>, vector<1x64xf32> -> vector<1x64xf32>
    %137 = arith.addf %133, %136 : vector<1x64xf32>
    %138 = vector.extract_strided_slice %104 {offsets = [8, 0], sizes = [1, 64], strides = [1, 1]} : vector<16x64xbf16> to vector<1x64xbf16>
    %139 = vector.extract_strided_slice %7 {offsets = [512, 0], sizes = [64, 64], strides = [1, 1]} : vector<576x64xbf16> to vector<64x64xbf16>
    %cst_32 = arith.constant dense<0.000000e+00> : vector<1x64xf32>
    %140 = tpu.matmul %138, %139, %cst_32 {dimension_numbers = #tpu.dot_dimension_numbers<[1], [0], [0], [1], [0, 0, 1, 1], [], []>} : vector<1x64xbf16>, vector<64x64xbf16>, vector<1x64xf32> -> vector<1x64xf32>
    %141 = arith.addf %137, %140 : vector<1x64xf32>
    %142 = arith.addf %141, %9 : vector<1x64xf32>
    %cst_33 = arith.constant 0.000000e+00 : f32
    %143 = vector.broadcast %cst_33 : f32 to vector<1x64xf32>
    %144 = arith.maximumf %142, %143 : vector<1x64xf32>
    %c0_34 = arith.constant 0 : index
    %c0_35 = arith.constant 0 : index
    %145 = vector.load %arg6[%c0_34, %c0_35] : memref<144x256xbf16, #tpu.memory_space<vmem>>, vector<64x256xbf16>
    %146 = vector.extract_strided_slice %0 {offsets = [3, 0], sizes = [1, 256], strides = [1, 1]} : vector<16x256xf32> to vector<1x256xf32>
    %147 = arith.truncf %144 : vector<1x64xf32> to vector<1x64xbf16>
    %cst_36 = arith.constant dense<0.000000e+00> : vector<1x256xf32>
    %148 = tpu.matmul %147, %145, %cst_36 {dimension_numbers = #tpu.dot_dimension_numbers<[1], [0], [0], [1], [0, 0, 1, 1], [], []>} : vector<1x64xbf16>, vector<64x256xbf16>, vector<1x256xf32> -> vector<1x256xf32>
    %149 = arith.addf %148, %146 : vector<1x256xf32>
    %cst_37 = arith.constant 0.000000e+00 : f32
    %150 = vector.broadcast %cst_37 : f32 to vector<1x256xf32>
    %151 = arith.maximumf %149, %150 : vector<1x256xf32>
    %c0_38 = arith.constant 0 : index
    %c0_39 = arith.constant 0 : index
    %152 = vector.load %arg5[%c0_38, %c0_39] : memref<512x128xbf16, #tpu.memory_space<vmem>>, vector<256x128xbf16>
    %153 = vector.extract_strided_slice %0 {offsets = [4, 0], sizes = [1, 128], strides = [1, 1]} : vector<16x256xf32> to vector<1x128xf32>
    %154 = arith.truncf %151 : vector<1x256xf32> to vector<1x256xbf16>
    %cst_40 = arith.constant dense<0.000000e+00> : vector<1x128xf32>
    %155 = tpu.matmul %154, %152, %cst_40 {dimension_numbers = #tpu.dot_dimension_numbers<[1], [0], [0], [1], [0, 0, 1, 1], [], []>} : vector<1x256xbf16>, vector<256x128xbf16>, vector<1x128xf32> -> vector<1x128xf32>
    %156 = arith.addf %155, %153 : vector<1x128xf32>
    %c256 = arith.constant 256 : index
    %c0_41 = arith.constant 0 : index
    %157 = vector.load %arg5[%c256, %c0_41] : memref<512x128xbf16, #tpu.memory_space<vmem>>, vector<128x128xbf16>
    %158 = vector.extract_strided_slice %0 {offsets = [5, 0], sizes = [1, 128], strides = [1, 1]} : vector<16x256xf32> to vector<1x128xf32>
    %159 = arith.truncf %156 : vector<1x128xf32> to vector<1x128xbf16>
    %cst_42 = arith.constant dense<0.000000e+00> : vector<1x128xf32>
    %160 = tpu.matmul %159, %157, %cst_42 {dimension_numbers = #tpu.dot_dimension_numbers<[1], [0], [0], [1], [0, 0, 1, 1], [], []>} : vector<1x128xbf16>, vector<128x128xbf16>, vector<1x128xf32> -> vector<1x128xf32>
    %161 = arith.addf %160, %158 : vector<1x128xf32>
    %cst_43 = arith.constant 0.000000e+00 : f32
    %162 = vector.broadcast %cst_43 : f32 to vector<1x128xf32>
    %163 = arith.maximumf %161, %162 : vector<1x128xf32>
    %c384 = arith.constant 384 : index
    %c0_44 = arith.constant 0 : index
    %164 = vector.load %arg5[%c384, %c0_44] : memref<512x128xbf16, #tpu.memory_space<vmem>>, vector<128x128xbf16>
    %165 = vector.extract_strided_slice %0 {offsets = [6, 0], sizes = [1, 128], strides = [1, 1]} : vector<16x256xf32> to vector<1x128xf32>
    %166 = arith.truncf %163 : vector<1x128xf32> to vector<1x128xbf16>
    %cst_45 = arith.constant dense<0.000000e+00> : vector<1x128xf32>
    %167 = tpu.matmul %166, %164, %cst_45 {dimension_numbers = #tpu.dot_dimension_numbers<[1], [0], [0], [1], [0, 0, 1, 1], [], []>} : vector<1x128xbf16>, vector<128x128xbf16>, vector<1x128xf32> -> vector<1x128xf32>
    %168 = arith.addf %167, %165 : vector<1x128xf32>
    %169 = vector.extract_strided_slice %168 {offsets = [0, 0], sizes = [1, 64], strides = [1, 1]} : vector<1x128xf32> to vector<1x64xf32>
    %170 = vector.extract_strided_slice %168 {offsets = [0, 64], sizes = [1, 64], strides = [1, 1]} : vector<1x128xf32> to vector<1x64xf32>
    %171 = vector.shape_cast %169 : vector<1x64xf32> to vector<1x64xf32>
    %172 = vector.broadcast %171 : vector<1x64xf32> to vector<4x64xf32>
    %173 = vector.shape_cast %170 : vector<1x64xf32> to vector<1x64xf32>
    %174 = vector.broadcast %173 : vector<1x64xf32> to vector<4x64xf32>
    %c0_46 = arith.constant 0 : index
    %c0_47 = arith.constant 0 : index
    %175 = vector.load %arg1[%c0_46, %c0_47] : memref<64x8xf32, #tpu.memory_space<vmem>>, vector<64x8xf32>
    %c0_48 = arith.constant 0 : index
    %c0_49 = arith.constant 0 : index
    %176 = vector.load %arg7[%c0_48, %c0_49] : memref<24x16xbf16, #tpu.memory_space<vmem>>, vector<8x16xbf16>
    %177 = vector.extract_strided_slice %0 {offsets = [7, 0], sizes = [1, 16], strides = [1, 1]} : vector<16x256xf32> to vector<1x16xf32>
    %178 = arith.truncf %175 : vector<64x8xf32> to vector<64x8xbf16>
    %cst_50 = arith.constant dense<0.000000e+00> : vector<64x16xf32>
    %179 = tpu.matmul %178, %176, %cst_50 {dimension_numbers = #tpu.dot_dimension_numbers<[1], [0], [0], [1], [0, 0, 1, 1], [], []>} : vector<64x8xbf16>, vector<8x16xbf16>, vector<64x16xf32> -> vector<64x16xf32>
    %180 = vector.broadcast %177 : vector<1x16xf32> to vector<64x16xf32>
    %181 = arith.addf %179, %180 : vector<64x16xf32>
    %cst_51 = arith.constant 0.000000e+00 : f32
    %182 = vector.broadcast %cst_51 : f32 to vector<64x16xf32>
    %183 = arith.maximumf %181, %182 : vector<64x16xf32>
    %c8 = arith.constant 8 : index
    %c0_52 = arith.constant 0 : index
    %184 = vector.load %arg7[%c8, %c0_52] : memref<24x16xbf16, #tpu.memory_space<vmem>>, vector<16x16xbf16>
    %185 = vector.extract_strided_slice %0 {offsets = [8, 0], sizes = [1, 16], strides = [1, 1]} : vector<16x256xf32> to vector<1x16xf32>
    %186 = arith.truncf %183 : vector<64x16xf32> to vector<64x16xbf16>
    %cst_53 = arith.constant dense<0.000000e+00> : vector<64x16xf32>
    %187 = tpu.matmul %186, %184, %cst_53 {dimension_numbers = #tpu.dot_dimension_numbers<[1], [0], [0], [1], [0, 0, 1, 1], [], []>} : vector<64x16xbf16>, vector<16x16xbf16>, vector<64x16xf32> -> vector<64x16xf32>
    %188 = vector.broadcast %185 : vector<1x16xf32> to vector<64x16xf32>
    %189 = arith.addf %187, %188 : vector<64x16xf32>
    %c64 = arith.constant 64 : index
    %c0_54 = arith.constant 0 : index
    %190 = vector.load %arg6[%c64, %c0_54] : memref<144x256xbf16, #tpu.memory_space<vmem>>, vector<16x256xbf16>
    %191 = vector.extract_strided_slice %0 {offsets = [9, 0], sizes = [1, 256], strides = [1, 1]} : vector<16x256xf32> to vector<1x256xf32>
    %192 = arith.truncf %189 : vector<64x16xf32> to vector<64x16xbf16>
    %cst_55 = arith.constant dense<0.000000e+00> : vector<64x256xf32>
    %193 = tpu.matmul %192, %190, %cst_55 {dimension_numbers = #tpu.dot_dimension_numbers<[1], [0], [0], [1], [0, 0, 1, 1], [], []>} : vector<64x16xbf16>, vector<16x256xbf16>, vector<64x256xf32> -> vector<64x256xf32>
    %194 = vector.broadcast %191 : vector<1x256xf32> to vector<64x256xf32>
    %195 = arith.addf %193, %194 : vector<64x256xf32>
    %c80 = arith.constant 80 : index
    %c0_56 = arith.constant 0 : index
    %196 = vector.load %arg6[%c80, %c0_56] : memref<144x256xbf16, #tpu.memory_space<vmem>>, vector<64x256xbf16>
    %cst_57 = arith.constant 0.000000e+00 : f32
    %197 = vector.broadcast %cst_57 : f32 to vector<64x64xf32>
    %c0_58 = arith.constant 0 : index
    %c0_59 = arith.constant 0 : index
    %198 = vector.load %arg10[%c0_58, %c0_59] : memref<64x64xf32, #tpu.memory_space<vmem>>, vector<64x64xf32>
    tpu.vector_store %arg10[%c0_58, %c0_59], %197 {strides = array<i32>} : memref<64x64xf32, #tpu.memory_space<vmem>>, vector<64x64xf32>,
    %199 = vector.extract_strided_slice %195 {offsets = [0, 0], sizes = [4, 256], strides = [1, 1]} : vector<64x256xf32> to vector<4x256xf32>
    %200 = arith.truncf %172 : vector<4x64xf32> to vector<4x64xbf16>
    %cst_60 = arith.constant dense<0.000000e+00> : vector<4x256xf32>
    %201 = tpu.matmul %200, %196, %cst_60 {dimension_numbers = #tpu.dot_dimension_numbers<[1], [0], [0], [1], [0, 0, 1, 1], [], []>} : vector<4x64xbf16>, vector<64x256xbf16>, vector<4x256xf32> -> vector<4x256xf32>
    %202 = arith.addf %199, %201 : vector<4x256xf32>
    %cst_61 = arith.constant 0.000000e+00 : f32
    %203 = vector.broadcast %cst_61 : f32 to vector<4x256xf32>
    %204 = arith.subf %203, %202 : vector<4x256xf32>
    %205 = math.exp %204 : vector<4x256xf32>
    %cst_62 = arith.constant 1.000000e+00 : f32
    %206 = vector.broadcast %cst_62 : f32 to vector<4x256xf32>
    %207 = arith.addf %206, %205 : vector<4x256xf32>
    %cst_63 = arith.constant 1.000000e+00 : f32
    %208 = vector.broadcast %cst_63 : f32 to vector<4x256xf32>
    %209 = arith.divf %208, %207 : vector<4x256xf32>
    %210 = vector.extract_strided_slice %202 {offsets = [0, 128], sizes = [4, 64], strides = [1, 1]} : vector<4x256xf32> to vector<4x64xf32>
    %211 = math.tanh %210 : vector<4x64xf32>
    %212 = vector.extract_strided_slice %209 {offsets = [0, 64], sizes = [4, 64], strides = [1, 1]} : vector<4x256xf32> to vector<4x64xf32>
    %213 = arith.mulf %212, %174 : vector<4x64xf32>
    %214 = vector.extract_strided_slice %209 {offsets = [0, 0], sizes = [4, 64], strides = [1, 1]} : vector<4x256xf32> to vector<4x64xf32>
    %215 = arith.mulf %214, %211 : vector<4x64xf32>
    %216 = arith.addf %213, %215 : vector<4x64xf32>
    %217 = vector.extract_strided_slice %209 {offsets = [0, 192], sizes = [4, 64], strides = [1, 1]} : vector<4x256xf32> to vector<4x64xf32>
    %218 = math.tanh %216 : vector<4x64xf32>
    %219 = arith.mulf %217, %218 : vector<4x64xf32>
    %c0_64 = arith.constant 0 : index
    %c0_65 = arith.constant 0 : index
    %220 = vector.load %arg10[%c0_64, %c0_65] : memref<64x64xf32, #tpu.memory_space<vmem>>, vector<4x64xf32>
    tpu.vector_store %arg10[%c0_64, %c0_65], %219 {strides = array<i32>} : memref<64x64xf32, #tpu.memory_space<vmem>>, vector<4x64xf32>,
    %221 = vector.extract_strided_slice %195 {offsets = [8, 0], sizes = [4, 256], strides = [1, 1]} : vector<64x256xf32> to vector<4x256xf32>
    %222 = arith.truncf %219 : vector<4x64xf32> to vector<4x64xbf16>
    %cst_66 = arith.constant dense<0.000000e+00> : vector<4x256xf32>
    %223 = tpu.matmul %222, %196, %cst_66 {dimension_numbers = #tpu.dot_dimension_numbers<[1], [0], [0], [1], [0, 0, 1, 1], [], []>} : vector<4x64xbf16>, vector<64x256xbf16>, vector<4x256xf32> -> vector<4x256xf32>
    %224 = arith.addf %221, %223 : vector<4x256xf32>
    %cst_67 = arith.constant 0.000000e+00 : f32
    %225 = vector.broadcast %cst_67 : f32 to vector<4x256xf32>
    %226 = arith.subf %225, %224 : vector<4x256xf32>
    %227 = math.exp %226 : vector<4x256xf32>
    %cst_68 = arith.constant 1.000000e+00 : f32
    %228 = vector.broadcast %cst_68 : f32 to vector<4x256xf32>
    %229 = arith.addf %228, %227 : vector<4x256xf32>
    %cst_69 = arith.constant 1.000000e+00 : f32
    %230 = vector.broadcast %cst_69 : f32 to vector<4x256xf32>
    %231 = arith.divf %230, %229 : vector<4x256xf32>
    %232 = vector.extract_strided_slice %224 {offsets = [0, 128], sizes = [4, 64], strides = [1, 1]} : vector<4x256xf32> to vector<4x64xf32>
    %233 = math.tanh %232 : vector<4x64xf32>
    %234 = vector.extract_strided_slice %231 {offsets = [0, 64], sizes = [4, 64], strides = [1, 1]} : vector<4x256xf32> to vector<4x64xf32>
    %235 = arith.mulf %234, %216 : vector<4x64xf32>
    %236 = vector.extract_strided_slice %231 {offsets = [0, 0], sizes = [4, 64], strides = [1, 1]} : vector<4x256xf32> to vector<4x64xf32>
    %237 = arith.mulf %236, %233 : vector<4x64xf32>
    %238 = arith.addf %235, %237 : vector<4x64xf32>
    %239 = vector.extract_strided_slice %231 {offsets = [0, 192], sizes = [4, 64], strides = [1, 1]} : vector<4x256xf32> to vector<4x64xf32>
    %240 = math.tanh %238 : vector<4x64xf32>
    %241 = arith.mulf %239, %240 : vector<4x64xf32>
    %c8_70 = arith.constant 8 : index
    %c0_71 = arith.constant 0 : index
    %242 = vector.load %arg10[%c8_70, %c0_71] : memref<64x64xf32, #tpu.memory_space<vmem>>, vector<4x64xf32>
    tpu.vector_store %arg10[%c8_70, %c0_71], %241 {strides = array<i32>} : memref<64x64xf32, #tpu.memory_space<vmem>>, vector<4x64xf32>,
    %243 = vector.extract_strided_slice %195 {offsets = [16, 0], sizes = [4, 256], strides = [1, 1]} : vector<64x256xf32> to vector<4x256xf32>
    %244 = arith.truncf %241 : vector<4x64xf32> to vector<4x64xbf16>
    %cst_72 = arith.constant dense<0.000000e+00> : vector<4x256xf32>
    %245 = tpu.matmul %244, %196, %cst_72 {dimension_numbers = #tpu.dot_dimension_numbers<[1], [0], [0], [1], [0, 0, 1, 1], [], []>} : vector<4x64xbf16>, vector<64x256xbf16>, vector<4x256xf32> -> vector<4x256xf32>
    %246 = arith.addf %243, %245 : vector<4x256xf32>
    %cst_73 = arith.constant 0.000000e+00 : f32
    %247 = vector.broadcast %cst_73 : f32 to vector<4x256xf32>
    %248 = arith.subf %247, %246 : vector<4x256xf32>
    %249 = math.exp %248 : vector<4x256xf32>
    %cst_74 = arith.constant 1.000000e+00 : f32
    %250 = vector.broadcast %cst_74 : f32 to vector<4x256xf32>
    %251 = arith.addf %250, %249 : vector<4x256xf32>
    %cst_75 = arith.constant 1.000000e+00 : f32
    %252 = vector.broadcast %cst_75 : f32 to vector<4x256xf32>
    %253 = arith.divf %252, %251 : vector<4x256xf32>
    %254 = vector.extract_strided_slice %246 {offsets = [0, 128], sizes = [4, 64], strides = [1, 1]} : vector<4x256xf32> to vector<4x64xf32>
    %255 = math.tanh %254 : vector<4x64xf32>
    %256 = vector.extract_strided_slice %253 {offsets = [0, 64], sizes = [4, 64], strides = [1, 1]} : vector<4x256xf32> to vector<4x64xf32>
    %257 = arith.mulf %256, %238 : vector<4x64xf32>
    %258 = vector.extract_strided_slice %253 {offsets = [0, 0], sizes = [4, 64], strides = [1, 1]} : vector<4x256xf32> to vector<4x64xf32>
    %259 = arith.mulf %258, %255 : vector<4x64xf32>
    %260 = arith.addf %257, %259 : vector<4x64xf32>
    %261 = vector.extract_strided_slice %253 {offsets = [0, 192], sizes = [4, 64], strides = [1, 1]} : vector<4x256xf32> to vector<4x64xf32>
    %262 = math.tanh %260 : vector<4x64xf32>
    %263 = arith.mulf %261, %262 : vector<4x64xf32>
    %c16 = arith.constant 16 : index
    %c0_76 = arith.constant 0 : index
    %264 = vector.load %arg10[%c16, %c0_76] : memref<64x64xf32, #tpu.memory_space<vmem>>, vector<4x64xf32>
    tpu.vector_store %arg10[%c16, %c0_76], %263 {strides = array<i32>} : memref<64x64xf32, #tpu.memory_space<vmem>>, vector<4x64xf32>,
    %265 = vector.extract_strided_slice %195 {offsets = [24, 0], sizes = [4, 256], strides = [1, 1]} : vector<64x256xf32> to vector<4x256xf32>
    %266 = arith.truncf %263 : vector<4x64xf32> to vector<4x64xbf16>
    %cst_77 = arith.constant dense<0.000000e+00> : vector<4x256xf32>
    %267 = tpu.matmul %266, %196, %cst_77 {dimension_numbers = #tpu.dot_dimension_numbers<[1], [0], [0], [1], [0, 0, 1, 1], [], []>} : vector<4x64xbf16>, vector<64x256xbf16>, vector<4x256xf32> -> vector<4x256xf32>
    %268 = arith.addf %265, %267 : vector<4x256xf32>
    %cst_78 = arith.constant 0.000000e+00 : f32
    %269 = vector.broadcast %cst_78 : f32 to vector<4x256xf32>
    %270 = arith.subf %269, %268 : vector<4x256xf32>
    %271 = math.exp %270 : vector<4x256xf32>
    %cst_79 = arith.constant 1.000000e+00 : f32
    %272 = vector.broadcast %cst_79 : f32 to vector<4x256xf32>
    %273 = arith.addf %272, %271 : vector<4x256xf32>
    %cst_80 = arith.constant 1.000000e+00 : f32
    %274 = vector.broadcast %cst_80 : f32 to vector<4x256xf32>
    %275 = arith.divf %274, %273 : vector<4x256xf32>
    %276 = vector.extract_strided_slice %268 {offsets = [0, 128], sizes = [4, 64], strides = [1, 1]} : vector<4x256xf32> to vector<4x64xf32>
    %277 = math.tanh %276 : vector<4x64xf32>
    %278 = vector.extract_strided_slice %275 {offsets = [0, 64], sizes = [4, 64], strides = [1, 1]} : vector<4x256xf32> to vector<4x64xf32>
    %279 = arith.mulf %278, %260 : vector<4x64xf32>
    %280 = vector.extract_strided_slice %275 {offsets = [0, 0], sizes = [4, 64], strides = [1, 1]} : vector<4x256xf32> to vector<4x64xf32>
    %281 = arith.mulf %280, %277 : vector<4x64xf32>
    %282 = arith.addf %279, %281 : vector<4x64xf32>
    %283 = vector.extract_strided_slice %275 {offsets = [0, 192], sizes = [4, 64], strides = [1, 1]} : vector<4x256xf32> to vector<4x64xf32>
    %284 = math.tanh %282 : vector<4x64xf32>
    %285 = arith.mulf %283, %284 : vector<4x64xf32>
    %c24 = arith.constant 24 : index
    %c0_81 = arith.constant 0 : index
    %286 = vector.load %arg10[%c24, %c0_81] : memref<64x64xf32, #tpu.memory_space<vmem>>, vector<4x64xf32>
    tpu.vector_store %arg10[%c24, %c0_81], %285 {strides = array<i32>} : memref<64x64xf32, #tpu.memory_space<vmem>>, vector<4x64xf32>,
    %287 = vector.extract_strided_slice %195 {offsets = [32, 0], sizes = [4, 256], strides = [1, 1]} : vector<64x256xf32> to vector<4x256xf32>
    %288 = arith.truncf %285 : vector<4x64xf32> to vector<4x64xbf16>
    %cst_82 = arith.constant dense<0.000000e+00> : vector<4x256xf32>
    %289 = tpu.matmul %288, %196, %cst_82 {dimension_numbers = #tpu.dot_dimension_numbers<[1], [0], [0], [1], [0, 0, 1, 1], [], []>} : vector<4x64xbf16>, vector<64x256xbf16>, vector<4x256xf32> -> vector<4x256xf32>
    %290 = arith.addf %287, %289 : vector<4x256xf32>
    %cst_83 = arith.constant 0.000000e+00 : f32
    %291 = vector.broadcast %cst_83 : f32 to vector<4x256xf32>
    %292 = arith.subf %291, %290 : vector<4x256xf32>
    %293 = math.exp %292 : vector<4x256xf32>
    %cst_84 = arith.constant 1.000000e+00 : f32
    %294 = vector.broadcast %cst_84 : f32 to vector<4x256xf32>
    %295 = arith.addf %294, %293 : vector<4x256xf32>
    %cst_85 = arith.constant 1.000000e+00 : f32
    %296 = vector.broadcast %cst_85 : f32 to vector<4x256xf32>
    %297 = arith.divf %296, %295 : vector<4x256xf32>
    %298 = vector.extract_strided_slice %290 {offsets = [0, 128], sizes = [4, 64], strides = [1, 1]} : vector<4x256xf32> to vector<4x64xf32>
    %299 = math.tanh %298 : vector<4x64xf32>
    %300 = vector.extract_strided_slice %297 {offsets = [0, 64], sizes = [4, 64], strides = [1, 1]} : vector<4x256xf32> to vector<4x64xf32>
    %301 = arith.mulf %300, %282 : vector<4x64xf32>
    %302 = vector.extract_strided_slice %297 {offsets = [0, 0], sizes = [4, 64], strides = [1, 1]} : vector<4x256xf32> to vector<4x64xf32>
    %303 = arith.mulf %302, %299 : vector<4x64xf32>
    %304 = arith.addf %301, %303 : vector<4x64xf32>
    %305 = vector.extract_strided_slice %297 {offsets = [0, 192], sizes = [4, 64], strides = [1, 1]} : vector<4x256xf32> to vector<4x64xf32>
    %306 = math.tanh %304 : vector<4x64xf32>
    %307 = arith.mulf %305, %306 : vector<4x64xf32>
    %c32 = arith.constant 32 : index
    %c0_86 = arith.constant 0 : index
    %308 = vector.load %arg10[%c32, %c0_86] : memref<64x64xf32, #tpu.memory_space<vmem>>, vector<4x64xf32>
    tpu.vector_store %arg10[%c32, %c0_86], %307 {strides = array<i32>} : memref<64x64xf32, #tpu.memory_space<vmem>>, vector<4x64xf32>,
    %309 = vector.extract_strided_slice %195 {offsets = [40, 0], sizes = [4, 256], strides = [1, 1]} : vector<64x256xf32> to vector<4x256xf32>
    %310 = arith.truncf %307 : vector<4x64xf32> to vector<4x64xbf16>
    %cst_87 = arith.constant dense<0.000000e+00> : vector<4x256xf32>
    %311 = tpu.matmul %310, %196, %cst_87 {dimension_numbers = #tpu.dot_dimension_numbers<[1], [0], [0], [1], [0, 0, 1, 1], [], []>} : vector<4x64xbf16>, vector<64x256xbf16>, vector<4x256xf32> -> vector<4x256xf32>
    %312 = arith.addf %309, %311 : vector<4x256xf32>
    %cst_88 = arith.constant 0.000000e+00 : f32
    %313 = vector.broadcast %cst_88 : f32 to vector<4x256xf32>
    %314 = arith.subf %313, %312 : vector<4x256xf32>
    %315 = math.exp %314 : vector<4x256xf32>
    %cst_89 = arith.constant 1.000000e+00 : f32
    %316 = vector.broadcast %cst_89 : f32 to vector<4x256xf32>
    %317 = arith.addf %316, %315 : vector<4x256xf32>
    %cst_90 = arith.constant 1.000000e+00 : f32
    %318 = vector.broadcast %cst_90 : f32 to vector<4x256xf32>
    %319 = arith.divf %318, %317 : vector<4x256xf32>
    %320 = vector.extract_strided_slice %312 {offsets = [0, 128], sizes = [4, 64], strides = [1, 1]} : vector<4x256xf32> to vector<4x64xf32>
    %321 = math.tanh %320 : vector<4x64xf32>
    %322 = vector.extract_strided_slice %319 {offsets = [0, 64], sizes = [4, 64], strides = [1, 1]} : vector<4x256xf32> to vector<4x64xf32>
    %323 = arith.mulf %322, %304 : vector<4x64xf32>
    %324 = vector.extract_strided_slice %319 {offsets = [0, 0], sizes = [4, 64], strides = [1, 1]} : vector<4x256xf32> to vector<4x64xf32>
    %325 = arith.mulf %324, %321 : vector<4x64xf32>
    %326 = arith.addf %323, %325 : vector<4x64xf32>
    %327 = vector.extract_strided_slice %319 {offsets = [0, 192], sizes = [4, 64], strides = [1, 1]} : vector<4x256xf32> to vector<4x64xf32>
    %328 = math.tanh %326 : vector<4x64xf32>
    %329 = arith.mulf %327, %328 : vector<4x64xf32>
    %c40 = arith.constant 40 : index
    %c0_91 = arith.constant 0 : index
    %330 = vector.load %arg10[%c40, %c0_91] : memref<64x64xf32, #tpu.memory_space<vmem>>, vector<4x64xf32>
    tpu.vector_store %arg10[%c40, %c0_91], %329 {strides = array<i32>} : memref<64x64xf32, #tpu.memory_space<vmem>>, vector<4x64xf32>,
    %331 = vector.extract_strided_slice %195 {offsets = [48, 0], sizes = [4, 256], strides = [1, 1]} : vector<64x256xf32> to vector<4x256xf32>
    %332 = arith.truncf %329 : vector<4x64xf32> to vector<4x64xbf16>
    %cst_92 = arith.constant dense<0.000000e+00> : vector<4x256xf32>
    %333 = tpu.matmul %332, %196, %cst_92 {dimension_numbers = #tpu.dot_dimension_numbers<[1], [0], [0], [1], [0, 0, 1, 1], [], []>} : vector<4x64xbf16>, vector<64x256xbf16>, vector<4x256xf32> -> vector<4x256xf32>
    %334 = arith.addf %331, %333 : vector<4x256xf32>
    %cst_93 = arith.constant 0.000000e+00 : f32
    %335 = vector.broadcast %cst_93 : f32 to vector<4x256xf32>
    %336 = arith.subf %335, %334 : vector<4x256xf32>
    %337 = math.exp %336 : vector<4x256xf32>
    %cst_94 = arith.constant 1.000000e+00 : f32
    %338 = vector.broadcast %cst_94 : f32 to vector<4x256xf32>
    %339 = arith.addf %338, %337 : vector<4x256xf32>
    %cst_95 = arith.constant 1.000000e+00 : f32
    %340 = vector.broadcast %cst_95 : f32 to vector<4x256xf32>
    %341 = arith.divf %340, %339 : vector<4x256xf32>
    %342 = vector.extract_strided_slice %334 {offsets = [0, 128], sizes = [4, 64], strides = [1, 1]} : vector<4x256xf32> to vector<4x64xf32>
    %343 = math.tanh %342 : vector<4x64xf32>
    %344 = vector.extract_strided_slice %341 {offsets = [0, 64], sizes = [4, 64], strides = [1, 1]} : vector<4x256xf32> to vector<4x64xf32>
    %345 = arith.mulf %344, %326 : vector<4x64xf32>
    %346 = vector.extract_strided_slice %341 {offsets = [0, 0], sizes = [4, 64], strides = [1, 1]} : vector<4x256xf32> to vector<4x64xf32>
    %347 = arith.mulf %346, %343 : vector<4x64xf32>
    %348 = arith.addf %345, %347 : vector<4x64xf32>
    %349 = vector.extract_strided_slice %341 {offsets = [0, 192], sizes = [4, 64], strides = [1, 1]} : vector<4x256xf32> to vector<4x64xf32>
    %350 = math.tanh %348 : vector<4x64xf32>
    %351 = arith.mulf %349, %350 : vector<4x64xf32>
    %c48 = arith.constant 48 : index
    %c0_96 = arith.constant 0 : index
    %352 = vector.load %arg10[%c48, %c0_96] : memref<64x64xf32, #tpu.memory_space<vmem>>, vector<4x64xf32>
    tpu.vector_store %arg10[%c48, %c0_96], %351 {strides = array<i32>} : memref<64x64xf32, #tpu.memory_space<vmem>>, vector<4x64xf32>,
    %353 = vector.extract_strided_slice %195 {offsets = [56, 0], sizes = [4, 256], strides = [1, 1]} : vector<64x256xf32> to vector<4x256xf32>
    %354 = arith.truncf %351 : vector<4x64xf32> to vector<4x64xbf16>
    %cst_97 = arith.constant dense<0.000000e+00> : vector<4x256xf32>
    %355 = tpu.matmul %354, %196, %cst_97 {dimension_numbers = #tpu.dot_dimension_numbers<[1], [0], [0], [1], [0, 0, 1, 1], [], []>} : vector<4x64xbf16>, vector<64x256xbf16>, vector<4x256xf32> -> vector<4x256xf32>
    %356 = arith.addf %353, %355 : vector<4x256xf32>
    %cst_98 = arith.constant 0.000000e+00 : f32
    %357 = vector.broadcast %cst_98 : f32 to vector<4x256xf32>
    %358 = arith.subf %357, %356 : vector<4x256xf32>
    %359 = math.exp %358 : vector<4x256xf32>
    %cst_99 = arith.constant 1.000000e+00 : f32
    %360 = vector.broadcast %cst_99 : f32 to vector<4x256xf32>
    %361 = arith.addf %360, %359 : vector<4x256xf32>
    %cst_100 = arith.constant 1.000000e+00 : f32
    %362 = vector.broadcast %cst_100 : f32 to vector<4x256xf32>
    %363 = arith.divf %362, %361 : vector<4x256xf32>
    %364 = vector.extract_strided_slice %356 {offsets = [0, 128], sizes = [4, 64], strides = [1, 1]} : vector<4x256xf32> to vector<4x64xf32>
    %365 = math.tanh %364 : vector<4x64xf32>
    %366 = vector.extract_strided_slice %363 {offsets = [0, 64], sizes = [4, 64], strides = [1, 1]} : vector<4x256xf32> to vector<4x64xf32>
    %367 = arith.mulf %366, %348 : vector<4x64xf32>
    %368 = vector.extract_strided_slice %363 {offsets = [0, 0], sizes = [4, 64], strides = [1, 1]} : vector<4x256xf32> to vector<4x64xf32>
    %369 = arith.mulf %368, %365 : vector<4x64xf32>
    %370 = arith.addf %367, %369 : vector<4x64xf32>
    %371 = vector.extract_strided_slice %363 {offsets = [0, 192], sizes = [4, 64], strides = [1, 1]} : vector<4x256xf32> to vector<4x64xf32>
    %372 = math.tanh %370 : vector<4x64xf32>
    %373 = arith.mulf %371, %372 : vector<4x64xf32>
    %c56 = arith.constant 56 : index
    %c0_101 = arith.constant 0 : index
    %374 = vector.load %arg10[%c56, %c0_101] : memref<64x64xf32, #tpu.memory_space<vmem>>, vector<4x64xf32>
    tpu.vector_store %arg10[%c56, %c0_101], %373 {strides = array<i32>} : memref<64x64xf32, #tpu.memory_space<vmem>>, vector<4x64xf32>,
    %c0_102 = arith.constant 0 : index
    %c0_103 = arith.constant 0 : index
    %375 = vector.load %arg10[%c0_102, %c0_103] : memref<64x64xf32, #tpu.memory_space<vmem>>, vector<64x64xf32>
    %c128 = arith.constant 128 : index
    %c0_104 = arith.constant 0 : index
    %376 = vector.load %arg3[%c128, %c0_104] : memref<200x32xbf16, #tpu.memory_space<vmem>>, vector<64x32xbf16>
    %377 = vector.extract_strided_slice %0 {offsets = [10, 0], sizes = [1, 32], strides = [1, 1]} : vector<16x256xf32> to vector<1x32xf32>
    %378 = arith.truncf %375 : vector<64x64xf32> to vector<64x64xbf16>
    %cst_105 = arith.constant dense<0.000000e+00> : vector<64x32xf32>
    %379 = tpu.matmul %378, %376, %cst_105 {dimension_numbers = #tpu.dot_dimension_numbers<[1], [0], [0], [1], [0, 0, 1, 1], [], []>} : vector<64x64xbf16>, vector<64x32xbf16>, vector<64x32xf32> -> vector<64x32xf32>
    %380 = vector.broadcast %377 : vector<1x32xf32> to vector<64x32xf32>
    %381 = arith.addf %379, %380 : vector<64x32xf32>
    %cst_106 = arith.constant 0.000000e+00 : f32
    %382 = vector.broadcast %cst_106 : f32 to vector<64x32xf32>
    %383 = arith.maximumf %381, %382 : vector<64x32xf32>
    %c192 = arith.constant 192 : index
    %c0_107 = arith.constant 0 : index
    %384 = vector.load %arg3[%c192, %c0_107] : memref<200x32xbf16, #tpu.memory_space<vmem>>, vector<1x32xbf16>
    %385 = arith.extf %384 : vector<1x32xbf16> to vector<1x32xf32>
    %386 = vector.broadcast %385 : vector<1x32xf32> to vector<64x32xf32>
    %387 = arith.mulf %383, %386 : vector<64x32xf32>
    %cst_108 = arith.constant dense<0.000000e+00> : vector<64xf32>
    %388 = vector.multi_reduction <add>, %387, %cst_108 [1] : vector<64x32xf32> to vector<64xf32>
    %389 = vector.shape_cast %388 : vector<64xf32> to vector<64x1xf32>
    %390 = vector.extract_strided_slice %0 {offsets = [11, 0], sizes = [1, 1], strides = [1, 1]} : vector<16x256xf32> to vector<1x1xf32>
    %391 = vector.broadcast %390 : vector<1x1xf32> to vector<64x1xf32>
    %392 = arith.addf %389, %391 : vector<64x1xf32>
    %c0_109 = arith.constant 0 : index
    %c0_110 = arith.constant 0 : index
    %393 = vector.load %arg9[%c0_109, %c0_110] : memref<64x1xf32, #tpu.memory_space<vmem>>, vector<64x1xf32>
    tpu.vector_store %arg9[%c0_109, %c0_110], %392 {strides = array<i32>} : memref<64x1xf32, #tpu.memory_space<vmem>>, vector<64x1xf32>,
    return
  }
}

</mosaic_0001>

<bundles_post_ra>
// kernel: herdr_forward.1
= control target key start
LH: loop header
LB: loop body
LE: loop exit
PB: predicated region body
PF: predicated region fallthrough
CT: control target
= control target key end

     0   :  { %vm4280_vm0 = vcmask 588800   ;;  %vm4389_vm1 = vcmask 1043456   ;;  %vm4734_vm2 = vcmask 261120   ;;  %vm10087_vm3 = vmmov 0   ;;  %s13311_s3 = inlined_call_operand.vmem [shape: bf16[200,32], index: 3, kind: input, shape index: {}]   ;;  %s13312_s0 = inlined_call_operand.vmem [shape: bf16[3200,128], index: 0, kind: input, shape index: {}]   ;;  %s13313_s4 = inlined_call_operand.vmem [shape: bf16[864,64], index: 4, kind: input, shape index: {}]   ;;  %s13314_s2 = inlined_call_operand.vmem [shape: bf16[576,200], index: 2, kind: input, shape index: {}]   ;;  %s13315_s8 = inlined_call_operand.vmem [shape: f32[16,256], index: 8, kind: input, shape index: {}]   ;;  %s13316_s6 = inlined_call_operand.vmem [shape: bf16[144,256], index: 6, kind: input, shape index: {}]   ;;  %s13317_s5 = inlined_call_operand.vmem [shape: bf16[512,128], index: 5, kind: input, shape index: {}]   ;;  %s13318_s7 = inlined_call_operand.vmem [shape: bf16[24,16], index: 7, kind: input, shape index: {}]   ;;  %s13319_s1 = inlined_call_operand.vmem [shape: f32[64,8], index: 1, kind: input, shape index: {}]   ;;  %s13320_s9 = inlined_call_operand.vmem [shape: f32[64,1], index: 9, kind: output, shape index: {}]  }
   0x1   :  { %v9552_v0 = vld [vmem:[%s13311_s3] sm:$0xff]   ;;  %v9553_v1 = vld [vmem:[%s13311_s3 + $0x8] sm:$0xff]   ;;  %v9554_v2 = vld [vmem:[%s13311_s3 + $0x10] sm:$0xff]   ;;  %vm5650_vm4 = vcmask 523264   ;;  %vm6757_vm5 = vcmask 64512   ;;  %vm6862_vm6 = vcmask 130048  }
   0x2   :  { %8775 = vmatprep.subr.bf16.mxu0 %v9552_v0  ;;  %v9555_v3 = vld [vmem:[%s13311_s3 + $0x18] sm:$0xff]   ;;  %v9560_v4 = vld [vmem:[%s13312_s0] sm:$0xff]   ;;  %v9557_v6 = vld [vmem:[%s13311_s3 + $0x28] sm:$0xff]   ;;  %vm7178_vm7 = vcmask 519168   ;;  %vm7902_vm8 = vcmask 7168  }
   0x3   :  { %8776 = vmatpush3.bf16.msra.mxu0 %v9552_v0  ;;  %8791 = vmatprep.mubr.bf16.mxu0 %v9560_v4  ;;  %v9556_v5 = vld [vmem:[%s13311_s3 + $0x20] sm:$0xff]   ;;  %v9558_v7 = vld [vmem:[%s13311_s3 + $0x30] sm:$0xff]   ;;  %v9559_v8 = vld [vmem:[%s13311_s3 + $0x38] sm:$0xff]  }
   0x4   :  { %8777 = vmatprep.subr.bf16.mxu0 %v9553_v1  ;;  %v9561_v9 = vld [vmem:[%s13312_s0 + $0x8] sm:$0xff]   ;;  %v9562_v10 = vld [vmem:[%s13312_s0 + $0x10] sm:$0xff]   ;;  %v9563_v11 = vld [vmem:[%s13312_s0 + $0x18] sm:$0xff]  }
   0x5   :  { %v9564_v12 = vld [vmem:[%s13312_s0 + $0x20] sm:$0xff]   ;;  %v9565_v13 = vld [vmem:[%s13312_s0 + $0x28] sm:$0xff]   ;;  %v9566_v14 = vld [vmem:[%s13312_s0 + $0x30] sm:$0xff]  }
   0x6   :  { %v9567_v15 = vld [vmem:[%s13312_s0 + $0x38] sm:$0xff]   ;;  %v9568_v16 = vld [vmem:[%s13312_s0 + $0x40] sm:$0xff]   ;;  %v9569_v17 = vld [vmem:[%s13312_s0 + $0x48] sm:$0xff]  }
   0x7   :  { %8778 = vmatpush3.bf16.msra.mxu0 %v9553_v1  ;;  %v9570_v18 = vld [vmem:[%s13312_s0 + $0x50] sm:$0xff]   ;;  %v9571_v19 = vld [vmem:[%s13312_s0 + $0x58] sm:$0xff]   ;;  %v9572_v20 = vld [vmem:[%s13312_s0 + $0x60] sm:$0xff]  }
   0x8   :  { %8779 = vmatprep.subr.bf16.mxu0 %v9554_v2  ;;  %v9573_v21 = vld [vmem:[%s13312_s0 + $0x68] sm:$0xff]   ;;  %v9574_v22 = vld [vmem:[%s13312_s0 + $0x70] sm:$0xff]   ;;  %v9575_v23 = vld [vmem:[%s13312_s0 + $0x78] sm:$0xff]  }
   0x9   :  { %v9576_v24 = vld [vmem:[%s13312_s0 + $0x80] sm:$0xff]   ;;  %v9577_v25 = vld [vmem:[%s13312_s0 + $0x88] sm:$0xff]   ;;  %v9578_v26 = vld [vmem:[%s13312_s0 + $0x90] sm:$0xff]  }
   0xa   :  { %v9579_v27 = vld [vmem:[%s13312_s0 + $0x98] sm:$0xff]   ;;  %v9580_v28 = vld [vmem:[%s13312_s0 + $0xa0] sm:$0xff]   ;;  %v9581_v29 = vld [vmem:[%s13312_s0 + $0xa8] sm:$0xff]  }
   0xb   :  { %8780 = vmatpush3.bf16.msra.mxu0 %v9554_v2  ;;  %v9582_v30 = vld [vmem:[%s13312_s0 + $0xb0] sm:$0xff]   ;;  %v9583_v31 = vld [vmem:[%s13312_s0 + $0xb8] sm:$0xff]   ;;  %v9584_v32 = vld [vmem:[%s13312_s0 + $0xc0] sm:$0xff]  }
   0xc   :  { %8781 = vmatprep.subr.bf16.mxu0 %v9555_v3  ;;  %v9585_v33 = vld [vmem:[%s13312_s0 + $0xc8] sm:$0xff]   ;;  %v9586_v34 = vld [vmem:[%s13312_s0 + $0xd0] sm:$0xff]   ;;  %v9587_v35 = vld [vmem:[%s13312_s0 + $0xd8] sm:$0xff]  }
   0xd   :  { %v9588_v36 = vld [vmem:[%s13312_s0 + $0xe0] sm:$0xff]   ;;  %v9589_v37 = vld [vmem:[%s13312_s0 + $0xe8] sm:$0xff]   ;;  %v9590_v38 = vld [vmem:[%s13312_s0 + $0xf0] sm:$0xff]  }
   0xe   :  { %v9591_v39 = vld [vmem:[%s13312_s0 + $0xf8] sm:$0xff]   ;;  %v9592_v40 = vld [vmem:[%s13312_s0 + $0x100] sm:$0xff]   ;;  %v9593_v41 = vld [vmem:[%s13312_s0 + $0x108] sm:$0xff]  }
   0xf   :  { %8782 = vmatpush3.bf16.msra.mxu0 %v9555_v3  ;;  %v9594_v42 = vld [vmem:[%s13312_s0 + $0x110] sm:$0xff]   ;;  %v9595_v43 = vld [vmem:[%s13312_s0 + $0x118] sm:$0xff]   ;;  %v9596_v44 = vld [vmem:[%s13312_s0 + $0x120] sm:$0xff]  }
  0x10   :  { %8783 = vmatprep.subr.bf16.mxu0 %v9556_v5  ;;  %v9597_v45 = vld [vmem:[%s13312_s0 + $0x128] sm:$0xff]   ;;  %v9598_v46 = vld [vmem:[%s13312_s0 + $0x130] sm:$0xff]   ;;  %v9599_v47 = vld [vmem:[%s13312_s0 + $0x138] sm:$0xff]  }
  0x11   :  { %v9600_v48 = vld [vmem:[%s13312_s0 + $0x140] sm:$0xff]   ;;  %v9601_v49 = vld [vmem:[%s13312_s0 + $0x148] sm:$0xff]   ;;  %v9602_v50 = vld [vmem:[%s13312_s0 + $0x150] sm:$0xff]  }
  0x12   :  { %v9603_v51 = vld [vmem:[%s13312_s0 + $0x158] sm:$0xff]   ;;  %v9604_v52 = vld [vmem:[%s13312_s0 + $0x160] sm:$0xff]   ;;  %v9605_v53 = vld [vmem:[%s13312_s0 + $0x168] sm:$0xff]  }
  0x13   :  { %8784 = vmatpush3.bf16.msra.mxu0 %v9556_v5  ;;  %v9606_v54 = vld [vmem:[%s13312_s0 + $0x170] sm:$0xff]   ;;  %v9607_v55 = vld [vmem:[%s13312_s0 + $0x178] sm:$0xff]   ;;  %v9608_v56 = vld [vmem:[%s13312_s0 + $0x180] sm:$0xff]  }
  0x14   :  { %8785 = vmatprep.subr.bf16.mxu0 %v9557_v6  ;;  %v9609_v57 = vld [vmem:[%s13312_s0 + $0x188] sm:$0xff]   ;;  %v9610_v58 = vld [vmem:[%s13312_s0 + $0x190] sm:$0xff]   ;;  %v9611_v59 = vld [vmem:[%s13312_s0 + $0x198] sm:$0xff]  }
  0x15   :  { %v9612_v60 = vld [vmem:[%s13312_s0 + $0x1a0] sm:$0xff]   ;;  %v9613_v61 = vld [vmem:[%s13312_s0 + $0x1a8] sm:$0xff]   ;;  %v9614_v62 = vld [vmem:[%s13312_s0 + $0x1b0] sm:$0xff]  }
  0x16   :  { %v9615_v1 = vld [vmem:[%s13312_s0 + $0x1b8] sm:$0xff]   ;;  %v9616_v3 = vld [vmem:[%s13312_s0 + $0x1c0] sm:$0xff]  }
  0x17   :  { %8786 = vmatpush3.bf16.msra.mxu0 %v9557_v6 }
  0x18   :  { %8787 = vmatprep.subr.bf16.mxu0 %v9558_v7 }
  0x1b   :  { %8788 = vmatpush3.bf16.msra.mxu0 %v9558_v7  ;;  %v9617_v7 = vld [vmem:[%s13312_s0 + $0x1c8] sm:$0xff]  }
  0x1c   :  { %8789 = vmatprep.subr.bf16.mxu0 %v9559_v8 }
  0x1f   :  { %8790 = vmatpush3.bf16.msra.mxu0 %v9559_v8 }
  0x22   :  { %8792 = vmatmul.mubr.bf16.vlgmr.msra.gmra.mrb[0].mxu0 %v9561_v9  ;;  %v9618_v9 = vld [vmem:[%s13312_s0 + $0x1d0] sm:$0xff]  }
  0x23   :  { %8795 = vmatprep.mubr.bf16.mxu0 %v9562_v10 }
  0x2a   :  { %8796 = vmatmul.mubr.bf16.gmra.mrb[4].mxu0 %v9563_v11 }
  0x2b   :  { %8799 = vmatprep.mubr.bf16.mxu0 %v9564_v12 }
  0x32   :  { %8800 = vmatmul.mubr.bf16.gmra.mrb[8].mxu0 %v9565_v13  ;;  %v9619_v13 = vld [vmem:[%s13312_s0 + $0x1d8] sm:$0xff]  }
  0x33   :  { %8803 = vmatprep.mubr.bf16.mxu0 %v9566_v14 }
  0x3a   :  { %8804 = vmatmul.mubr.bf16.gmra.mrb[12].mxu0 %v9567_v15  ;;  %v9620_v15 = vld [vmem:[%s13312_s0 + $0x1e0] sm:$0xff]  }
  0x3b   :  { %8807 = vmatprep.mubr.bf16.mxu0 %v9568_v16 }
  0x42   :  { %8808 = vmatmul.mubr.bf16.gmra.mrb[16].mxu0 %v9569_v17 }
  0x43   :  { %8811 = vmatprep.mubr.bf16.mxu0 %v9570_v18 }
  0x4a   :  { %8812 = vmatmul.mubr.bf16.gmra.mrb[20].mxu0 %v9571_v19  ;;  %v9621_v19 = vld [vmem:[%s13312_s0 + $0x1e8] sm:$0xff]  }
  0x4b   :  { %8815 = vmatprep.mubr.bf16.mxu0 %v9572_v20 }
  0x52   :  { %8816 = vmatmul.mubr.bf16.gmra.mrb[24].mxu0 %v9573_v21  ;;  %v9622_v21 = vld [vmem:[%s13312_s0 + $0x1f0] sm:$0xff]  }
  0x53   :  { %8819 = vmatprep.mubr.bf16.mxu0 %v9574_v22 }
  0x5a   :  { %8820 = vmatmul.mubr.bf16.gmra.mrb[28].mxu0 %v9575_v23 }
  0x5b   :  { %8823 = vmatprep.mubr.bf16.mxu0 %v9576_v24 }
  0x62   :  { %8824 = vmatmul.mubr.bf16.gmra.mrb[32].mxu0 %v9577_v25  ;;  %v9623_v25 = vld [vmem:[%s13312_s0 + $0x1f8] sm:$0xff]  }
  0x63   :  { %8827 = vmatprep.mubr.bf16.mxu0 %v9578_v26 }
  0x6a   :  { %8828 = vmatmul.mubr.bf16.gmra.mrb[36].mxu0 %v9579_v27  ;;  %v9624_v27 = vld [vmem:[%s13312_s0 + $0x200] sm:$0xff]  }
  0x6b   :  { %8831 = vmatprep.mubr.bf16.mxu0 %v9580_v28 }
  0x72   :  { %8832 = vmatmul.mubr.bf16.gmra.mrb[40].mxu0 %v9581_v29 }
  0x73   :  { %8835 = vmatprep.mubr.bf16.mxu0 %v9582_v30 }
  0x7a   :  { %8836 = vmatmul.mubr.bf16.gmra.mrb[44].mxu0 %v9583_v31  ;;  %v9625_v31 = vld [vmem:[%s13312_s0 + $0x208] sm:$0xff]  }
  0x7b   :  { %8839 = vmatprep.mubr.bf16.mxu0 %v9584_v32 }
  0x82   :  { %8840 = vmatmul.mubr.bf16.gmra.mrb[48].mxu0 %v9585_v33  ;;  %v9626_v33 = vld [vmem:[%s13312_s0 + $0x210] sm:$0xff]  }
  0x83   :  { %8843 = vmatprep.mubr.bf16.mxu0 %v9586_v34 }
  0x8a   :  { %8844 = vmatmul.mubr.bf16.gmra.mrb[52].mxu0 %v9587_v35 }
  0x8b   :  { %8847 = vmatprep.mubr.bf16.mxu0 %v9588_v36 }
  0x92   :  { %8848 = vmatmul.mubr.bf16.gmra.mrb[56].mxu0 %v9589_v37 }
  0x93   :  { %8851 = vmatprep.mubr.bf16.mxu0 %v9590_v38  ;;  %v9627_v38 = vld [vmem:[%s13312_s0 + $0x218] sm:$0xff]  }
  0x9a   :  { %8852 = vmatmul.mubr.bf16.gmra.mrb[60].mxu0 %v9591_v39 }
  0x9b   :  { %8855 = vmatprep.mubr.bf16.mxu0 %v9592_v40  ;;  %v9628_v40 = vld [vmem:[%s13312_s0 + $0x220] sm:$0xff]  }
  0xa2   :  { %8856 = vmatmul.mubr.bf16.gmra.mrb[64].mxu0 %v9593_v41 }
  0xa3   :  { %8859 = vmatprep.mubr.bf16.mxu0 %v9594_v42 }
  0xaa   :  { %8860 = vmatmul.mubr.bf16.gmra.mrb[68].mxu0 %v9595_v43 }
  0xab   :  { %8863 = vmatprep.mubr.bf16.mxu0 %v9596_v44 }
  0xb2   :  { %8864 = vmatmul.mubr.bf16.gmra.mrb[72].mxu0 %v9597_v45 }
  0xb3   :  { %8867 = vmatprep.mubr.bf16.mxu0 %v9598_v46 }
  0xba   :  { %8868 = vmatmul.mubr.bf16.gmra.mrb[76].mxu0 %v9599_v47  ;;  %v9629_v47 = vld [vmem:[%s13312_s0 + $0x228] sm:$0xff]  }
  0xbb   :  { %8871 = vmatprep.mubr.bf16.mxu0 %v9600_v48 }
  0xc2   :  { %8872 = vmatmul.mubr.bf16.gmra.mrb[80].mxu0 %v9601_v49 }
  0xc3   :  { %8875 = vmatprep.mubr.bf16.mxu0 %v9602_v50  ;;  %v9630_v50 = vld [vmem:[%s13312_s0 + $0x230] sm:$0xff]  }
  0xca   :  { %8876 = vmatmul.mubr.bf16.gmra.mrb[84].mxu0 %v9603_v51 }
  0xcb   :  { %8879 = vmatprep.mubr.bf16.mxu0 %v9604_v52 }
  0xd2   :  { %8880 = vmatmul.mubr.bf16.gmra.mrb[88].mxu0 %v9605_v53 }
  0xd3   :  { %8883 = vmatprep.mubr.bf16.mxu0 %v9606_v54 }
  0xda   :  { %8884 = vmatmul.mubr.bf16.gmra.mrb[92].mxu0 %v9607_v55  ;;  %v9639_v55 = vld [vmem:[%s13312_s0 + $0x278] sm:$0xff]  }
  0xdb   :  { %8887 = vmatprep.mubr.bf16.mxu0 %v9608_v56 }
  0xe2   :  { %8888 = vmatmul.mubr.bf16.gmra.mrb[96].mxu0 %v9609_v57  ;;  %v9631_v57 = vld [vmem:[%s13312_s0 + $0x238] sm:$0xff]  }
  0xe3   :  { %8891 = vmatprep.mubr.bf16.mxu0 %v9610_v58 }
  0xea   :  { %8892 = vmatmul.mubr.bf16.gmra.mrb[100].mxu0 %v9611_v59 }
  0xeb   :  { %8895 = vmatprep.mubr.bf16.mxu0 %v9612_v60  ;;  %v9632_v60 = vld [vmem:[%s13312_s0 + $0x240] sm:$0xff]  }
  0xf2   :  { %8896 = vmatmul.mubr.bf16.gmra.mrb[104].mxu0 %v9613_v61 }
  0xf3   :  { %8899 = vmatprep.mubr.bf16.mxu0 %v9614_v62 }
  0xf5   :  { %v10328_v63 = vpop.f32.mrb[0].mxu0 }
  0xf6   :  { %v10330_v0 = vpop.f32.mrb[1].mxu0 }
  0xf7   :  { %v10335_v2 = vpop.f32.mrb[2].mxu0 }
  0xf8   :  { %v10340_v4 = vpop.f32.mrb[3].mxu0 }
  0xfa   :  { %8900 = vmatmul.mubr.bf16.gmra.mrb[108].mxu0 %v9615_v1 }
  0xfb   :  { %8903 = vmatprep.mubr.bf16.mxu0 %v9616_v3 }
  0xfd   :  { %v10342_v5 = vpop.f32.mrb[4].mxu0 }
  0xfe   :  { %v10344_v6 = vpop.f32.mrb[5].mxu0 }
  0xff   :  { %v10349_v8 = vpop.f32.mrb[6].mxu0 }
 0x100   :  { %v10354_v10 = vpop.f32.mrb[7].mxu0 }
 0x102   :  { %8904 = vmatmul.mubr.bf16.gmra.mrb[112].mxu0 %v9617_v7  ;;  %v9637_v7 = vld [vmem:[%s13312_s0 + $0x268] sm:$0xff]  }
 0x103   :  { %8907 = vmatprep.mubr.bf16.mxu0 %v9618_v9 }
 0x105   :  { %v10356_v11 = vpop.f32.mrb[8].mxu0 }
 0x106   :  { %v10358_v12 = vpop.f32.mrb[9].mxu0 }
 0x107   :  { %v10363_v14 = vpop.f32.mrb[10].mxu0 }
 0x108   :  { %v10368_v16 = vpop.f32.mrb[11].mxu0 }
 0x10a   :  { %8908 = vmatmul.mubr.bf16.gmra.mrb[116].mxu0 %v9619_v13  ;;  %v9633_v13 = vld [vmem:[%s13312_s0 + $0x248] sm:$0xff]  }
 0x10b   :  { %8911 = vmatprep.mubr.bf16.mxu0 %v9620_v15 }
 0x10d   :  { %v10370_v17 = vpop.f32.mrb[12].mxu0 }
 0x10e   :  { %v10372_v18 = vpop.f32.mrb[13].mxu0 }
 0x10f   :  { %v10377_v20 = vpop.f32.mrb[14].mxu0 }
 0x110   :  { %v10382_v22 = vpop.f32.mrb[15].mxu0 }
 0x112   :  { %8912 = vmatmul.mubr.bf16.gmra.mrb[120].mxu0 %v9621_v19 }
 0x113   :  { %8915 = vmatprep.mubr.bf16.mxu0 %v9622_v21  ;;  %v9634_v21 = vld [vmem:[%s13312_s0 + $0x250] sm:$0xff]  }
 0x115   :  { %v10384_v23 = vpop.f32.mrb[16].mxu0 }
 0x116   :  { %v10386_v24 = vpop.f32.mrb[17].mxu0 }
 0x117   :  { %v10391_v26 = vpop.f32.mrb[18].mxu0 }
 0x118   :  { %v10396_v28 = vpop.f32.mrb[19].mxu0 }
 0x11a   :  { %8916 = vmatmul.mubr.bf16.gmra.mrb[124].mxu0 %v9623_v25 }
 0x11b   :  { %8919 = vmatprep.mubr.bf16.mxu0 %v9624_v27 }
 0x11d   :  { %v10398_v29 = vpop.f32.mrb[20].mxu0 }
 0x11e   :  { %v10400_v30 = vpop.f32.mrb[21].mxu0 }
 0x11f   :  { %v10405_v32 = vpop.f32.mrb[22].mxu0 }
 0x120   :  { %v10410_v34 = vpop.f32.mrb[23].mxu0 }
 0x122   :  { %8920 = vmatmul.mubr.bf16.gmra.mrb[128].mxu0 %v9625_v31 }
 0x123   :  { %8923 = vmatprep.mubr.bf16.mxu0 %v9626_v33 }
 0x125   :  { %v10412_v35 = vpop.f32.mrb[24].mxu0 }
 0x126   :  { %v3515_v36 = vmax.f32 %v10340_v4, %v10412_v35  ;;  %v10416_v37 = vpop.f32.mrb[25].mxu0  ;;  %v9641_v4 = vld [vmem:[%s13312_s0 + $0x288] sm:$0xff]  }
 0x127   :  { %v10421_v39 = vpop.f32.mrb[26].mxu0 }
 0x128   :  { %v3516_v41 = vmax.f32 %v10328_v63, %v10421_v39  ;;  %v10428_v42 = vpop.f32.mrb[27].mxu0 }
 0x129   :  { %v3514_v43 = vmax.f32 %v10330_v0, %v10428_v42 }
 0x12a   :  { %8924 = vmatmul.mubr.bf16.gmra.mrb[132].mxu0 %v9627_v38 }
 0x12b   :  { %8927 = vmatprep.mubr.bf16.mxu0 %v9628_v40 }
 0x12d   :  { %v10432_v44 = vpop.f32.mrb[28].mxu0 }
 0x12e   :  { %v3519_v45 = vmax.f32 %v10354_v10, %v10432_v44  ;;  %v10436_v46 = vpop.f32.mrb[29].mxu0  ;;  %v9643_v10 = vld [vmem:[%s13312_s0 + $0x298] sm:$0xff]  }
 0x12f   :  { %v3517_v48 = vmax.f32 %v10335_v2, %v10436_v46  ;;  %v10443_v49 = vpop.f32.mrb[30].mxu0  ;;  %v9644_v46 = vld [vmem:[%s13312_s0 + $0x2a0] sm:$0xff]  }
 0x130   :  { %v10450_v52 = vpop.f32.mrb[31].mxu0  ;;  %v13321_v44 = vmax.f32 %v10342_v5, %v10443_v49 }
 0x131   :  { %v3518_v53 = vmax.f32 %v10344_v6, %v10450_v52 }
 0x132   :  { %8928 = vmatmul.mubr.bf16.gmra.mrb[136].mxu0 %v9629_v47  ;;  %v9635_v47 = vld [vmem:[%s13312_s0 + $0x258] sm:$0xff]  }
 0x133   :  { %8931 = vmatprep.mubr.bf16.mxu0 %v9630_v50 }
 0x135   :  { %v10454_v54 = vpop.f32.mrb[32].mxu0 }
 0x136   :  { %v10458_v56 = vpop.f32.mrb[33].mxu0 }
 0x137   :  { %v10465_v59 = vpop.f32.mrb[34].mxu0 }
 0x138   :  { %v10472_v62 = vpop.f32.mrb[35].mxu0 }
 0x139   :  { %v3522_v1 = vmax.f32 %v10358_v12, %v10472_v62  ;;  %v13322_v12 = vmax.f32 %v10368_v16, %v10454_v54  ;;  %v13323_v62 = vmax.f32 %v10349_v8, %v10458_v56  ;;  %v9645_v16 = vld [vmem:[%s13312_s0 + $0x2a8] sm:$0xff]   ;;  %v13325_v54 = vmax.f32 %v10356_v11, %v10465_v59  ;;  %v9646_v56 = vld [vmem:[%s13312_s0 + $0x2b0] sm:$0xff]  }
 0x13a   :  { %8932 = vmatmul.mubr.bf16.gmra.mrb[140].mxu0 %v9631_v57 }
 0x13b   :  { %8935 = vmatprep.mubr.bf16.mxu0 %v9632_v60  ;;  %v9636_v60 = vld [vmem:[%s13312_s0 + $0x260] sm:$0xff]  }
 0x13d   :  { %v10476_v3 = vpop.f32.mrb[36].mxu0 }
 0x13e   :  { %v10480_v9 = vpop.f32.mrb[37].mxu0 }
 0x13f   :  { %v10487_v19 = vpop.f32.mrb[38].mxu0 }
 0x140   :  { %v10494_v27 = vpop.f32.mrb[39].mxu0 }
 0x141   :  { %v13324_v49 = vmax.f32 %v10372_v18, %v10494_v27  ;;  %v13326_v18 = vmax.f32 %v10382_v22, %v10476_v3  ;;  %v9647_v22 = vld [vmem:[%s13312_s0 + $0x2b8] sm:$0xff]   ;;  %v13329_v3 = vmax.f32 %v10370_v17, %v10487_v19 }
 0x142   :  { %8936 = vmatmul.mubr.bf16.gmra.mrb[144].mxu0 %v9633_v13 }
 0x143   :  { %8939 = vmatprep.mubr.bf16.mxu0 %v9634_v21 }
 0x145   :  { %v10498_v33 = vpop.f32.mrb[40].mxu0 }
 0x146   :  { %v10502_v40 = vpop.f32.mrb[41].mxu0 }
 0x147   :  { %v10509_v57 = vpop.f32.mrb[42].mxu0 }
 0x148   :  { %v10516_v21 = vpop.f32.mrb[43].mxu0 }
 0x149   :  { %v13328_v59 = vmax.f32 %v10386_v24, %v10516_v21  ;;  %v13330_v24 = vmax.f32 %v10396_v28, %v10498_v33  ;;  %v9649_v28 = vld [vmem:[%s13312_s0 + $0x2c8] sm:$0xff]   ;;  %v13332_v33 = vmax.f32 %v10384_v23, %v10509_v57 }
 0x14a   :  { %8940 = vmatmul.mubr.bf16.gmra.mrb[148].mxu0 %v9635_v47  ;;  %v9638_v47 = vld [vmem:[%s13312_s0 + $0x270] sm:$0xff]  }
 0x14b   :  { %8943 = vmatprep.mubr.bf16.mxu0 %v9636_v60 }
 0x14d   :  { %v10520_v25 = vpop.f32.mrb[44].mxu0 }
 0x14e   :  { %v10524_v15 = vpop.f32.mrb[45].mxu0 }
 0x14f   :  { %v10531_v61 = vpop.f32.mrb[46].mxu0 }
 0x150   :  { %v10538_v38 = vpop.f32.mrb[47].mxu0 }
 0x151   :  { %v3534_v50 = vmax.f32 %v10400_v30, %v10538_v38  ;;  %v13333_v30 = vmax.f32 %v10410_v34, %v10520_v25  ;;  %v9651_v34 = vld [vmem:[%s13312_s0 + $0x2d8] sm:$0xff]   ;;  %v13335_v25 = vmax.f32 %v10398_v29, %v10531_v61 }
 0x152   :  { %8944 = vmatmul.mubr.bf16.gmra.mrb[152].mxu0 %v9637_v7  ;;  %v9640_v7 = vld [vmem:[%s13312_s0 + $0x280] sm:$0xff]  }
 0x153   :  { %8947 = vmatprep.mubr.bf16.mxu0 %v9638_v47 }
 0x155   :  { %v8841_v31 = vpop.f32.mrb[48].mxu0 }
 0x156   :  { %v10545_v13 = vmax.f32 %v3514_v43, %v8841_v31  ;;  %v10547_v58 = vpop.f32.mrb[49].mxu0 }
 0x157   :  { %v8842_v51 = vpop.f32.mrb[50].mxu0 }
 0x158   :  { %v10560_v0 = vmax.f32 %v3515_v36, %v8842_v51  ;;  %v10562_v42 = vpop.f32.mrb[51].mxu0  ;;  %v9642_v51 = vld [vmem:[%s13312_s0 + $0x290] sm:$0xff]  }
 0x159   :  { %v3538_v43 = vmax.f32 %v10416_v37, %v10562_v42 }
 0x15a   :  { %8948 = vmatmul.mubr.bf16.gmra.mrb[156].mxu0 %v9639_v55 }
 0x15b   :  { %8951 = vmatprep.mubr.bf16.mxu0 %v9640_v7 }
 0x15d   :  { %v8845_v31 = vpop.f32.mrb[52].mxu0 }
 0x15e   :  { %v10569_v47 = vmax.f32 %v3518_v53, %v8845_v31  ;;  %v1943_v60 = vpop.f32.mrb[53].mxu0 }
 0x15f   :  { %v10577_v35 = vmax.f32 %v3516_v41, %v1943_v60  ;;  %v8846_v36 = vpop.f32.mrb[54].mxu0 }
 0x160   :  { %v10585_v6 = vmax.f32 %v3519_v45, %v8846_v36  ;;  %v1946_v52 = vpop.f32.mrb[55].mxu0  ;;  %v13327_v36 = vmax.f32 %v10363_v14, %v10480_v9  ;;  %v9648_v9 = vld [vmem:[%s13312_s0 + $0x2c0] sm:$0xff]  }
 0x161   :  { %v10590_v53 = vmax.f32 %v3517_v48, %v1946_v52 }
 0x162   :  { %8952 = vmatmul.mubr.bf16.gmra.mrb[160].mxu0 %v9641_v4 }
 0x163   :  { %8955 = vmatprep.mubr.bf16.mxu0 %v9642_v51 }
 0x165   :  { %v8849_v63 = vpop.f32.mrb[56].mxu0 }
 0x166   :  { %v10595_v39 = vmax.f32 %v3522_v1, %v8849_v63  ;;  %v1959_v41 = vpop.f32.mrb[57].mxu0 }
 0x167   :  { %v10603_v45 = vmax.f32 %v13321_v44, %v1959_v41  ;;  %v8850_v2 = vpop.f32.mrb[58].mxu0  ;;  %v13331_v44 = vmax.f32 %v10377_v20, %v10502_v40  ;;  %v9650_v40 = vld [vmem:[%s13312_s0 + $0x2d0] sm:$0xff]  }
 0x168   :  { %v10611_v48 = vmax.f32 %v13322_v12, %v8850_v2  ;;  %v1962_v55 = vpop.f32.mrb[59].mxu0 }
 0x169   :  { %v10616_v1 = vmax.f32 %v13323_v62, %v1962_v55  ;;  %v13334_v55 = vmax.f32 %v10391_v26, %v10524_v15  ;;  %v9652_v15 = vld [vmem:[%s13312_s0 + $0x2e0] sm:$0xff]  }
 0x16a   :  { %8956 = vmatmul.mubr.bf16.gmra.mrb[164].mxu0 %v9643_v10 }
 0x16b   :  { %8959 = vmatprep.mubr.bf16.mxu0 %v9644_v46 }
 0x16d   :  { %v8853_v5 = vpop.f32.mrb[60].mxu0 }
 0x16e   :  { %v10621_v60 = vmax.f32 %v13324_v49, %v8853_v5  ;;  %v1975_v7 = vpop.f32.mrb[61].mxu0 }
 0x16f   :  { %v10629_v31 = vmax.f32 %v13325_v54, %v1975_v7  ;;  %v8854_v8 = vpop.f32.mrb[62].mxu0  ;;  %v9653_v54 = vld [vmem:[%s13312_s0 + $0x2e8] sm:$0xff]  }
 0x170   :  { %v10637_v27 = vmax.f32 %v13326_v18, %v8854_v8  ;;  %v1978_v4 = vpop.f32.mrb[63].mxu0 }
 0x171   :  { %v10642_v51 = vmax.f32 %v13327_v36, %v1978_v4 }
 0x172   :  { %8960 = vmatmul.mubr.bf16.gmra.mrb[168].mxu0 %v9645_v16 }
 0x173   :  { %8963 = vmatprep.mubr.bf16.mxu0 %v9646_v56 }
 0x175   :  { %v8857_v11 = vpop.f32.mrb[64].mxu0 }
 0x176   :  { %v10647_v52 = vmax.f32 %v13328_v59, %v8857_v11  ;;  %v1991_v63 = vpop.f32.mrb[65].mxu0  ;;  %v9665_v11 = vld [vmem:[%s13312_s0 + $0x348] sm:$0xff]  }
 0x177   :  { %v10655_v41 = vmax.f32 %v13329_v3, %v1991_v63  ;;  %v8858_v14 = vpop.f32.mrb[66].mxu0  ;;  %v9655_v63 = vld [vmem:[%s13312_s0 + $0x2f8] sm:$0xff]  }
 0x178   :  { %v10663_v21 = vmax.f32 %v13330_v24, %v8858_v14  ;;  %v1994_v10 = vpop.f32.mrb[67].mxu0  ;;  %v9656_v14 = vld [vmem:[%s13312_s0 + $0x300] sm:$0xff]  }
 0x179   :  { %v10668_v2 = vmax.f32 %v13331_v44, %v1994_v10 }
 0x17a   :  { %8964 = vmatmul.mubr.bf16.gmra.mrb[172].mxu0 %v9647_v22 }
 0x17b   :  { %8967 = vmatprep.mubr.bf16.mxu0 %v9648_v9 }
 0x17d   :  { %v8861_v17 = vpop.f32.mrb[68].mxu0 }
 0x17e   :  { %v10673_v19 = vmax.f32 %v3534_v50, %v8861_v17  ;;  %v2007_v46 = vpop.f32.mrb[69].mxu0  ;;  %v9663_v17 = vld [vmem:[%s13312_s0 + $0x338] sm:$0xff]  }
 0x17f   :  { %v10681_v12 = vmax.f32 %v13332_v33, %v2007_v46  ;;  %v8862_v20 = vpop.f32.mrb[70].mxu0 }
 0x180   :  { %v10689_v38 = vmax.f32 %v13333_v30, %v8862_v20  ;;  %v2010_v50 = vpop.f32.mrb[71].mxu0 }
 0x181   :  { %v10694_v62 = vmax.f32 %v13334_v55, %v2010_v50 }
 0x182   :  { %8968 = vmatmul.mubr.bf16.gmra.mrb[176].mxu0 %v9649_v28  ;;  %v9657_v28 = vld [vmem:[%s13312_s0 + $0x308] sm:$0xff]  }
 0x183   :  { %8971 = vmatprep.mubr.bf16.mxu0 %v9650_v40  ;;  %v9658_v40 = vld [vmem:[%s13312_s0 + $0x310] sm:$0xff]  }
 0x185   :  { %v8865_v23 = vpop.f32.mrb[72].mxu0 }
 0x186   :  { %v10699_v57 = vmax.f32 %v3538_v43, %v8865_v23  ;;  %v2023_v5 = vpop.f32.mrb[73].mxu0  ;;  %v13336_v43 = vmax.f32 %v10405_v32, %v10547_v58  ;;  %v9654_v32 = vld [vmem:[%s13312_s0 + $0x2f0] sm:$0xff]  }
 0x187   :  { %v10707_v49 = vmax.f32 %v13335_v25, %v2023_v5  ;;  %v10709_v26 = vpop.f32.mrb[74].mxu0  ;;  %v9659_v25 = vld [vmem:[%s13312_s0 + $0x318] sm:$0xff]  }
 0x188   :  { %v3564_v37 = vmax.f32 %v10545_v13, %v10709_v26  ;;  %v2026_v42 = vpop.f32.mrb[75].mxu0 }
 0x189   :  { %v10719_v7 = vmax.f32 %v13336_v43, %v2026_v42  ;;  %v9660_v43 = vld [vmem:[%s13312_s0 + $0x320] sm:$0xff]  }
 0x18a   :  { %8972 = vmatmul.mubr.bf16.gmra.mrb[180].mxu0 %v9651_v34 }
 0x18b   :  { %8975 = vmatprep.mubr.bf16.mxu0 %v9652_v15  ;;  %v9661_v15 = vld [vmem:[%s13312_s0 + $0x328] sm:$0xff]  }
 0x18d   :  { %v10721_v29 = vpop.f32.mrb[76].mxu0 }
 0x18e   :  { %v3567_v61 = vmax.f32 %v10590_v53, %v10721_v29  ;;  %v10725_v16 = vpop.f32.mrb[77].mxu0  ;;  %v9667_v53 = vld [vmem:[%s13312_s0 + $0x358] sm:$0xff]  }
 0x18f   :  { %v3565_v8 = vmax.f32 %v10560_v0, %v10725_v16  ;;  %v10732_v56 = vpop.f32.mrb[78].mxu0  ;;  %v9668_v16 = vld [vmem:[%s13312_s0 + $0x360] sm:$0xff]  }
 0x190   :  { %v10739_v18 = vpop.f32.mrb[79].mxu0  ;;  %v13337_v29 = vmax.f32 %v10569_v47, %v10732_v56 }
 0x191   :  { %v3566_v4 = vmax.f32 %v10577_v35, %v10739_v18 }
 0x192   :  { %8976 = vmatmul.mubr.bf16.gmra.mrb[184].mxu0 %v9653_v54 }
 0x193   :  { %8979 = vmatprep.mubr.bf16.mxu0 %v9654_v32 }
 0x195   :  { %v10743_v36 = vpop.f32.mrb[80].mxu0 }
 0x196   :  { %v10747_v59 = vpop.f32.mrb[81].mxu0 }
 0x197   :  { %v10754_v3 = vpop.f32.mrb[82].mxu0 }
 0x198   :  { %v10761_v24 = vpop.f32.mrb[83].mxu0 }
 0x199   :  { %v3570_v10 = vmax.f32 %v10603_v45, %v10761_v24  ;;  %v13338_v45 = vmax.f32 %v10616_v1, %v10743_v36  ;;  %v9669_v1 = vld [vmem:[%s13312_s0 + $0x368] sm:$0xff]   ;;  %v13341_v36 = vmax.f32 %v10595_v39, %v10754_v3 }
 0x19a   :  { %8980 = vmatmul.mubr.bf16.gmra.mrb[188].mxu0 %v9655_v63 }
 0x19b   :  { %8983 = vmatprep.mubr.bf16.mxu0 %v9656_v14 }
 0x19d   :  { %v10765_v44 = vpop.f32.mrb[84].mxu0 }
 0x19e   :  { %v10769_v46 = vpop.f32.mrb[85].mxu0 }
 0x19f   :  { %v10776_v20 = vpop.f32.mrb[86].mxu0 }
 0x1a0   :  { %v10783_v50 = vpop.f32.mrb[87].mxu0 }
 0x1a1   :  { %v13340_v56 = vmax.f32 %v10629_v31, %v10783_v50  ;;  %v13342_v31 = vmax.f32 %v10642_v51, %v10765_v44  ;;  %v9671_v51 = vld [vmem:[%s13312_s0 + $0x378] sm:$0xff]   ;;  %v13345_v44 = vmax.f32 %v10621_v60, %v10776_v20 }
 0x1a2   :  { %8984 = vmatmul.mubr.bf16.gmra.mrb[192].mxu0 %v9657_v28 }
 0x1a3   :  { %8987 = vmatprep.mubr.bf16.mxu0 %v9658_v40 }
 0x1a5   :  { %v10787_v23 = vpop.f32.mrb[88].mxu0 }
 0x1a6   :  { %v10791_v34 = vpop.f32.mrb[89].mxu0 }
 0x1a7   :  { %v10798_v42 = vpop.f32.mrb[90].mxu0 }
 0x1a8   :  { %v10805_v32 = vpop.f32.mrb[91].mxu0 }
 0x1a9   :  { %v13344_v3 = vmax.f32 %v10655_v41, %v10805_v32  ;;  %v13346_v41 = vmax.f32 %v10668_v2, %v10787_v23  ;;  %v9673_v2 = vld [vmem:[%s13312_s0 + $0x388] sm:$0xff]   ;;  %v13349_v23 = vmax.f32 %v10647_v52, %v10798_v42 }
 0x1aa   :  { %8988 = vmatmul.mubr.bf16.gmra.mrb[196].mxu0 %v9659_v25  ;;  %v9662_v25 = vld [vmem:[%s13312_s0 + $0x330] sm:$0xff]  }
 0x1ab   :  { %8991 = vmatprep.mubr.bf16.mxu0 %v9660_v43 }
 0x1ad   :  { %v10809_v14 = vpop.f32.mrb[92].mxu0 }
 0x1ae   :  { %v10813_v40 = vpop.f32.mrb[93].mxu0 }
 0x1af   :  { %v10820_v5 = vpop.f32.mrb[94].mxu0 }
 0x1b0   :  { %v10827_v30 = vpop.f32.mrb[95].mxu0 }
 0x1b1   :  { %v13348_v20 = vmax.f32 %v10681_v12, %v10827_v30  ;;  %v13350_v12 = vmax.f32 %v10694_v62, %v10809_v14  ;;  %v9675_v62 = vld [vmem:[%s13312_s0 + $0x398] sm:$0xff]   ;;  %v13352_v14 = vmax.f32 %v10673_v19, %v10820_v5 }
 0x1b2   :  { %8992 = vmatmul.mubr.bf16.gmra.mrb[200].mxu0 %v9661_v15  ;;  %v9664_v15 = vld [vmem:[%s13312_s0 + $0x340] sm:$0xff]  }
 0x1b3   :  { %8995 = vmatprep.mubr.bf16.mxu0 %v9662_v25 }
 0x1b5   :  { %v10831_v63 = vpop.f32.mrb[96].mxu0 }
 0x1b6   :  { %v10835_v33 = vpop.f32.mrb[97].mxu0 }
 0x1b7   :  { %v10842_v9 = vpop.f32.mrb[98].mxu0 }
 0x1b8   :  { %v10849_v28 = vpop.f32.mrb[99].mxu0 }
 0x1b9   :  { %v3586_v54 = vmax.f32 %v10707_v49, %v10849_v28  ;;  %v13353_v49 = vmax.f32 %v10719_v7, %v10831_v63  ;;  %v9677_v7 = vld [vmem:[%s13312_s0 + $0x3a8] sm:$0xff]   ;;  %v13355_v63 = vmax.f32 %v10699_v57, %v10842_v9 }
 0x1ba   :  { %8996 = vmatmul.mubr.bf16.gmra.mrb[204].mxu0 %v9663_v17  ;;  %v9666_v17 = vld [vmem:[%s13312_s0 + $0x350] sm:$0xff]  }
 0x1bb   :  { %8999 = vmatprep.mubr.bf16.mxu0 %v9664_v15 }
 0x1bd   :  { %v8893_v55 = vpop.f32.mrb[100].mxu0 }
 0x1be   :  { %v10856_v43 = vmax.f32 %v3566_v4, %v8893_v55  ;;  %v2135_v22 = vpop.f32.mrb[101].mxu0 }
 0x1bf   :  { %v10864_v25 = vmax.f32 %v3564_v37, %v2135_v22  ;;  %v8894_v58 = vpop.f32.mrb[102].mxu0 }
 0x1c0   :  { %v10872_v35 = vmax.f32 %v3567_v61, %v8894_v58  ;;  %v2138_v18 = vpop.f32.mrb[103].mxu0 }
 0x1c1   :  { %v10877_v4 = vmax.f32 %v3565_v8, %v2138_v18 }
 0x1c2   :  { %9000 = vmatmul.mubr.bf16.gmra.mrb[208].mxu0 %v9665_v11  ;;  %v13339_v11 = vmax.f32 %v10585_v6, %v10747_v59  ;;  %v9670_v59 = vld [vmem:[%s13312_s0 + $0x370] sm:$0xff]  }
 0x1c3   :  { %9003 = vmatprep.mubr.bf16.mxu0 %v9666_v17  ;;  %v13343_v17 = vmax.f32 %v10611_v48, %v10769_v46  ;;  %v9672_v46 = vld [vmem:[%s13312_s0 + $0x380] sm:$0xff]  }
 0x1c5   :  { %v8897_v13 = vpop.f32.mrb[104].mxu0 }
 0x1c6   :  { %v10882_v26 = vmax.f32 %v3570_v10, %v8897_v13  ;;  %v2151_v37 = vpop.f32.mrb[105].mxu0 }
 0x1c7   :  { %v10890_v61 = vmax.f32 %v13337_v29, %v2151_v37  ;;  %v8898_v0 = vpop.f32.mrb[106].mxu0 }
 0x1c8   :  { %v10898_v8 = vmax.f32 %v13338_v45, %v8898_v0  ;;  %v2154_v58 = vpop.f32.mrb[107].mxu0  ;;  %v13347_v0 = vmax.f32 %v10637_v27, %v10791_v34  ;;  %v9674_v34 = vld [vmem:[%s13312_s0 + $0x390] sm:$0xff]  }
 0x1c9   :  { %v10903_v22 = vmax.f32 %v13339_v11, %v2154_v58 }
 0x1ca   :  { %9004 = vmatmul.mubr.bf16.gmra.mrb[212].mxu0 %v9667_v53 }
 0x1cb   :  { %9007 = vmatprep.mubr.bf16.mxu0 %v9668_v16 }
 0x1cd   :  { %v8901_v47 = vpop.f32.mrb[108].mxu0 }
 0x1ce   :  { %v10908_v24 = vmax.f32 %v13340_v56, %v8901_v47  ;;  %v2167_v10 = vpop.f32.mrb[109].mxu0  ;;  %v13351_v56 = vmax.f32 %v10663_v21, %v10813_v40  ;;  %v9676_v40 = vld [vmem:[%s13312_s0 + $0x3a0] sm:$0xff]  }
 0x1cf   :  { %v10916_v55 = vmax.f32 %v13341_v36, %v2167_v10  ;;  %v8902_v6 = vpop.f32.mrb[110].mxu0 }
 0x1d0   :  { %v10924_v50 = vmax.f32 %v13342_v31, %v8902_v6  ;;  %v2170_v15 = vpop.f32.mrb[111].mxu0  ;;  %v13354_v6 = vmax.f32 %v10689_v38, %v10835_v33  ;;  %v9678_v33 = vld [vmem:[%s13312_s0 + $0x3b0] sm:$0xff]  }
 0x1d1   :  { %v10929_v18 = vmax.f32 %v13343_v17, %v2170_v15 }
 0x1d2   :  { %9008 = vmatmul.mubr.bf16.gmra.mrb[216].mxu0 %v9669_v1 }
 0x1d3   :  { %9011 = vmatprep.mubr.bf16.mxu0 %v9670_v59 }
 0x1d5   :  { %v8905_v39 = vpop.f32.mrb[112].mxu0 }
 0x1d6   :  { %v10934_v13 = vmax.f32 %v13344_v3, %v8905_v39  ;;  %v2183_v37 = vpop.f32.mrb[113].mxu0 }
 0x1d7   :  { %v10942_v53 = vmax.f32 %v13345_v44, %v2183_v37  ;;  %v8906_v48 = vpop.f32.mrb[114].mxu0 }
 0x1d8   :  { %v10950_v32 = vmax.f32 %v13346_v41, %v8906_v48  ;;  %v2186_v29 = vpop.f32.mrb[115].mxu0 }
 0x1d9   :  { %v10955_v16 = vmax.f32 %v13347_v0, %v2186_v29 }
 0x1da   :  { %9012 = vmatmul.mubr.bf16.gmra.mrb[220].mxu0 %v9671_v51  ;;  %v9679_v51 = vld [vmem:[%s13312_s0 + $0x3b8] sm:$0xff]  }
 0x1db   :  { %9015 = vmatprep.mubr.bf16.mxu0 %v9672_v46  ;;  %v9680_v46 = vld [vmem:[%s13312_s0 + $0x3c0] sm:$0xff]  }
 0x1dd   :  { %v8909_v60 = vpop.f32.mrb[116].mxu0 }
 0x1de   :  { %v10960_v45 = vmax.f32 %v13348_v20, %v8909_v60  ;;  %v2199_v58 = vpop.f32.mrb[117].mxu0  ;;  %v9689_v20 = vld [vmem:[%s13312_s0 + $0x408] sm:$0xff]  }
 0x1df   :  { %v10968_v11 = vmax.f32 %v13349_v23, %v2199_v58  ;;  %v8910_v27 = vpop.f32.mrb[118].mxu0 }
 0x1e0   :  { %v10976_v30 = vmax.f32 %v13350_v12, %v8910_v27  ;;  %v2202_v47 = vpop.f32.mrb[119].mxu0 }
 0x1e1   :  { %v10981_v10 = vmax.f32 %v13351_v56, %v2202_v47 }
 0x1e2   :  { %9016 = vmatmul.mubr.bf16.gmra.mrb[224].mxu0 %v9673_v2  ;;  %v9681_v2 = vld [vmem:[%s13312_s0 + $0x3c8] sm:$0xff]  }
 0x1e3   :  { %9019 = vmatprep.mubr.bf16.mxu0 %v9674_v34  ;;  %v9682_v34 = vld [vmem:[%s13312_s0 + $0x3d0] sm:$0xff]  }
 0x1e5   :  { %v8913_v52 = vpop.f32.mrb[120].mxu0 }
 0x1e6   :  { %v10986_v42 = vmax.f32 %v3586_v54, %v8913_v52  ;;  %v2215_v1 = vpop.f32.mrb[121].mxu0 }
 0x1e7   :  { %v10994_v36 = vmax.f32 %v13352_v14, %v2215_v1  ;;  %v8914_v21 = vpop.f32.mrb[122].mxu0  ;;  %v9683_v14 = vld [vmem:[%s13312_s0 + $0x3d8] sm:$0xff]  }
 0x1e8   :  { %v11002_v54 = vmax.f32 %v13353_v49, %v8914_v21  ;;  %v2218_v28 = vpop.f32.mrb[123].mxu0  ;;  %v9684_v49 = vld [vmem:[%s13312_s0 + $0x3e0] sm:$0xff]   ;;  %v9687_v1 = vld [vmem:[%s13312_s0 + $0x3f8] sm:$0xff]  }
 0x1e9   :  { %v11007_v59 = vmax.f32 %v13354_v6, %v2218_v28 }
 0x1ea   :  { %9020 = vmatmul.mubr.bf16.gmra.mrb[228].mxu0 %v9675_v62 }
 0x1eb   :  { %9023 = vmatprep.mubr.bf16.mxu0 %v9676_v40 }
 0x1ed   :  { %v11009_v19 = vpop.f32.mrb[124].mxu0 }
 0x1ee   :  { %v3615_v5 = vmax.f32 %v10877_v4, %v11009_v19  ;;  %v2231_v31 = vpop.f32.mrb[125].mxu0  ;;  %v9691_v4 = vld [vmem:[%s13312_s0 + $0x418] sm:$0xff]  }
 0x1ef   :  { %v11019_v15 = vmax.f32 %v13355_v63, %v2231_v31  ;;  %v11021_v38 = vpop.f32.mrb[126].mxu0 }
 0x1f0   :  { %v3616_v17 = vmax.f32 %v10856_v43, %v11021_v38  ;;  %v11028_v39 = vpop.f32.mrb[127].mxu0 }
 0x1f1   :  { %v3614_v3 = vmax.f32 %v10864_v25, %v11028_v39 }
 0x1f2   :  { %9024 = vmatmul.mubr.bf16.gmra.mrb[232].mxu0 %v9677_v7 }
 0x1f3   :  { %9027 = vmatprep.mubr.bf16.mxu0 %v9678_v33 }
 0x1f5   :  { %v11032_v37 = vpop.f32.mrb[128].mxu0 }
 0x1f6   :  { %v3619_v57 = vmax.f32 %v10903_v22, %v11032_v37  ;;  %v11036_v9 = vpop.f32.mrb[129].mxu0  ;;  %v9693_v22 = vld [vmem:[%s13312_s0 + $0x428] sm:$0xff]  }
 0x1f7   :  { %v3617_v44 = vmax.f32 %v10872_v35, %v11036_v9  ;;  %v11043_v48 = vpop.f32.mrb[130].mxu0  ;;  %v9694_v9 = vld [vmem:[%s13312_s0 + $0x430] sm:$0xff]  }
 0x1f8   :  { %v11050_v29 = vpop.f32.mrb[131].mxu0  ;;  %v13356_v37 = vmax.f32 %v10882_v26, %v11043_v48 }
 0x1f9   :  { %v3618_v0 = vmax.f32 %v10890_v61, %v11050_v29 }
 0x1fa   :  { %9028 = vmatmul.mubr.bf16.gmra.mrb[236].mxu0 %v9679_v51  ;;  %v9685_v51 = vld [vmem:[%s13312_s0 + $0x3e8] sm:$0xff]  }
 0x1fb   :  { %9031 = vmatprep.mubr.bf16.mxu0 %v9680_v46 }
 0x1fd   :  { %v11054_v60 = vpop.f32.mrb[132].mxu0 }
 0x1fe   :  { %v11058_v58 = vpop.f32.mrb[133].mxu0 }
 0x1ff   :  { %v11065_v27 = vpop.f32.mrb[134].mxu0 }
 0x200   :  { %v11072_v47 = vpop.f32.mrb[135].mxu0 }
 0x201   :  { %v3622_v56 = vmax.f32 %v10916_v55, %v11072_v47  ;;  %v13357_v55 = vmax.f32 %v10929_v18, %v11054_v60  ;;  %v13358_v47 = vmax.f32 %v10898_v8, %v11058_v58  ;;  %v9695_v18 = vld [vmem:[%s13312_s0 + $0x438] sm:$0xff]   ;;  %v13360_v60 = vmax.f32 %v10908_v24, %v11065_v27  ;;  %v9696_v58 = vld [vmem:[%s13312_s0 + $0x440] sm:$0xff]  }
 0x202   :  { %9032 = vmatmul.mubr.bf16.gmra.mrb[240].mxu0 %v9681_v2 }
 0x203   :  { %9035 = vmatprep.mubr.bf16.mxu0 %v9682_v34  ;;  %v9686_v34 = vld [vmem:[%s13312_s0 + $0x3f0] sm:$0xff]  }
 0x205   :  { %v11076_v52 = vpop.f32.mrb[136].mxu0 }
 0x206   :  { %v11080_v62 = vpop.f32.mrb[137].mxu0 }
 0x207   :  { %v11087_v40 = vpop.f32.mrb[138].mxu0 }
 0x208   :  { %v11094_v6 = vpop.f32.mrb[139].mxu0 }
 0x209   :  { %v13359_v48 = vmax.f32 %v10942_v53, %v11094_v6  ;;  %v13361_v53 = vmax.f32 %v10955_v16, %v11076_v52  ;;  %v9697_v16 = vld [vmem:[%s13312_s0 + $0x448] sm:$0xff]   ;;  %v13364_v52 = vmax.f32 %v10934_v13, %v11087_v40 }
 0x20a   :  { %9036 = vmatmul.mubr.bf16.gmra.mrb[244].mxu0 %v9683_v14 }
 0x20b   :  { %9039 = vmatprep.mubr.bf16.mxu0 %v9684_v49 }
 0x20d   :  { %v11098_v7 = vpop.f32.mrb[140].mxu0 }
 0x20e   :  { %v11102_v33 = vpop.f32.mrb[141].mxu0 }
 0x20f   :  { %v11109_v2 = vpop.f32.mrb[142].mxu0 }
 0x210   :  { %v11116_v49 = vpop.f32.mrb[143].mxu0 }
 0x211   :  { %v13363_v27 = vmax.f32 %v10968_v11, %v11116_v49  ;;  %v13365_v11 = vmax.f32 %v10981_v10, %v11098_v7  ;;  %v9699_v10 = vld [vmem:[%s13312_s0 + $0x458] sm:$0xff]   ;;  %v13367_v7 = vmax.f32 %v10960_v45, %v11109_v2 }
 0x212   :  { %9040 = vmatmul.mubr.bf16.gmra.mrb[248].mxu0 %v9685_v51  ;;  %v9688_v51 = vld [vmem:[%s13312_s0 + $0x400] sm:$0xff]  }
 0x213   :  { %9043 = vmatprep.mubr.bf16.mxu0 %v9686_v34 }
 0x215   :  { %v11120_v28 = vpop.f32.mrb[144].mxu0 }
 0x216   :  { %v11124_v21 = vpop.f32.mrb[145].mxu0 }
 0x217   :  { %v11131_v12 = vpop.f32.mrb[146].mxu0 }
 0x218   :  { %v11138_v63 = vpop.f32.mrb[147].mxu0 }
 0x219   :  { %v3634_v46 = vmax.f32 %v10994_v36, %v11138_v63  ;;  %v13368_v36 = vmax.f32 %v11007_v59, %v11120_v28  ;;  %v9701_v59 = vld [vmem:[%s13312_s0 + $0x468] sm:$0xff]   ;;  %v13370_v28 = vmax.f32 %v10986_v42, %v11131_v12 }
 0x21a   :  { %9044 = vmatmul.mubr.bf16.gmra.mrb[252].mxu0 %v9687_v1  ;;  %v9690_v1 = vld [vmem:[%s13312_s0 + $0x410] sm:$0xff]  }
 0x21b   :  { %9047 = vmatprep.mubr.bf16.mxu0 %v9688_v51 }
 0x21d   :  { %v8941_v31 = vpop.f32.mrb[148].mxu0 }
 0x21e   :  { %v11145_v14 = vmax.f32 %v3614_v3, %v8941_v31  ;;  %v11147_v23 = vpop.f32.mrb[149].mxu0 }
 0x21f   :  { %v8942_v41 = vpop.f32.mrb[150].mxu0 }
 0x220   :  { %v11160_v25 = vmax.f32 %v3615_v5, %v8942_v41  ;;  %v11162_v39 = vpop.f32.mrb[151].mxu0  ;;  %v9692_v41 = vld [vmem:[%s13312_s0 + $0x420] sm:$0xff]  }
 0x221   :  { %v3638_v3 = vmax.f32 %v11019_v15, %v11162_v39 }
 0x222   :  { %9048 = vmatmul.mubr.bf16.gmra.mrb[0].mxu0 %v9689_v20 }
 0x223   :  { %9051 = vmatprep.mubr.bf16.mxu0 %v9690_v1 }
 0x225   :  { %v8945_v31 = vpop.f32.mrb[152].mxu0 }
 0x226   :  { %v11169_v51 = vmax.f32 %v3618_v0, %v8945_v31  ;;  %v2343_v34 = vpop.f32.mrb[153].mxu0 }
 0x227   :  { %v11177_v19 = vmax.f32 %v3616_v17, %v2343_v34  ;;  %v8946_v5 = vpop.f32.mrb[154].mxu0 }
 0x228   :  { %v11185_v61 = vmax.f32 %v3619_v57, %v8946_v5  ;;  %v2346_v29 = vpop.f32.mrb[155].mxu0  ;;  %v13362_v5 = vmax.f32 %v10924_v50, %v11080_v62  ;;  %v9698_v62 = vld [vmem:[%s13312_s0 + $0x450] sm:$0xff]  }
 0x229   :  { %v11190_v0 = vmax.f32 %v3617_v44, %v2346_v29 }
 0x22a   :  { %9052 = vmatmul.mubr.bf16.gmra.mrb[4].mxu0 %v9691_v4 }
 0x22b   :  { %9055 = vmatprep.mubr.bf16.mxu0 %v9692_v41 }
 0x22d   :  { %v8949_v43 = vpop.f32.mrb[156].mxu0 }
 0x22e   :  { %v11195_v38 = vmax.f32 %v3622_v56, %v8949_v43  ;;  %v2359_v17 = vpop.f32.mrb[157].mxu0 }
 0x22f   :  { %v11203_v57 = vmax.f32 %v13356_v37, %v2359_v17  ;;  %v8950_v35 = vpop.f32.mrb[158].mxu0  ;;  %v13366_v37 = vmax.f32 %v10950_v32, %v11102_v33  ;;  %v9700_v33 = vld [vmem:[%s13312_s0 + $0x460] sm:$0xff]  }
 0x230   :  { %v11211_v44 = vmax.f32 %v13357_v55, %v8950_v35  ;;  %v2362_v20 = vpop.f32.mrb[159].mxu0 }
 0x231   :  { %v11216_v56 = vmax.f32 %v13358_v47, %v2362_v20  ;;  %v13369_v20 = vmax.f32 %v10976_v30, %v11124_v21  ;;  %v9702_v21 = vld [vmem:[%s13312_s0 + $0x470] sm:$0xff]  }
 0x232   :  { %9056 = vmatmul.mubr.bf16.gmra.mrb[8].mxu0 %v9693_v22 }
 0x233   :  { %9059 = vmatprep.mubr.bf16.mxu0 %v9694_v9 }
 0x235   :  { %v8953_v26 = vpop.f32.mrb[160].mxu0 }
 0x236   :  { %v11221_v34 = vmax.f32 %v13359_v48, %v8953_v26  ;;  %v2375_v1 = vpop.f32.mrb[161].mxu0 }
 0x237   :  { %v11229_v31 = vmax.f32 %v13360_v60, %v2375_v1  ;;  %v8954_v8 = vpop.f32.mrb[162].mxu0  ;;  %v9703_v60 = vld [vmem:[%s13312_s0 + $0x478] sm:$0xff]  }
 0x238   :  { %v11237_v6 = vmax.f32 %v13361_v53, %v8954_v8  ;;  %v2378_v4 = vpop.f32.mrb[163].mxu0 }
 0x239   :  { %v11242_v41 = vmax.f32 %v13362_v5, %v2378_v4 }
 0x23a   :  { %9060 = vmatmul.mubr.bf16.gmra.mrb[12].mxu0 %v9695_v18 }
 0x23b   :  { %9063 = vmatprep.mubr.bf16.mxu0 %v9696_v58 }
 0x23d   :  { %v8957_v24 = vpop.f32.mrb[164].mxu0 }
 0x23e   :  { %v11247_v29 = vmax.f32 %v13363_v27, %v8957_v24  ;;  %v2391_v43 = vpop.f32.mrb[165].mxu0  ;;  %v9715_v24 = vld [vmem:[%s13312_s0 + $0x4d8] sm:$0xff]  }
 0x23f   :  { %v11255_v17 = vmax.f32 %v13364_v52, %v2391_v43  ;;  %v8958_v50 = vpop.f32.mrb[166].mxu0  ;;  %v9705_v43 = vld [vmem:[%s13312_s0 + $0x488] sm:$0xff]  }
 0x240   :  { %v11263_v49 = vmax.f32 %v13365_v11, %v8958_v50  ;;  %v2394_v22 = vpop.f32.mrb[167].mxu0  ;;  %v9706_v50 = vld [vmem:[%s13312_s0 + $0x490] sm:$0xff]  }
 0x241   :  { %v11268_v35 = vmax.f32 %v13366_v37, %v2394_v22 }
 0x242   :  { %9064 = vmatmul.mubr.bf16.gmra.mrb[16].mxu0 %v9697_v16 }
 0x243   :  { %9067 = vmatprep.mubr.bf16.mxu0 %v9698_v62 }
 0x245   :  { %v8961_v13 = vpop.f32.mrb[168].mxu0 }
 0x246   :  { %v11273_v40 = vmax.f32 %v3634_v46, %v8961_v13  ;;  %v2407_v9 = vpop.f32.mrb[169].mxu0  ;;  %v9713_v13 = vld [vmem:[%s13312_s0 + $0x4c8] sm:$0xff]  }
 0x247   :  { %v11281_v55 = vmax.f32 %v13367_v7, %v2407_v9  ;;  %v8962_v32 = vpop.f32.mrb[170].mxu0 }
 0x248   :  { %v11289_v63 = vmax.f32 %v13368_v36, %v8962_v32  ;;  %v2410_v46 = vpop.f32.mrb[171].mxu0 }
 0x249   :  { %v11294_v47 = vmax.f32 %v13369_v20, %v2410_v46 }
 0x24a   :  { %9068 = vmatmul.mubr.bf16.gmra.mrb[20].mxu0 %v9699_v10  ;;  %v9707_v10 = vld [vmem:[%s13312_s0 + $0x498] sm:$0xff]  }
 0x24b   :  { %9071 = vmatprep.mubr.bf16.mxu0 %v9700_v33  ;;  %v9708_v33 = vld [vmem:[%s13312_s0 + $0x4a0] sm:$0xff]  }
 0x24d   :  { %v8965_v45 = vpop.f32.mrb[172].mxu0 }
 0x24e   :  { %v11299_v2 = vmax.f32 %v3638_v3, %v8965_v45  ;;  %v2423_v26 = vpop.f32.mrb[173].mxu0  ;;  %v13371_v3 = vmax.f32 %v11002_v54, %v11147_v23  ;;  %v9704_v54 = vld [vmem:[%s13312_s0 + $0x480] sm:$0xff]   ;;  %v9739_v45 = vld [vmem:[%s13313_s4 + $0x10] sm:$0xff]  }
 0x24f   :  { %v11307_v48 = vmax.f32 %v13370_v28, %v2423_v26  ;;  %v11309_v30 = vpop.f32.mrb[174].mxu0  ;;  %9191 = vmatprep.subr.bf16.mxu0 %v9739_v45 }
 0x250   :  { %v3664_v15 = vmax.f32 %v11145_v14, %v11309_v30  ;;  %v2426_v39 = vpop.f32.mrb[175].mxu0  ;;  %9192 = vmatpush3.bf16.msra.mxu0 %v9739_v45 }
 0x251   :  { %v11319_v1 = vmax.f32 %v13371_v3, %v2426_v39  ;;  %v9711_v39 = vld [vmem:[%s13312_s0 + $0x4b8] sm:$0xff]  }
 0x252   :  { %9072 = vmatmul.mubr.bf16.gmra.mrb[24].mxu0 %v9701_v59 }
 0x253   :  { %9075 = vmatprep.mubr.bf16.mxu0 %v9702_v21  ;;  %v9709_v21 = vld [vmem:[%s13312_s0 + $0x4a8] sm:$0xff]  }
 0x255   :  { %v11321_v42 = vpop.f32.mrb[176].mxu0 }
 0x256   :  { %v3667_v12 = vmax.f32 %v11190_v0, %v11321_v42  ;;  %v11325_v18 = vpop.f32.mrb[177].mxu0  ;;  %v9717_v0 = vld [vmem:[%s13312_s0 + $0x4e8] sm:$0xff]  }
 0x257   :  { %v3665_v8 = vmax.f32 %v11160_v25, %v11325_v18  ;;  %v11332_v58 = vpop.f32.mrb[178].mxu0  ;;  %v9718_v18 = vld [vmem:[%s13312_s0 + $0x4f0] sm:$0xff]  }
 0x258   :  { %v11339_v53 = vpop.f32.mrb[179].mxu0  ;;  %v13372_v42 = vmax.f32 %v11169_v51, %v11332_v58 }
 0x259   :  { %v3666_v4 = vmax.f32 %v11177_v19, %v11339_v53 }
 0x25a   :  { %9076 = vmatmul.mubr.bf16.gmra.mrb[28].mxu0 %v9703_v60  ;;  %v9710_v60 = vld [vmem:[%s13312_s0 + $0x4b0] sm:$0xff]  }
 0x25b   :  { %9079 = vmatprep.mubr.bf16.mxu0 %v9704_v54 }
 0x25d   :  { %v11343_v5 = vpop.f32.mrb[180].mxu0 }
 0x25e   :  { %v11347_v27 = vpop.f32.mrb[181].mxu0 }
 0x25f   :  { %v11354_v52 = vpop.f32.mrb[182].mxu0 }
 0x260   :  { %v11361_v11 = vpop.f32.mrb[183].mxu0 }
 0x261   :  { %v3670_v22 = vmax.f32 %v11203_v57, %v11361_v11  ;;  %v13373_v57 = vmax.f32 %v11216_v56, %v11343_v5  ;;  %v9719_v56 = vld [vmem:[%s13312_s0 + $0x4f8] sm:$0xff]   ;;  %v13376_v5 = vmax.f32 %v11195_v38, %v11354_v52 }
 0x262   :  { %9080 = vmatmul.mubr.bf16.gmra.mrb[32].mxu0 %v9705_v43 }
 0x263   :  { %9083 = vmatprep.mubr.bf16.mxu0 %v9706_v50 }
 0x265   :  { %v11365_v37 = vpop.f32.mrb[184].mxu0 }
 0x266   :  { %v11369_v9 = vpop.f32.mrb[185].mxu0 }
 0x267   :  { %v11376_v32 = vpop.f32.mrb[186].mxu0 }
 0x268   :  { %v11383_v46 = vpop.f32.mrb[187].mxu0 }
 0x269   :  { %v13375_v58 = vmax.f32 %v11229_v31, %v11383_v46  ;;  %v13377_v31 = vmax.f32 %v11242_v41, %v11365_v37  ;;  %v9721_v41 = vld [vmem:[%s13312_s0 + $0x508] sm:$0xff]   ;;  %v13380_v37 = vmax.f32 %v11221_v34, %v11376_v32 }
 0x26a   :  { %9084 = vmatmul.mubr.bf16.gmra.mrb[36].mxu0 %v9707_v10 }
 0x26b   :  { %9087 = vmatprep.mubr.bf16.mxu0 %v9708_v33 }
 0x26d   :  { %v11390_v26 = vpop.f32.mrb[188].mxu0 }
 0x26e   :  { %v11394_v28 = vpop.f32.mrb[189].mxu0 }
 0x26f   :  { %v11401_v3 = vpop.f32.mrb[190].mxu0 }
 0x270   :  { %v11408_v43 = vpop.f32.mrb[191].mxu0 }
 0x271   :  { %v13379_v52 = vmax.f32 %v11255_v17, %v11408_v43  ;;  %v13381_v17 = vmax.f32 %v11268_v35, %v11390_v26  ;;  %v9723_v35 = vld [vmem:[%s13312_s0 + $0x518] sm:$0xff]   ;;  %v13384_v26 = vmax.f32 %v11247_v29, %v11401_v3 }
 0x272   :  { %9088 = vmatmul.mubr.bf16.gmra.mrb[40].mxu0 %v9709_v21  ;;  %v9712_v21 = vld [vmem:[%s13312_s0 + $0x4c0] sm:$0xff]  }
 0x273   :  { %9091 = vmatprep.mubr.bf16.mxu0 %v9710_v60 }
 0x275   :  { %v11412_v10 = vpop.f32.mrb[192].mxu0 }
 0x276   :  { %v11416_v45 = vpop.f32.mrb[193].mxu0 }
 0x277   :  { %v11423_v59 = vpop.f32.mrb[194].mxu0 }
 0x278   :  { %v11430_v36 = vpop.f32.mrb[195].mxu0 }
 0x279   :  { %v13383_v32 = vmax.f32 %v11281_v55, %v11430_v36  ;;  %v13385_v55 = vmax.f32 %v11294_v47, %v11412_v10  ;;  %v9725_v47 = vld [vmem:[%s13312_s0 + $0x528] sm:$0xff]   ;;  %v13387_v10 = vmax.f32 %v11273_v40, %v11423_v59 }
 0x27a   :  { %9092 = vmatmul.mubr.bf16.gmra.mrb[44].mxu0 %v9711_v39  ;;  %v9714_v39 = vld [vmem:[%s13312_s0 + $0x4d0] sm:$0xff]  }
 0x27b   :  { %9095 = vmatprep.mubr.bf16.mxu0 %v9712_v21 }
 0x27d   :  { %v11434_v50 = vpop.f32.mrb[196].mxu0 }
 0x27e   :  { %v11438_v7 = vpop.f32.mrb[197].mxu0 }
 0x27f   :  { %v11445_v62 = vpop.f32.mrb[198].mxu0 }
 0x280   :  { %v11452_v33 = vpop.f32.mrb[199].mxu0 }
 0x281   :  { %v3686_v54 = vmax.f32 %v11307_v48, %v11452_v33  ;;  %v13388_v48 = vmax.f32 %v11319_v1, %v11434_v50  ;;  %v9727_v1 = vld [vmem:[%s13312_s0 + $0x538] sm:$0xff]   ;;  %v13390_v50 = vmax.f32 %v11299_v2, %v11445_v62 }
 0x282   :  { %9096 = vmatmul.mubr.bf16.gmra.mrb[48].mxu0 %v9713_v13  ;;  %v9716_v13 = vld [vmem:[%s13312_s0 + $0x4e0] sm:$0xff]  }
 0x283   :  { %9099 = vmatprep.mubr.bf16.mxu0 %v9714_v39 }
 0x285   :  { %v8993_v20 = vpop.f32.mrb[200].mxu0 }
 0x286   :  { %v11459_v60 = vmax.f32 %v3666_v4, %v8993_v20  ;;  %v2535_v16 = vpop.f32.mrb[201].mxu0 }
 0x287   :  { %v11467_v21 = vmax.f32 %v3664_v15, %v2535_v16  ;;  %v8994_v23 = vpop.f32.mrb[202].mxu0 }
 0x288   :  { %v11475_v19 = vmax.f32 %v3667_v12, %v8994_v23  ;;  %v2538_v53 = vpop.f32.mrb[203].mxu0 }
 0x289   :  { %v11480_v4 = vmax.f32 %v3665_v8, %v2538_v53 }
 0x28a   :  { %9100 = vmatmul.mubr.bf16.gmra.mrb[52].mxu0 %v9715_v24  ;;  %v13374_v24 = vmax.f32 %v11185_v61, %v11347_v27  ;;  %v9720_v27 = vld [vmem:[%s13312_s0 + $0x500] sm:$0xff]  }
 0x28b   :  { %9103 = vmatprep.mubr.bf16.mxu0 %v9716_v13  ;;  %v13378_v13 = vmax.f32 %v11211_v44, %v11369_v9  ;;  %v9722_v9 = vld [vmem:[%s13312_s0 + $0x510] sm:$0xff]  }
 0x28d   :  { %v8997_v14 = vpop.f32.mrb[204].mxu0 }
 0x28e   :  { %v11485_v30 = vmax.f32 %v3670_v22, %v8997_v14  ;;  %v2551_v15 = vpop.f32.mrb[205].mxu0 }
 0x28f   :  { %v11493_v12 = vmax.f32 %v13372_v42, %v2551_v15  ;;  %v8998_v25 = vpop.f32.mrb[206].mxu0 }
 0x290   :  { %v11501_v8 = vmax.f32 %v13373_v57, %v8998_v25  ;;  %v2554_v23 = vpop.f32.mrb[207].mxu0  ;;  %v13382_v25 = vmax.f32 %v11237_v6, %v11394_v28  ;;  %v9724_v28 = vld [vmem:[%s13312_s0 + $0x520] sm:$0xff]  }
 0x291   :  { %v11506_v16 = vmax.f32 %v13374_v24, %v2554_v23 }
 0x292   :  { %9104 = vmatmul.mubr.bf16.gmra.mrb[56].mxu0 %v9717_v0 }
 0x293   :  { %9107 = vmatprep.mubr.bf16.mxu0 %v9718_v18 }
 0x295   :  { %v9001_v51 = vpop.f32.mrb[208].mxu0 }
 0x296   :  { %v11511_v11 = vmax.f32 %v13375_v58, %v9001_v51  ;;  %v2567_v22 = vpop.f32.mrb[209].mxu0  ;;  %v13386_v58 = vmax.f32 %v11263_v49, %v11416_v45  ;;  %v9726_v45 = vld [vmem:[%s13312_s0 + $0x530] sm:$0xff]  }
 0x297   :  { %v11519_v20 = vmax.f32 %v13376_v5, %v2567_v22  ;;  %v9002_v61 = vpop.f32.mrb[210].mxu0 }
 0x298   :  { %v11527_v46 = vmax.f32 %v13377_v31, %v9002_v61  ;;  %v2570_v39 = vpop.f32.mrb[211].mxu0  ;;  %v13389_v61 = vmax.f32 %v11289_v63, %v11438_v7  ;;  %v9728_v7 = vld [vmem:[%s13312_s0 + $0x540] sm:$0xff]  }
 0x299   :  { %v11532_v53 = vmax.f32 %v13378_v13, %v2570_v39 }
 0x29a   :  { %9108 = vmatmul.mubr.bf16.gmra.mrb[60].mxu0 %v9719_v56 }
 0x29b   :  { %9111 = vmatprep.mubr.bf16.mxu0 %v9720_v27 }
 0x29d   :  { %v9005_v38 = vpop.f32.mrb[212].mxu0 }
 0x29e   :  { %v11537_v14 = vmax.f32 %v13379_v52, %v9005_v38  ;;  %v2583_v15 = vpop.f32.mrb[213].mxu0 }
 0x29f   :  { %v11545_v0 = vmax.f32 %v13380_v37, %v2583_v15  ;;  %v9006_v44 = vpop.f32.mrb[214].mxu0 }
 0x2a0   :  { %v11553_v43 = vmax.f32 %v13381_v17, %v9006_v44  ;;  %v2586_v42 = vpop.f32.mrb[215].mxu0 }
 0x2a1   :  { %v11558_v18 = vmax.f32 %v13382_v25, %v2586_v42 }
 0x2a2   :  { %9112 = vmatmul.mubr.bf16.gmra.mrb[64].mxu0 %v9721_v41  ;;  %v9729_v41 = vld [vmem:[%s13312_s0 + $0x548] sm:$0xff]  }
 0x2a3   :  { %9115 = vmatprep.mubr.bf16.mxu0 %v9722_v9  ;;  %v9730_v9 = vld [vmem:[%s13312_s0 + $0x550] sm:$0xff]  }
 0x2a5   :  { %v9009_v34 = vpop.f32.mrb[216].mxu0 }
 0x2a6   :  { %v11563_v57 = vmax.f32 %v13383_v32, %v9009_v34  ;;  %v2599_v23 = vpop.f32.mrb[217].mxu0  ;;  %v9740_v32 = vld [vmem:[%s13312_s0 + $0x598] sm:$0xff]  }
 0x2a7   :  { %v11571_v24 = vmax.f32 %v13384_v26, %v2599_v23  ;;  %v9010_v6 = vpop.f32.mrb[218].mxu0 }
 0x2a8   :  { %v11579_v36 = vmax.f32 %v13385_v55, %v9010_v6  ;;  %v2602_v51 = vpop.f32.mrb[219].mxu0 }
 0x2a9   :  { %v11584_v22 = vmax.f32 %v13386_v58, %v2602_v51 }
 0x2aa   :  { %9116 = vmatmul.mubr.bf16.gmra.mrb[68].mxu0 %v9723_v35  ;;  %v9731_v35 = vld [vmem:[%s13312_s0 + $0x558] sm:$0xff]  }
 0x2ab   :  { %9119 = vmatprep.mubr.bf16.mxu0 %v9724_v28  ;;  %v9732_v28 = vld [vmem:[%s13312_s0 + $0x560] sm:$0xff]  }
 0x2ad   :  { %v9013_v29 = vpop.f32.mrb[220].mxu0 }
 0x2ae   :  { %v11589_v3 = vmax.f32 %v3686_v54, %v9013_v29  ;;  %v2615_v56 = vpop.f32.mrb[221].mxu0 }
 0x2af   :  { %v11597_v5 = vmax.f32 %v13387_v10, %v2615_v56  ;;  %v9014_v49 = vpop.f32.mrb[222].mxu0  ;;  %v9733_v10 = vld [vmem:[%s13312_s0 + $0x568] sm:$0xff]  }
 0x2b0   :  { %v11605_v54 = vmax.f32 %v13388_v48, %v9014_v49  ;;  %v2618_v33 = vpop.f32.mrb[223].mxu0  ;;  %v9734_v48 = vld [vmem:[%s13312_s0 + $0x570] sm:$0xff]   ;;  %v9737_v56 = vld [vmem:[%s13312_s0 + $0x588] sm:$0xff]  }
 0x2b1   :  { %v11610_v27 = vmax.f32 %v13389_v61, %v2618_v33 }
 0x2b2   :  { %9120 = vmatmul.mubr.bf16.gmra.mrb[72].mxu0 %v9725_v47 }
 0x2b3   :  { %9123 = vmatprep.mubr.bf16.mxu0 %v9726_v45 }
 0x2b5   :  { %v11612_v40 = vpop.f32.mrb[224].mxu0 }
 0x2b6   :  { %v3715_v59 = vmax.f32 %v11480_v4, %v11612_v40  ;;  %v2631_v31 = vpop.f32.mrb[225].mxu0  ;;  %v9742_v4 = vld [vmem:[%s13312_s0 + $0x5a8] sm:$0xff]  }
 0x2b7   :  { %v11622_v39 = vmax.f32 %v13390_v50, %v2631_v31  ;;  %v11624_v63 = vpop.f32.mrb[226].mxu0 }
 0x2b8   :  { %v3716_v13 = vmax.f32 %v11459_v60, %v11624_v63  ;;  %v11631_v38 = vpop.f32.mrb[227].mxu0 }
 0x2b9   :  { %v3714_v52 = vmax.f32 %v11467_v21, %v11631_v38 }
 0x2ba   :  { %9124 = vmatmul.mubr.bf16.gmra.mrb[76].mxu0 %v9727_v1 }
 0x2bb   :  { %9127 = vmatprep.mubr.bf16.mxu0 %v9728_v7 }
 0x2bd   :  { %v11635_v15 = vpop.f32.mrb[228].mxu0 }
 0x2be   :  { %v3719_v2 = vmax.f32 %v11506_v16, %v11635_v15  ;;  %v11639_v62 = vpop.f32.mrb[229].mxu0  ;;  %v9744_v16 = vld [vmem:[%s13312_s0 + $0x5b8] sm:$0xff]  }
 0x2bf   :  { %v3717_v37 = vmax.f32 %v11475_v19, %v11639_v62  ;;  %v11646_v44 = vpop.f32.mrb[230].mxu0  ;;  %v9745_v62 = vld [vmem:[%s13312_s0 + $0x5c0] sm:$0xff]  }
 0x2c0   :  { %v11653_v42 = vpop.f32.mrb[231].mxu0  ;;  %v13391_v15 = vmax.f32 %v11485_v30, %v11646_v44 }
 0x2c1   :  { %v3718_v25 = vmax.f32 %v11493_v12, %v11653_v42 }
 0x2c2   :  { %9128 = vmatmul.mubr.bf16.gmra.mrb[80].mxu0 %v9729_v41  ;;  %v9735_v41 = vld [vmem:[%s13312_s0 + $0x578] sm:$0xff]  }
 0x2c3   :  { %9131 = vmatprep.mubr.bf16.mxu0 %v9730_v9 }
 0x2c5   :  { %v11657_v34 = vpop.f32.mrb[232].mxu0 }
 0x2c6   :  { %v11661_v23 = vpop.f32.mrb[233].mxu0 }
 0x2c7   :  { %v11668_v6 = vpop.f32.mrb[234].mxu0 }
 0x2c8   :  { %v11675_v51 = vpop.f32.mrb[235].mxu0 }
 0x2c9   :  { %v3722_v58 = vmax.f32 %v11519_v20, %v11675_v51  ;;  %v13392_v20 = vmax.f32 %v11532_v53, %v11657_v34  ;;  %v13393_v51 = vmax.f32 %v11501_v8, %v11661_v23  ;;  %v9746_v53 = vld [vmem:[%s13312_s0 + $0x5c8] sm:$0xff]   ;;  %v13395_v34 = vmax.f32 %v11511_v11, %v11668_v6  ;;  %v9747_v23 = vld [vmem:[%s13312_s0 + $0x5d0] sm:$0xff]  }
 0x2ca   :  { %9132 = vmatmul.mubr.bf16.gmra.mrb[84].mxu0 %v9731_v35 }
 0x2cb   :  { %9135 = vmatprep.mubr.bf16.mxu0 %v9732_v28  ;;  %v9736_v28 = vld [vmem:[%s13312_s0 + $0x580] sm:$0xff]  }
 0x2cd   :  { %v11679_v29 = vpop.f32.mrb[236].mxu0 }
 0x2ce   :  { %v11683_v47 = vpop.f32.mrb[237].mxu0 }
 0x2cf   :  { %v11690_v45 = vpop.f32.mrb[238].mxu0 }
 0x2d0   :  { %v11697_v61 = vpop.f32.mrb[239].mxu0 }
 0x2d1   :  { %v13394_v44 = vmax.f32 %v11545_v0, %v11697_v61  ;;  %v13396_v0 = vmax.f32 %v11558_v18, %v11679_v29  ;;  %v9748_v18 = vld [vmem:[%s13312_s0 + $0x5d8] sm:$0xff]   ;;  %v13399_v29 = vmax.f32 %v11537_v14, %v11690_v45 }
 0x2d2   :  { %9136 = vmatmul.mubr.bf16.gmra.mrb[88].mxu0 %v9733_v10 }
 0x2d3   :  { %9139 = vmatprep.mubr.bf16.mxu0 %v9734_v48 }
 0x2d5   :  { %v11701_v1 = vpop.f32.mrb[240].mxu0 }
 0x2d6   :  { %v11705_v7 = vpop.f32.mrb[241].mxu0 }
 0x2d7   :  { %v11712_v35 = vpop.f32.mrb[242].mxu0 }
 0x2d8   :  { %v11719_v48 = vpop.f32.mrb[243].mxu0 }
 0x2d9   :  { %v13398_v6 = vmax.f32 %v11571_v24, %v11719_v48  ;;  %v13400_v24 = vmax.f32 %v11584_v22, %v11701_v1  ;;  %v9750_v22 = vld [vmem:[%s13312_s0 + $0x5e8] sm:$0xff]   ;;  %v13402_v1 = vmax.f32 %v11563_v57, %v11712_v35 }
 0x2da   :  { %9140 = vmatmul.mubr.bf16.gmra.mrb[92].mxu0 %v9735_v41  ;;  %v9738_v41 = vld [vmem:[%s13312_s0 + $0x590] sm:$0xff]  }
 0x2db   :  { %9143 = vmatprep.mubr.bf16.mxu0 %v9736_v28 }
 0x2dd   :  { %v11723_v33 = vpop.f32.mrb[244].mxu0 }
 0x2de   :  { %v11727_v49 = vpop.f32.mrb[245].mxu0 }
 0x2df   :  { %v11734_v55 = vpop.f32.mrb[246].mxu0 }
 0x2e0   :  { %v11741_v50 = vpop.f32.mrb[247].mxu0 }
 0x2e1   :  { %v3734_v9 = vmax.f32 %v11597_v5, %v11741_v50  ;;  %v13403_v5 = vmax.f32 %v11610_v27, %v11723_v33  ;;  %v9752_v27 = vld [vmem:[%s13312_s0 + $0x5f8] sm:$0xff]   ;;  %v13405_v33 = vmax.f32 %v11589_v3, %v11734_v55 }
 0x2e2   :  { %9144 = vmatmul.mubr.bf16.gmra.mrb[96].mxu0 %v9737_v56  ;;  %v9741_v56 = vld [vmem:[%s13312_s0 + $0x5a0] sm:$0xff]  }
 0x2e3   :  { %9147 = vmatprep.mubr.bf16.mxu0 %v9738_v41 }
 0x2e5   :  { %v9041_v31 = vpop.f32.mrb[248].mxu0 }
 0x2e6   :  { %v11748_v10 = vmax.f32 %v3714_v52, %v9041_v31  ;;  %v11750_v26 = vpop.f32.mrb[249].mxu0 }
 0x2e7   :  { %v9042_v17 = vpop.f32.mrb[250].mxu0 }
 0x2e8   :  { %v11763_v21 = vmax.f32 %v3715_v59, %v9042_v17  ;;  %v11765_v38 = vpop.f32.mrb[251].mxu0  ;;  %v9743_v17 = vld [vmem:[%s13312_s0 + $0x5b0] sm:$0xff]  }
 0x2e9   :  { %v3738_v52 = vmax.f32 %v11622_v39, %v11765_v38 }
 0x2ea   :  { %9148 = vmatmul.mubr.bf16.gmra.mrb[100].mxu0 %v9740_v32 }
 0x2eb   :  { %9151 = vmatprep.mubr.bf16.mxu0 %v9741_v56 }
 0x2ed   :  { %v9045_v31 = vpop.f32.mrb[252].mxu0 }
 0x2ee   :  { %v11772_v41 = vmax.f32 %v3718_v25, %v9045_v31  ;;  %v2743_v28 = vpop.f32.mrb[253].mxu0 }
 0x2ef   :  { %v11780_v40 = vmax.f32 %v3716_v13, %v2743_v28  ;;  %v9046_v59 = vpop.f32.mrb[254].mxu0 }
 0x2f0   :  { %v11788_v12 = vmax.f32 %v3719_v2, %v9046_v59  ;;  %v2746_v42 = vpop.f32.mrb[255].mxu0  ;;  %v13397_v59 = vmax.f32 %v11527_v46, %v11683_v47  ;;  %v9749_v47 = vld [vmem:[%s13312_s0 + $0x5e0] sm:$0xff]  }
 0x2f1   :  { %v11793_v25 = vmax.f32 %v3717_v37, %v2746_v42 }
 0x2f2   :  { %9152 = vmatmul.mubr.bf16.gmra.mrb[104].mxu0 %v9742_v4 }
 0x2f3   :  { %9155 = vmatprep.mubr.bf16.mxu0 %v9743_v17 }
 0x2f5   :  { %v9049_v60 = vpop.f32.mrb[0].mxu0 }
 0x2f6   :  { %v11798_v63 = vmax.f32 %v3722_v58, %v9049_v60  ;;  %v2759_v13 = vpop.f32.mrb[1].mxu0 }
 0x2f7   :  { %v11806_v2 = vmax.f32 %v13391_v15, %v2759_v13  ;;  %v9050_v19 = vpop.f32.mrb[2].mxu0  ;;  %v13401_v15 = vmax.f32 %v11553_v43, %v11705_v7  ;;  %v9751_v7 = vld [vmem:[%s13312_s0 + $0x5f0] sm:$0xff]  }
 0x2f8   :  { %v11814_v37 = vmax.f32 %v13392_v20, %v9050_v19  ;;  %v2762_v32 = vpop.f32.mrb[3].mxu0 }
 0x2f9   :  { %v11819_v58 = vmax.f32 %v13393_v51, %v2762_v32  ;;  %v13404_v32 = vmax.f32 %v11579_v36, %v11727_v49  ;;  %v9753_v49 = vld [vmem:[%s13312_s0 + $0x600] sm:$0xff]  }
 0x2fa   :  { %9156 = vmatmul.mubr.bf16.gmra.mrb[108].mxu0 %v9744_v16 }
 0x2fb   :  { %9159 = vmatprep.mubr.bf16.mxu0 %v9745_v62 }
 0x2fd   :  { %v9053_v30 = vpop.f32.mrb[4].mxu0 }
 0x2fe   :  { %v11824_v28 = vmax.f32 %v13394_v44, %v9053_v30  ;;  %v2775_v56 = vpop.f32.mrb[5].mxu0 }
 0x2ff   :  { %v11832_v31 = vmax.f32 %v13395_v34, %v2775_v56  ;;  %v9054_v8 = vpop.f32.mrb[6].mxu0  ;;  %v9754_v34 = vld [vmem:[%s13312_s0 + $0x608] sm:$0xff]  }
 0x300   :  { %v11840_v61 = vmax.f32 %v13396_v0, %v9054_v8  ;;  %v2778_v4 = vpop.f32.mrb[7].mxu0 }
 0x301   :  { %v11845_v17 = vmax.f32 %v13397_v59, %v2778_v4 }
 0x302   :  { %9160 = vmatmul.mubr.bf16.gmra.mrb[112].mxu0 %v9746_v53 }
 0x303   :  { %9163 = vmatprep.mubr.bf16.mxu0 %v9747_v23 }
 0x305   :  { %v9057_v11 = vpop.f32.mrb[8].mxu0 }
 0x306   :  { %v11850_v42 = vmax.f32 %v13398_v6, %v9057_v11  ;;  %v2791_v60 = vpop.f32.mrb[9].mxu0 }
 0x307   :  { %v11858_v13 = vmax.f32 %v13399_v29, %v2791_v60  ;;  %v9058_v46 = vpop.f32.mrb[10].mxu0  ;;  %v9756_v60 = vld [vmem:[%s13312_s0 + $0x618] sm:$0xff]  }
 0x308   :  { %v11866_v48 = vmax.f32 %v13400_v24, %v9058_v46  ;;  %v2794_v16 = vpop.f32.mrb[11].mxu0 }
 0x309   :  { %v11871_v19 = vmax.f32 %v13401_v15, %v2794_v16 }
 0x30a   :  { %9164 = vmatmul.mubr.bf16.gmra.mrb[116].mxu0 %v9748_v18 }
 0x30b   :  { %9167 = vmatprep.mubr.bf16.mxu0 %v9749_v47 }
 0x30d   :  { %v9061_v14 = vpop.f32.mrb[12].mxu0 }
 0x30e   :  { %v11876_v45 = vmax.f32 %v3734_v9, %v9061_v14  ;;  %v2807_v62 = vpop.f32.mrb[13].mxu0 }
 0x30f   :  { %v11884_v20 = vmax.f32 %v13402_v1, %v2807_v62  ;;  %v9062_v43 = vpop.f32.mrb[14].mxu0 }
 0x310   :  { %v11892_v50 = vmax.f32 %v13403_v5, %v9062_v43  ;;  %v2810_v9 = vpop.f32.mrb[15].mxu0 }
 0x311   :  { %v11897_v51 = vmax.f32 %v13404_v32, %v2810_v9 }
 0x312   :  { %9168 = vmatmul.mubr.bf16.gmra.mrb[120].mxu0 %v9750_v22 }
 0x313   :  { %9171 = vmatprep.mubr.bf16.mxu0 %v9751_v7 }
 0x315   :  { %v9065_v57 = vpop.f32.mrb[16].mxu0 }
 0x316   :  { %v11902_v35 = vmax.f32 %v3738_v52, %v9065_v57  ;;  %v2823_v30 = vpop.f32.mrb[17].mxu0  ;;  %v13406_v52 = vmax.f32 %v11605_v54, %v11750_v26  ;;  %v9755_v54 = vld [vmem:[%s13312_s0 + $0x610] sm:$0xff]  }
 0x317   :  { %v11910_v44 = vmax.f32 %v13405_v33, %v2823_v30  ;;  %v11912_v36 = vpop.f32.mrb[18].mxu0 }
 0x318   :  { %v3764_v39 = vmax.f32 %v11748_v10, %v11912_v36  ;;  %v2826_v38 = vpop.f32.mrb[19].mxu0 }
 0x319   :  { %v11922_v56 = vmax.f32 %v13406_v52, %v2826_v38 }
 0x31a   :  { %9172 = vmatmul.mubr.bf16.gmra.mrb[124].mxu0 %v9752_v27 }
 0x31b   :  { %9175 = vmatprep.mubr.bf16.mxu0 %v9753_v49 }
 0x31d   :  { %v11924_v3 = vpop.f32.mrb[20].mxu0 }
 0x31e   :  { %v3767_v55 = vmax.f32 %v11793_v25, %v11924_v3  ;;  %v11928_v53 = vpop.f32.mrb[21].mxu0 }
 0x31f   :  { %v3765_v8 = vmax.f32 %v11763_v21, %v11928_v53  ;;  %v11935_v23 = vpop.f32.mrb[22].mxu0 }
 0x320   :  { %v3768_v26 = vmax.f32 %v11772_v41, %v11935_v23  ;;  %v2842_v0 = vpop.f32.mrb[23].mxu0 }
 0x321   :  { %v3766_v4 = vmax.f32 %v11780_v40, %v2842_v0  ;;  %v9757_v40 = vld [vmem:[%s13312_s0 + $0x620] sm:$0xff]  }
 0x322   :  { %9176 = vmatmul.mubr.bf16.gmra.mrb[128].mxu0 %v9754_v34 }
 0x323   :  { %9179 = vmatprep.mubr.bf16.mxu0 %v9755_v54 }
 0x325   :  { %v11943_v59 = vpop.f32.mrb[24].mxu0 }
 0x326   :  { %v3771_v11 = vmax.f32 %v11819_v58, %v11943_v59  ;;  %v11947_v6 = vpop.f32.mrb[25].mxu0 }
 0x327   :  { %v3769_v18 = vmax.f32 %v11788_v12, %v11947_v6  ;;  %v11954_v29 = vpop.f32.mrb[26].mxu0  ;;  %v9758_v12 = vld [vmem:[%s13312_s0 + $0x628] sm:$0xff]  }
 0x328   :  { %v3772_v46 = vmax.f32 %v11798_v63, %v11954_v29  ;;  %v2858_v47 = vpop.f32.mrb[27].mxu0  ;;  %v9759_v63 = vld [vmem:[%s13312_s0 + $0x630] sm:$0xff]  }
 0x329   :  { %v3770_v58 = vmax.f32 %v11806_v2, %v2858_v47 }
 0x32a   :  { %9180 = vmatmul.mubr.bf16.gmra.mrb[132].mxu0 %v9756_v60 }
 0x32b   :  { %9183 = vmatprep.mubr.bf16.mxu0 %v9757_v40 }
 0x32d   :  { %v9077_v24 = vpop.f32.mrb[28].mxu0 }
 0x32e   :  { %v3775_v16 = vmax.f32 %v11845_v17, %v9077_v24  ;;  %v2871_v15 = vpop.f32.mrb[29].mxu0 }
 0x32f   :  { %v3773_v14 = vmax.f32 %v11814_v37, %v2871_v15  ;;  %v9078_v62 = vpop.f32.mrb[30].mxu0  ;;  %v9760_v37 = vld [vmem:[%s13312_s0 + $0x638] sm:$0xff]  }
 0x330   :  { %v3776_v22 = vmax.f32 %v11824_v28, %v9078_v62  ;;  %v2874_v2 = vpop.f32.mrb[31].mxu0 }
 0x331   :  { %v3774_v1 = vmax.f32 %v11832_v31, %v2874_v2  ;;  %v10085_v2 = vmov 0  }
 0x332   :  { %9184 = vmatmul.mubr.bf16.gmra.mrb[136].mxu0 %v9758_v12  ;;  %4393 = vmatprep.subr.bf16.mxu1 %v10085_v2 }
 0x333   :  { %9187 = vmatprep.mubr.bf16.mxu0 %v9759_v63 }
 0x335   :  { %v9081_v17 = vpop.f32.mrb[32].mxu0 }
 0x336   :  { %v3779_v43 = vmax.f32 %v11871_v19, %v9081_v17  ;;  %v2887_v7 = vpop.f32.mrb[33].mxu0 }
 0x337   :  { %v3777_v5 = vmax.f32 %v11840_v61, %v2887_v7  ;;  %v9082_v9 = vpop.f32.mrb[34].mxu0 }
 0x338   :  { %v3780_v32 = vmax.f32 %v11850_v42, %v9082_v9  ;;  %v2890_v57 = vpop.f32.mrb[35].mxu0 }
 0x339   :  { %v3778_v28 = vmax.f32 %v11858_v13, %v2890_v57 }
 0x33a   :  { %9188 = vmatmul.mubr.bf16.gmra.mrb[140].mxu0 %v9760_v37 }
 0x33d   :  { %v9085_v31 = vpop.f32.mrb[36].mxu0 }
 0x33e   :  { %v3783_v30 = vmax.f32 %v11897_v51, %v9085_v31  ;;  %v2903_v27 = vpop.f32.mrb[37].mxu0 }
 0x33f   :  { %v3781_v19 = vmax.f32 %v11866_v48, %v2903_v27  ;;  %v9086_v33 = vpop.f32.mrb[38].mxu0 }
 0x340   :  { %v3784_v49 = vmax.f32 %v11876_v45, %v9086_v33  ;;  %v2906_v38 = vpop.f32.mrb[39].mxu0 }
 0x341   :  { %v3782_v52 = vmax.f32 %v11884_v20, %v2906_v38 }
 0x345   :  { %v9089_v61 = vpop.f32.mrb[40].mxu0 }
 0x346   :  { %v3787_v34 = vmax.f32 %v11922_v56, %v9089_v61  ;;  %v2919_v42 = vpop.f32.mrb[41].mxu0 }
 0x347   :  { %v3785_v54 = vmax.f32 %v11892_v50, %v2919_v42  ;;  %v9090_v13 = vpop.f32.mrb[42].mxu0 }
 0x348   :  { %v3788_v0 = vmax.f32 %v11902_v35, %v9090_v13  ;;  %v2922_v59 = vpop.f32.mrb[43].mxu0 }
 0x349   :  { %v3786_v51 = vmax.f32 %v11910_v44, %v2922_v59 }
 0x34d   :  { %v9093_v6 = vpop.f32.mrb[44].mxu0 }
 0x34e   :  { %v11987_v48 = vmax.f32 %v3766_v4, %v9093_v6  ;;  %v2935_v60 = vpop.f32.mrb[45].mxu0 }
 0x34f   :  { %v11992_v45 = vmax.f32 %v3764_v39, %v2935_v60  ;;  %v9094_v20 = vpop.f32.mrb[46].mxu0 }
 0x350   :  { %v11997_v50 = vmax.f32 %v3767_v55, %v9094_v20  ;;  %v2938_v56 = vpop.f32.mrb[47].mxu0 }
 0x351   :  { %v12002_v35 = vmax.f32 %v3765_v8, %v2938_v56 }
 0x355   :  { %v9097_v44 = vpop.f32.mrb[48].mxu0 }
 0x356   :  { %v12004_v4 = vmax.f32 %v3770_v58, %v9097_v44  ;;  %v2951_v29 = vpop.f32.mrb[49].mxu0 }
 0x357   :  { %v12009_v10 = vmax.f32 %v3768_v26, %v2951_v29  ;;  %v9098_v36 = vpop.f32.mrb[50].mxu0 }
 0x358   :  { %v12011_v39 = vmax.f32 %v3771_v11, %v9098_v36  ;;  %v2954_v25 = vpop.f32.mrb[51].mxu0 }
 0x359   :  { %v12013_v3 = vmax.f32 %v3769_v18, %v2954_v25 }
 0x35d   :  { %v9101_v55 = vpop.f32.mrb[52].mxu0 }
 0x35e   :  { %v12015_v40 = vmax.f32 %v3774_v1, %v9101_v55  ;;  %v2967_v21 = vpop.f32.mrb[53].mxu0 }
 0x35f   :  { %v12017_v53 = vmax.f32 %v3772_v46, %v2967_v21  ;;  %v9102_v8 = vpop.f32.mrb[54].mxu0 }
 0x360   :  { %v12019_v47 = vmax.f32 %v3775_v16, %v9102_v8  ;;  %v2970_v58 = vpop.f32.mrb[55].mxu0 }
 0x361   :  { %v12021_v24 = vmax.f32 %v3773_v14, %v2970_v58 }
 0x365   :  { %v9105_v41 = vpop.f32.mrb[56].mxu0 }
 0x366   :  { %v12023_v23 = vmax.f32 %v3778_v28, %v9105_v41  ;;  %v2983_v26 = vpop.f32.mrb[57].mxu0 }
 0x367   :  { %v12025_v11 = vmax.f32 %v3776_v22, %v2983_v26  ;;  %v9106_v18 = vpop.f32.mrb[58].mxu0 }
 0x368   :  { %v12027_v15 = vmax.f32 %v3779_v43, %v9106_v18  ;;  %v2986_v12 = vpop.f32.mrb[59].mxu0 }
 0x369   :  { %v12029_v62 = vmax.f32 %v3777_v5, %v2986_v12 }
 0x36d   :  { %v9109_v46 = vpop.f32.mrb[60].mxu0 }
 0x36e   :  { %v12031_v63 = vmax.f32 %v3782_v52, %v9109_v46  ;;  %v2999_v16 = vpop.f32.mrb[61].mxu0 }
 0x36f   :  { %v12034_v14 = vmax.f32 %v3780_v32, %v2999_v16  ;;  %v9110_v1 = vpop.f32.mrb[62].mxu0 }
 0x370   :  { %v12036_v17 = vmax.f32 %v3783_v30, %v9110_v1  ;;  %v3002_v22 = vpop.f32.mrb[63].mxu0 }
 0x371   :  { %v12038_v7 = vmax.f32 %v3781_v19, %v3002_v22 }
 0x375   :  { %v9113_v43 = vpop.f32.mrb[64].mxu0 }
 0x376   :  { %v12040_v37 = vmax.f32 %v3786_v51, %v9113_v43  ;;  %v3015_v5 = vpop.f32.mrb[65].mxu0 }
 0x377   :  { %v12042_v9 = vmax.f32 %v3784_v49, %v3015_v5  ;;  %v9114_v57 = vpop.f32.mrb[66].mxu0 }
 0x378   :  { %v12044_v28 = vmax.f32 %v3787_v34, %v9114_v57  ;;  %v3018_v31 = vpop.f32.mrb[67].mxu0 }
 0x379   :  { %v12046_v27 = vmax.f32 %v3785_v54, %v3018_v31 }
 0x37d   :  { %v9117_v32 = vpop.f32.mrb[68].mxu0 }
 0x37e   :  { %v3815_v33 = vmax.f32 %v12002_v35, %v9117_v32  ;;  %v3031_v30 = vpop.f32.mrb[69].mxu0 }
 0x37f   :  { %v12049_v38 = vmax.f32 %v3788_v0, %v3031_v30  ;;  %v9118_v19 = vpop.f32.mrb[70].mxu0 }
 0x380   :  { %v3816_v52 = vmax.f32 %v11987_v48, %v9118_v19  ;;  %v3034_v61 = vpop.f32.mrb[71].mxu0 }
 0x381   :  { %v3814_v42 = vmax.f32 %v11992_v45, %v3034_v61 }
 0x385   :  { %v9121_v49 = vpop.f32.mrb[72].mxu0 }
 0x386   :  { %v3819_v13 = vmax.f32 %v12013_v3, %v9121_v49  ;;  %v3047_v34 = vpop.f32.mrb[73].mxu0 }
 0x387   :  { %v3817_v59 = vmax.f32 %v11997_v50, %v3047_v34  ;;  %v9122_v54 = vpop.f32.mrb[74].mxu0 }
 0x388   :  { %v3820_v51 = vmax.f32 %v12004_v4, %v9122_v54  ;;  %v3050_v6 = vpop.f32.mrb[75].mxu0 }
 0x389   :  { %v3818_v60 = vmax.f32 %v12009_v10, %v3050_v6 }
 0x38d   :  { %v9125_v0 = vpop.f32.mrb[76].mxu0 }
 0x38e   :  { %v3823_v20 = vmax.f32 %v12021_v24, %v9125_v0  ;;  %v3063_v56 = vpop.f32.mrb[77].mxu0 }
 0x38f   :  { %v3821_v48 = vmax.f32 %v12011_v39, %v3063_v56  ;;  %v9126_v35 = vpop.f32.mrb[78].mxu0 }
 0x390   :  { %v3824_v45 = vmax.f32 %v12015_v40, %v9126_v35  ;;  %v3066_v44 = vpop.f32.mrb[79].mxu0 }
 0x391   :  { %v3822_v29 = vmax.f32 %v12017_v53, %v3066_v44 }
 0x395   :  { %v9129_v36 = vpop.f32.mrb[80].mxu0 }
 0x396   :  { %v3827_v50 = vmax.f32 %v12029_v62, %v9129_v36  ;;  %v3079_v25 = vpop.f32.mrb[81].mxu0 }
 0x397   :  { %v3825_v4 = vmax.f32 %v12019_v47, %v3079_v25  ;;  %v9130_v3 = vpop.f32.mrb[82].mxu0  ;;  %v9763_v47 = vld [vmem:[%s13314_s2 + $0x4] ss:$8 sps:$4 sm:$0xff]  }
 0x398   :  { %v3828_v10 = vmax.f32 %v12023_v23, %v9130_v3  ;;  %v3082_v55 = vpop.f32.mrb[83].mxu0  ;;  %8195 = vmatprep.mubr.msk.bf16.mxu1 %vm4280_vm0, %v9763_v47 }
 0x399   :  { %v3826_v21 = vmax.f32 %v12025_v11, %v3082_v55 }
 0x39d   :  { %v9133_v8 = vpop.f32.mrb[84].mxu0 }
 0x39e   :  { %v3831_v39 = vmax.f32 %v12038_v7, %v9133_v8  ;;  %v3095_v58 = vpop.f32.mrb[85].mxu0  ;;  %v3889_v8 = vlaneseq }
 0x39f   :  { %v3829_v40 = vmax.f32 %v12027_v15, %v3095_v58  ;;  %v9134_v24 = vpop.f32.mrb[86].mxu0 }
 0x3a0   :  { %v3832_v53 = vmax.f32 %v12031_v63, %v9134_v24  ;;  %v3098_v41 = vpop.f32.mrb[87].mxu0 }
 0x3a1   :  { %v3830_v23 = vmax.f32 %v12034_v14, %v3098_v41 }
 0x3a5   :  { %v9137_v26 = vpop.f32.mrb[88].mxu0 }
 0x3a6   :  { %v3835_v11 = vmax.f32 %v12046_v27, %v9137_v26  ;;  %v3111_v18 = vpop.f32.mrb[89].mxu0 }
 0x3a7   :  { %v3833_v12 = vmax.f32 %v12036_v17, %v3111_v18  ;;  %v9138_v15 = vpop.f32.mrb[90].mxu0 }
 0x3a8   :  { %v3836_v62 = vmax.f32 %v12040_v37, %v9138_v15  ;;  %v3114_v46 = vpop.f32.mrb[91].mxu0 }
 0x3a9   :  { %v3834_v63 = vmax.f32 %v12042_v9, %v3114_v46 }
 0x3ad   :  { %v9141_v16 = vpop.f32.mrb[92].mxu0 }
 0x3ae   :  { %v12077_v1 = vmax.f32 %v3814_v42, %v9141_v16  ;;  %v3127_v22 = vpop.f32.mrb[93].mxu0 }
 0x3af   :  { %v3837_v14 = vmax.f32 %v12044_v28, %v3127_v22  ;;  %v9142_v7 = vpop.f32.mrb[94].mxu0 }
 0x3b0   :  { %v12080_v43 = vmax.f32 %v3815_v33, %v9142_v7  ;;  %v3130_v5 = vpop.f32.mrb[95].mxu0 }
 0x3b1   :  { %v3838_v57 = vmax.f32 %v12049_v38, %v3130_v5 }
 0x3b5   :  { %v9145_v31 = vpop.f32.mrb[96].mxu0 }
 0x3b6   :  { %v12083_v17 = vmax.f32 %v3818_v60, %v9145_v31  ;;  %v3143_v27 = vpop.f32.mrb[97].mxu0 }
 0x3b7   :  { %v12085_v37 = vmax.f32 %v3816_v52, %v3143_v27  ;;  %v9146_v32 = vpop.f32.mrb[98].mxu0 }
 0x3b8   :  { %v12087_v9 = vmax.f32 %v3819_v13, %v9146_v32  ;;  %v3146_v30 = vpop.f32.mrb[99].mxu0 }
 0x3b9   :  { %v3842_v19 = vmax.f32 %v3817_v59, %v3146_v30 }
 0x3bd   :  { %v9149_v61 = vpop.f32.mrb[100].mxu0 }
 0x3be   :  { %v12089_v42 = vmax.f32 %v3822_v29, %v9149_v61  ;;  %v3159_v28 = vpop.f32.mrb[101].mxu0 }
 0x3bf   :  { %v12091_v33 = vmax.f32 %v3820_v51, %v3159_v28  ;;  %v9150_v49 = vpop.f32.mrb[102].mxu0 }
 0x3c0   :  { %v12093_v34 = vmax.f32 %v3823_v20, %v9150_v49  ;;  %v3162_v38 = vpop.f32.mrb[103].mxu0 }
 0x3c1   :  { %v12095_v54 = vmax.f32 %v3821_v48, %v3162_v38 }
 0x3c5   :  { %v9153_v6 = vpop.f32.mrb[104].mxu0 }
 0x3c6   :  { %v12097_v52 = vmax.f32 %v3826_v21, %v9153_v6  ;;  %v3175_v60 = vpop.f32.mrb[105].mxu0 }
 0x3c7   :  { %v12099_v13 = vmax.f32 %v3824_v45, %v3175_v60  ;;  %v9154_v0 = vpop.f32.mrb[106].mxu0 }
 0x3c8   :  { %v12101_v59 = vmax.f32 %v3827_v50, %v9154_v0  ;;  %v3178_v56 = vpop.f32.mrb[107].mxu0 }
 0x3c9   :  { %v12103_v35 = vmax.f32 %v3825_v4, %v3178_v56 }
 0x3cd   :  { %v9157_v51 = vpop.f32.mrb[108].mxu0 }
 0x3ce   :  { %v12105_v44 = vmax.f32 %v3830_v23, %v9157_v51  ;;  %v3191_v20 = vpop.f32.mrb[109].mxu0 }
 0x3cf   :  { %v12107_v29 = vmax.f32 %v3828_v10, %v3191_v20  ;;  %v9158_v48 = vpop.f32.mrb[110].mxu0  ;;  %v12121_v10 = vshrl.u32 %v3889_v8, 7 }
 0x3d0   :  { %v12109_v36 = vmax.f32 %v3831_v39, %v9158_v48  ;;  %v3194_v25 = vpop.f32.mrb[111].mxu0 }
 0x3d1   :  { %v12111_v3 = vmax.f32 %v3829_v40, %v3194_v25  ;;  %v12128_v18 = vsub.s32 0, %v12121_v10 }
 0x3d5   :  { %v9161_v45 = vpop.f32.mrb[112].mxu0 }
 0x3d6   :  { %v12113_v55 = vmax.f32 %v3834_v63, %v9161_v45  ;;  %v3207_v50 = vpop.f32.mrb[113].mxu0 }
 0x3d7   :  { %v12115_v21 = vmax.f32 %v3832_v53, %v3207_v50  ;;  %v9162_v4 = vpop.f32.mrb[114].mxu0  ;;  %v33_v53 = vld [vmem:[%s13315_s8] sm:$0xff] }
 0x3d8   :  { %v12117_v58 = vmax.f32 %v3835_v11, %v9162_v4  ;;  %v3210_v24 = vpop.f32.mrb[115].mxu0  ;;  %v12137_v46 = vrot.slane %v33_v53, %v12128_v18 }
 0x3d9   :  { %v12119_v41 = vmax.f32 %v3833_v12, %v3210_v24 }
 0x3dd   :  { %v9165_v39 = vpop.f32.mrb[116].mxu0 }
 0x3de   :  { %v12123_v47 = vmax.f32 %v3838_v57, %v9165_v39  ;;  %v3223_v40 = vpop.f32.mrb[117].mxu0 }
 0x3df   :  { %v12125_v23 = vmax.f32 %v3836_v62, %v3223_v40  ;;  %v9166_v26 = vpop.f32.mrb[118].mxu0 }
 0x3e0   :  { %v3864_v11 = vmax.f32 %v12077_v1, %v9166_v26  ;;  %v3226_v12 = vpop.f32.mrb[119].mxu0 }
 0x3e1   :  { %v12134_v15 = vmax.f32 %v3837_v14, %v3226_v12 }
 0x3e2   :  { %v3893_v22 = vadd.f32 %v12137_v46, %v3864_v11 }
 0x3e4   :  { %v3918_v32 = vmax.f32 %v3893_v22, 0.0 }
 0x3e5   :  { %v9169_v63 = vpop.f32.mrb[120].mxu0 }
 0x3e6   :  { %v3867_v16 = vmax.f32 %v3842_v19, %v9169_v63  ;;  %v3239_v62 = vpop.f32.mrb[121].mxu0 }
 0x3e7   :  { %v3865_v7 = vmax.f32 %v12080_v43, %v3239_v62  ;;  %v9170_v5 = vpop.f32.mrb[122].mxu0 }
 0x3e8   :  { %v3868_v57 = vmax.f32 %v12083_v17, %v9170_v5  ;;  %v3242_v31 = vpop.f32.mrb[123].mxu0  ;;  %v3896_v27 = vadd.f32 %v12137_v46, %v3867_v16 }
 0x3e9   :  { %v3894_v1 = vadd.f32 %v12137_v46, %v3865_v7  ;;  %v3866_v14 = vmax.f32 %v12085_v37, %v3242_v31 }
 0x3ea   :  { %v3921_v19 = vmax.f32 %v3896_v27, 0.0  ;;  %v3897_v17 = vadd.f32 %v12137_v46, %v3868_v57 }
 0x3eb   :  { %v3919_v30 = vmax.f32 %v3894_v1, 0.0  ;;  %v3895_v61 = vadd.f32 %v12137_v46, %v3866_v14 }
 0x3ed   :  { %v3920_v28 = vmax.f32 %v3895_v61, 0.0  ;;  %v9173_v49 = vpop.f32.mrb[124].mxu0  ;;  %v3943_v38 = vpack.c.bf16 %v3919_v30, %v3918_v32 }
 0x3ee   :  { %v3871_v43 = vmax.f32 %v12095_v54, %v9173_v49  ;;  %v3255_v6 = vpop.f32.mrb[125].mxu0  ;;  %v3922_v54 = vmax.f32 %v3897_v17, 0.0 }
 0x3ef   :  { %v3869_v60 = vmax.f32 %v12087_v9, %v3255_v6  ;;  %v9174_v0 = vpop.f32.mrb[126].mxu0  ;;  %4394 = vmatpush1.bf16.msra.mxu1 %v3943_v38  ;;  %v3944_v56 = vpack.c.bf16 %v3921_v19, %v3920_v28  ;;  %v9796_v9 = vld [vmem:[%s13313_s4 + $0x18] sm:$0xff]  }
 0x3f0   :  { %v3872_v37 = vmax.f32 %v12089_v42, %v9174_v0  ;;  %v3258_v51 = vpop.f32.mrb[127].mxu0  ;;  %4395 = vmatprep.subr.bf16.mxu1 %v10085_v2  ;;  %v3900_v20 = vadd.f32 %v12137_v46, %v3871_v43  ;;  %9193 = vmatprep.subr.bf16.mxu0 %v9796_v9 }
 0x3f1   :  { %v3898_v48 = vadd.f32 %v12137_v46, %v3869_v60  ;;  %v3870_v25 = vmax.f32 %v12091_v33, %v3258_v51  ;;  %9194 = vmatpush3.bf16.msra.mxu0 %v9796_v9 }
 0x3f2   :  { %v3925_v42 = vmax.f32 %v3900_v20, 0.0  ;;  %v3901_v33 = vadd.f32 %v12137_v46, %v3872_v37 }
 0x3f3   :  { %v3923_v45 = vmax.f32 %v3898_v48, 0.0  ;;  %v3899_v50 = vadd.f32 %v12137_v46, %v3870_v25  ;;  %4396 = vmatpush1.bf16.msra.mxu1 %v3944_v56 }
 0x3f4   :  { %4397 = vmatprep.subr.bf16.mxu1 %v10085_v2  ;;  %v3926_v22 = vmax.f32 %v3901_v33, 0.0 }
 0x3f5   :  { %v3924_v4 = vmax.f32 %v3899_v50, 0.0  ;;  %v9177_v8 = vpop.f32.mrb[128].mxu0  ;;  %v3945_v24 = vpack.c.bf16 %v3923_v45, %v3922_v54 }
 0x3f6   :  { %v3875_v39 = vmax.f32 %v12103_v35, %v9177_v8  ;;  %v3271_v40 = vpop.f32.mrb[129].mxu0 }
 0x3f7   :  { %v3873_v26 = vmax.f32 %v12093_v34, %v3271_v40  ;;  %v9178_v53 = vpop.f32.mrb[130].mxu0  ;;  %4398 = vmatpush1.bf16.msra.mxu1 %v3945_v24  ;;  %v3946_v11 = vpack.c.bf16 %v3925_v42, %v3924_v4 }
 0x3f8   :  { %v3876_v12 = vmax.f32 %v12097_v52, %v9178_v53  ;;  %v3274_v63 = vpop.f32.mrb[131].mxu0  ;;  %4399 = vmatprep.subr.bf16.mxu1 %v10085_v2  ;;  %v3904_v16 = vadd.f32 %v12137_v46, %v3875_v39 }
 0x3f9   :  { %v3902_v62 = vadd.f32 %v12137_v46, %v3873_v26  ;;  %v3874_v35 = vmax.f32 %v12099_v13, %v3274_v63 }
 0x3fa   :  { %v3929_v34 = vmax.f32 %v3904_v16, 0.0  ;;  %v3905_v14 = vadd.f32 %v12137_v46, %v3876_v12 }
 0x3fb   :  { %v3927_v7 = vmax.f32 %v3902_v62, 0.0  ;;  %v3903_v5 = vadd.f32 %v12137_v46, %v3874_v35  ;;  %4400 = vmatpush1.bf16.msra.mxu1 %v3946_v11 }
 0x3fc   :  { %4401 = vmatprep.subr.bf16.mxu1 %v10085_v2 }
 0x3fd   :  { %v3928_v57 = vmax.f32 %v3903_v5, 0.0  ;;  %v9181_v31 = vpop.f32.mrb[132].mxu0  ;;  %v3947_v52 = vpack.c.bf16 %v3927_v7, %v3926_v22 }
 0x3fe   :  { %v3879_v27 = vmax.f32 %v12111_v3, %v9181_v31  ;;  %v3287_v1 = vpop.f32.mrb[133].mxu0  ;;  %v3930_v3 = vmax.f32 %v3905_v14, 0.0  ;;  %v9761_v31 = vld [vmem:[%s13314_s2] ss:$8 sps:$4 sm:$0xff]  }
 0x3ff   :  { %v3877_v32 = vmax.f32 %v12101_v59, %v3287_v1  ;;  %v9182_v30 = vpop.f32.mrb[134].mxu0  ;;  %4402 = vmatpush1.bf16.msra.mxu1 %v3947_v52  ;;  %v3948_v13 = vpack.c.bf16 %v3929_v34, %v3928_v57  ;;  %v9764_v52 = vld [vmem:[%s13314_s2 + $0x14] ss:$8 sps:$4 sm:$0xff]   ;;  %v9767_v1 = vld [vmem:[%s13314_s2 + $0x24] ss:$8 sps:$4 sm:$0xff]  }
 0x400   :  { %v3880_v61 = vmax.f32 %v12105_v44, %v9182_v30  ;;  %v3290_v19 = vpop.f32.mrb[135].mxu0  ;;  %4403 = vmatprep.subr.bf16.mxu1 %v10085_v2  ;;  %v3908_v28 = vadd.f32 %v12137_v46, %v3879_v27  ;;  %v9766_v27 = vld [vmem:[%s13314_s2 + $0x10] ss:$8 sps:$4 sm:$0xff]   ;;  %v9769_v14 = vld [vmem:[%s13314_s2 + $0x20] ss:$8 sps:$4 sm:$0xff]  }
 0x401   :  { %v3906_v49 = vadd.f32 %v12137_v46, %v3877_v32  ;;  %v3878_v38 = vmax.f32 %v12107_v29, %v3290_v19  ;;  %v9770_v32 = vld [vmem:[%s13314_s2 + $0x34] ss:$8 sps:$4 sm:$0xff]   ;;  %v9772_v30 = vld [vmem:[%s13314_s2 + $0x30] ss:$8 sps:$4 sm:$0xff]  }
 0x402   :  { %v3933_v59 = vmax.f32 %v3908_v28, 0.0  ;;  %v3909_v37 = vadd.f32 %v12137_v46, %v3880_v61  ;;  %v9775_v61 = vld [vmem:[%s13314_s2 + $0x40] ss:$8 sps:$4 sm:$0xff]   ;;  %v9776_v19 = vld [vmem:[%s13314_s2 + $0x54] ss:$8 sps:$4 sm:$0xff]  }
 0x403   :  { %v3931_v43 = vmax.f32 %v3906_v49, 0.0  ;;  %v3907_v6 = vadd.f32 %v12137_v46, %v3878_v38  ;;  %4404 = vmatpush1.bf16.msra.mxu1 %v3948_v13  ;;  %v9773_v13 = vld [vmem:[%s13314_s2 + $0x44] ss:$8 sps:$4 sm:$0xff]   ;;  %v9778_v28 = vld [vmem:[%s13314_s2 + $0x50] ss:$8 sps:$4 sm:$0xff]  }
 0x404   :  { %4405 = vmatprep.subr.bf16.mxu1 %v10085_v2  ;;  %v9779_v49 = vld [vmem:[%s13314_s2 + $0x64] ss:$8 sps:$4 sm:$0xff]   ;;  %v9781_v38 = vld [vmem:[%s13314_s2 + $0x60] ss:$8 sps:$4 sm:$0xff]  }
 0x405   :  { %v3932_v17 = vmax.f32 %v3907_v6, 0.0  ;;  %v9185_v60 = vpop.f32.mrb[136].mxu0  ;;  %v3949_v44 = vpack.c.bf16 %v3931_v43, %v3930_v3  ;;  %v9782_v3 = vld [vmem:[%s13314_s2 + $0x74] ss:$8 sps:$4 sm:$0xff]   ;;  %v9784_v43 = vld [vmem:[%s13314_s2 + $0x70] ss:$8 sps:$4 sm:$0xff]  }
 0x406   :  { %v3883_v0 = vmax.f32 %v12119_v41, %v9185_v60  ;;  %v3303_v56 = vpop.f32.mrb[137].mxu0  ;;  %v3934_v41 = vmax.f32 %v3909_v37, 0.0  ;;  %v9785_v6 = vld [vmem:[%s13314_s2 + $0x84] ss:$8 sps:$4 sm:$0xff]   ;;  %v9790_v60 = vld [vmem:[%s13314_s2 + $0x90] ss:$8 sps:$4 sm:$0xff]  }
 0x407   :  { %v3881_v51 = vmax.f32 %v12109_v36, %v3303_v56  ;;  %v9186_v20 = vpop.f32.mrb[138].mxu0  ;;  %4406 = vmatpush1.bf16.msra.mxu1 %v3949_v44  ;;  %v3950_v29 = vpack.c.bf16 %v3933_v59, %v3932_v17  ;;  %v9787_v59 = vld [vmem:[%s13314_s2 + $0x80] ss:$8 sps:$4 sm:$0xff]   ;;  %v9788_v17 = vld [vmem:[%s13314_s2 + $0x94] ss:$8 sps:$4 sm:$0xff]  }
 0x408   :  { %v3884_v48 = vmax.f32 %v12113_v55, %v9186_v20  ;;  %v3306_v25 = vpop.f32.mrb[139].mxu0  ;;  %4407 = vmatprep.subr.bf16.mxu1 %v10085_v2  ;;  %v3912_v54 = vadd.f32 %v12137_v46, %v3883_v0  ;;  %v9791_v44 = vld [vmem:[%s13314_s2 + $0xa4] ss:$8 sps:$4 sm:$0xff]   ;;  %v9793_v0 = vld [vmem:[%s13314_s2 + $0xa0] ss:$8 sps:$4 sm:$0xff]  }
 0x409   :  { %v3910_v45 = vadd.f32 %v12137_v46, %v3881_v51  ;;  %v3882_v50 = vmax.f32 %v12115_v21, %v3306_v25  ;;  %v9794_v56 = vld [vmem:[%s13314_s2 + $0xb4] ss:$8 sps:$4 sm:$0xff]   ;;  %v9798_v37 = vld [vmem:[%s13314_s2 + $0xb0] ss:$8 sps:$4 sm:$0xff]   ;;  %v9799_v51 = vld [vmem:[%s13314_s2 + $0xc4] ss:$8 sps:$4 sm:$0xff]  }
 0x40a   :  { %v3937_v36 = vmax.f32 %v3912_v54, 0.0  ;;  %v3913_v40 = vadd.f32 %v12137_v46, %v3884_v48  ;;  %v9801_v20 = vld [vmem:[%s13314_s2 + $0xc0] ss:$8 sps:$4 sm:$0xff]   ;;  %v9804_v48 = vld [vmem:[%s13314_s2 + $0xd0] ss:$8 sps:$4 sm:$0xff]  }
 0x40b   :  { %v3935_v9 = vmax.f32 %v3910_v45, 0.0  ;;  %v3911_v42 = vadd.f32 %v12137_v46, %v3882_v50  ;;  %4408 = vmatpush1.bf16.msra.mxu1 %v3950_v29  ;;  %v9802_v29 = vld [vmem:[%s13314_s2 + $0xd4] ss:$8 sps:$4 sm:$0xff]   ;;  %v9805_v25 = vld [vmem:[%s13314_s2 + $0xe4] ss:$8 sps:$4 sm:$0xff]  }
 0x40c   :  { %4409 = vmatprep.subr.bf16.mxu1 %v10085_v2  ;;  %v3938_v62 = vmax.f32 %v3913_v40, 0.0  ;;  %v9852_v54 = vld [vmem:[%s13313_s4 + $0x8] sm:$0xff]   ;;  %v9808_v50 = vld [vmem:[%s13314_s2 + $0xf4] ss:$8 sps:$4 sm:$0xff]  }
 0x40d   :  { %v3936_v4 = vmax.f32 %v3911_v42, 0.0  ;;  %v9189_v8 = vpop.f32.mrb[140].mxu0  ;;  %v3951_v55 = vpack.c.bf16 %v3935_v9, %v3934_v41  ;;  %v9807_v45 = vld [vmem:[%s13314_s2 + $0xe0] ss:$8 sps:$4 sm:$0xff]   ;;  %v9810_v41 = vld [vmem:[%s13314_s2 + $0xf0] ss:$8 sps:$4 sm:$0xff]  }
 0x40e   :  { %v3887_v24 = vmax.f32 %v12134_v15, %v9189_v8  ;;  %v3319_v39 = vpop.f32.mrb[141].mxu0  ;;  %v9811_v9 = vld [vmem:[%s13314_s2 + $0x104] ss:$8 sps:$4 sm:$0xff]   ;;  %v9813_v42 = vld [vmem:[%s13314_s2 + $0x100] ss:$8 sps:$4 sm:$0xff]  }
 0x40f   :  { %v3885_v33 = vmax.f32 %v12117_v58, %v3319_v39  ;;  %v9190_v26 = vpop.f32.mrb[142].mxu0  ;;  %4410 = vmatpush1.bf16.msra.mxu1 %v3951_v55  ;;  %v3952_v21 = vpack.c.bf16 %v3937_v36, %v3936_v4  ;;  %v9814_v36 = vld [vmem:[%s13314_s2 + $0x114] ss:$8 sps:$4 sm:$0xff]   ;;  %v9816_v4 = vld [vmem:[%s13314_s2 + $0x110] ss:$8 sps:$4 sm:$0xff]  }
 0x410   :  { %v3888_v53 = vmax.f32 %v12123_v47, %v9190_v26  ;;  %v3322_v11 = vpop.f32.mrb[143].mxu0  ;;  %4411 = vmatprep.subr.bf16.mxu1 %v10085_v2  ;;  %v3916_v12 = vadd.f32 %v12137_v46, %v3887_v24  ;;  %v9817_v8 = vld [vmem:[%s13314_s2 + $0x124] ss:$8 sps:$4 sm:$0xff]   ;;  %v9819_v55 = vld [vmem:[%s13314_s2 + $0x120] ss:$8 sps:$4 sm:$0xff]  }
 0x411   :  { %v3914_v63 = vadd.f32 %v12137_v46, %v3885_v33  ;;  %v3886_v16 = vmax.f32 %v12125_v23, %v3322_v11  ;;  %v9797_v23 = vld [vmem:[%s13313_s4] sm:$0xff]   ;;  %v9820_v24 = vld [vmem:[%s13314_s2 + $0x134] ss:$8 sps:$4 sm:$0xff]   ;;  %v9822_v39 = vld [vmem:[%s13314_s2 + $0x130] ss:$8 sps:$4 sm:$0xff]  }
 0x412   :  { %v3917_v15 = vadd.f32 %v12137_v46, %v3888_v53  ;;  %v3941_v22 = vmax.f32 %v3916_v12, 0.0  ;;  %v9823_v40 = vld [vmem:[%s13314_s2 + $0x144] ss:$8 sps:$4 sm:$0xff]   ;;  %v9825_v33 = vld [vmem:[%s13314_s2 + $0x140] ss:$8 sps:$4 sm:$0xff]  }
 0x413   :  { %v3939_v35 = vmax.f32 %v3914_v63, 0.0  ;;  %v3915_v58 = vadd.f32 %v12137_v46, %v3886_v16  ;;  %4412 = vmatpush1.bf16.msra.mxu1 %v3952_v21  ;;  %v9826_v26 = vld [vmem:[%s13314_s2 + $0x154] ss:$8 sps:$4 sm:$0xff]   ;;  %v9828_v21 = vld [vmem:[%s13314_s2 + $0x150] ss:$8 sps:$4 sm:$0xff]   ;;  %v12365_v11 = vld [vmem:[%s13313_s4 + $0x20] sm:$0xff]  }
 0x414   :  { %4413 = vmatprep.subr.bf16.mxu1 %v10085_v2  ;;  %v3942_v5 = vmax.f32 %v3917_v15, 0.0  ;;  %v9829_v53 = vld [vmem:[%s13314_s2 + $0x164] ss:$8 sps:$4 sm:$0xff]   ;;  %v9831_v12 = vld [vmem:[%s13314_s2 + $0x160] ss:$8 sps:$4 sm:$0xff]  }
 0x415   :  { %v3940_v47 = vmax.f32 %v3915_v58, 0.0  ;;  %v3953_v7 = vpack.c.bf16 %v3939_v35, %v3938_v62  ;;  %v9832_v63 = vld [vmem:[%s13314_s2 + $0x174] ss:$8 sps:$4 sm:$0xff]   ;;  %v9834_v16 = vld [vmem:[%s13314_s2 + $0x170] ss:$8 sps:$4 sm:$0xff]  }
 0x416   :  { %v3955_v57 = vpack.c.bf16 %v3942_v5, %v3942_v5  ;;  %v9835_v15 = vld [vmem:[%s13314_s2 + $0x184] ss:$8 sps:$4 sm:$0xff]   ;;  %v9837_v62 = vld [vmem:[%s13314_s2 + $0x180] ss:$8 sps:$4 sm:$0xff]   ;;  %v9838_v35 = vld [vmem:[%s13314_s2 + $0x194] ss:$8 sps:$4 sm:$0xff]  }
 0x417   :  { %4414 = vmatpush1.bf16.msra.mxu1 %v3953_v7  ;;  %v3954_v34 = vpack.c.bf16 %v3941_v22, %v3940_v47  ;;  %v9840_v58 = vld [vmem:[%s13314_s2 + $0x190] ss:$8 sps:$4 sm:$0xff]   ;;  %v9841_v22 = vld [vmem:[%s13314_s2 + $0x1a4] ss:$8 sps:$4 sm:$0xff]   ;;  %v9843_v47 = vld [vmem:[%s13314_s2 + $0x1a0] ss:$8 sps:$4 sm:$0xff]  }
 0x418   :  { %4415 = vmatprep.subr.bf16.mxu1 %v10085_v2  ;;  %v4391_v46 = vsel %vm4389_vm1, %v3955_v57, 0  ;;  %v9844_v7 = vld [vmem:[%s13314_s2 + $0x1b4] ss:$8 sps:$4 sm:$0xff]   ;;  %v9846_v57 = vld [vmem:[%s13314_s2 + $0x1b0] ss:$8 sps:$4 sm:$0xff]  }
 0x41b   :  { %4416 = vmatpush1.bf16.msra.mxu1 %v3954_v34 }
 0x41c   :  { %4417 = vmatprep.subr.bf16.mxu1 %v10085_v2 }
 0x41f   :  { %4418 = vmatpush1.bf16.msra.mxu1 %v4391_v46  ;;  %v9847_v46 = vld [vmem:[%s13314_s2 + $0x1c4] ss:$8 sps:$4 sm:$0xff]  }
 0x420   :  { %9203 = vmatprep.subr.bf16.mxu1 %v9797_v23 }
 0x422   :  { %4426 = vmatmul.mubr.bf16.vlgmr.msra.gmra.mrb[0].mxu1 %v9761_v31 }
 0x423   :  { %8196 = vmatprep.mubr.msk.bf16.mxu1 %vm4280_vm0, %v9764_v52  ;;  %9204 = vmatpush3.bf16.msra.mxu1 %v9797_v23 }
 0x424   :  { %9205 = vmatprep.subr.bf16.mxu1 %v9852_v54 }
 0x427   :  { %9206 = vmatpush3.bf16.msra.mxu1 %v9852_v54 }
 0x428   :  { %9215 = vmatprep.subr.bf16.mxu1 %v12365_v11 }
 0x42a   :  { %4434 = vmatmul.mubr.bf16.gmra.mrb[4].mxu1 %v9766_v27 }
 0x42b   :  { %8197 = vmatprep.mubr.msk.bf16.mxu1 %vm4280_vm0, %v9767_v1 }
 0x432   :  { %4442 = vmatmul.mubr.bf16.gmra.mrb[8].mxu1 %v9769_v14  ;;  %v9849_v14 = vld [vmem:[%s13314_s2 + $0x1c0] ss:$8 sps:$4 sm:$0xff]  }
 0x433   :  { %8198 = vmatprep.mubr.msk.bf16.mxu1 %vm4280_vm0, %v9770_v32 }
 0x43a   :  { %4450 = vmatmul.mubr.bf16.gmra.mrb[12].mxu1 %v9772_v30  ;;  %v9850_v30 = vld [vmem:[%s13314_s2 + $0x1d4] ss:$8 sps:$4 sm:$0xff]  }
 0x43b   :  { %8199 = vmatprep.mubr.msk.bf16.mxu1 %vm4280_vm0, %v9773_v13 }
 0x442   :  { %4458 = vmatmul.mubr.bf16.gmra.mrb[16].mxu1 %v9775_v61 }
 0x443   :  { %8200 = vmatprep.mubr.msk.bf16.mxu1 %vm4280_vm0, %v9776_v19 }
 0x44a   :  { %4466 = vmatmul.mubr.bf16.gmra.mrb[20].mxu1 %v9778_v28 }
 0x44b   :  { %8201 = vmatprep.mubr.msk.bf16.mxu1 %vm4280_vm0, %v9779_v49  ;;  %v9853_v49 = vld [vmem:[%s13314_s2 + $0x1d0] ss:$8 sps:$4 sm:$0xff]  }
 0x452   :  { %4474 = vmatmul.mubr.bf16.gmra.mrb[24].mxu1 %v9781_v38 }
 0x453   :  { %8202 = vmatprep.mubr.msk.bf16.mxu1 %vm4280_vm0, %v9782_v3  ;;  %v9854_v3 = vld [vmem:[%s13314_s2 + $0x1e4] ss:$8 sps:$4 sm:$0xff]  }
 0x45a   :  { %4482 = vmatmul.mubr.bf16.gmra.mrb[28].mxu1 %v9784_v43 }
 0x45b   :  { %8203 = vmatprep.mubr.msk.bf16.mxu1 %vm4280_vm0, %v9785_v6 }
 0x462   :  { %4490 = vmatmul.mubr.bf16.gmra.mrb[32].mxu1 %v9787_v59 }
 0x463   :  { %8204 = vmatprep.mubr.msk.bf16.mxu1 %vm4280_vm0, %v9788_v17 }
 0x46a   :  { %4498 = vmatmul.mubr.bf16.gmra.mrb[36].mxu1 %v9790_v60  ;;  %v9856_v60 = vld [vmem:[%s13314_s2 + $0x1e0] ss:$8 sps:$4 sm:$0xff]  }
 0x46b   :  { %8205 = vmatprep.mubr.msk.bf16.mxu1 %vm4280_vm0, %v9791_v44 }
 0x472   :  { %4506 = vmatmul.mubr.bf16.gmra.mrb[40].mxu1 %v9793_v0  ;;  %v9857_v0 = vld [vmem:[%s13314_s2 + $0x1f4] ss:$8 sps:$4 sm:$0xff]  }
 0x473   :  { %8206 = vmatprep.mubr.msk.bf16.mxu1 %vm4280_vm0, %v9794_v56 }
 0x47a   :  { %4514 = vmatmul.mubr.bf16.gmra.mrb[44].mxu1 %v9798_v37 }
 0x47b   :  { %8207 = vmatprep.mubr.msk.bf16.mxu1 %vm4280_vm0, %v9799_v51 }
 0x482   :  { %4522 = vmatmul.mubr.bf16.gmra.mrb[48].mxu1 %v9801_v20 }
 0x483   :  { %8208 = vmatprep.mubr.msk.bf16.mxu1 %vm4280_vm0, %v9802_v29  ;;  %v9859_v29 = vld [vmem:[%s13314_s2 + $0x1f0] ss:$8 sps:$4 sm:$0xff]  }
 0x48a   :  { %4530 = vmatmul.mubr.bf16.gmra.mrb[52].mxu1 %v9804_v48 }
 0x48b   :  { %8209 = vmatprep.mubr.msk.bf16.mxu1 %vm4280_vm0, %v9805_v25  ;;  %v9860_v25 = vld [vmem:[%s13314_s2 + $0x204] ss:$8 sps:$4 sm:$0xff]  }
 0x492   :  { %4538 = vmatmul.mubr.bf16.gmra.mrb[56].mxu1 %v9807_v45 }
 0x493   :  { %8210 = vmatprep.mubr.msk.bf16.mxu1 %vm4280_vm0, %v9808_v50 }
 0x49a   :  { %4546 = vmatmul.mubr.bf16.gmra.mrb[60].mxu1 %v9810_v41 }
 0x49b   :  { %8211 = vmatprep.mubr.msk.bf16.mxu1 %vm4280_vm0, %v9811_v9  ;;  %v9862_v9 = vld [vmem:[%s13314_s2 + $0x200] ss:$8 sps:$4 sm:$0xff]  }
 0x4a2   :  { %4554 = vmatmul.mubr.bf16.gmra.mrb[64].mxu1 %v9813_v42 }
 0x4a3   :  { %8212 = vmatprep.mubr.msk.bf16.mxu1 %vm4280_vm0, %v9814_v36  ;;  %v9863_v36 = vld [vmem:[%s13314_s2 + $0x214] ss:$8 sps:$4 sm:$0xff]  }
 0x4aa   :  { %4562 = vmatmul.mubr.bf16.gmra.mrb[68].mxu1 %v9816_v4 }
 0x4ab   :  { %8213 = vmatprep.mubr.msk.bf16.mxu1 %vm4280_vm0, %v9817_v8 }
 0x4b2   :  { %4570 = vmatmul.mubr.bf16.gmra.mrb[72].mxu1 %v9819_v55 }
 0x4b3   :  { %8214 = vmatprep.mubr.msk.bf16.mxu1 %vm4280_vm0, %v9820_v24 }
 0x4ba   :  { %4578 = vmatmul.mubr.bf16.gmra.mrb[76].mxu1 %v9822_v39  ;;  %v9865_v39 = vld [vmem:[%s13314_s2 + $0x210] ss:$8 sps:$4 sm:$0xff]  }
 0x4bb   :  { %8215 = vmatprep.mubr.msk.bf16.mxu1 %vm4280_vm0, %v9823_v40 }
 0x4c2   :  { %4586 = vmatmul.mubr.bf16.gmra.mrb[80].mxu1 %v9825_v33  ;;  %v9866_v33 = vld [vmem:[%s13314_s2 + $0x224] ss:$8 sps:$4 sm:$0xff]  }
 0x4c3   :  { %8216 = vmatprep.mubr.msk.bf16.mxu1 %vm4280_vm0, %v9826_v26 }
 0x4ca   :  { %4594 = vmatmul.mubr.bf16.gmra.mrb[84].mxu1 %v9828_v21 }
 0x4cb   :  { %8217 = vmatprep.mubr.msk.bf16.mxu1 %vm4280_vm0, %v9829_v53 }
 0x4d2   :  { %4602 = vmatmul.mubr.bf16.gmra.mrb[88].mxu1 %v9831_v12 }
 0x4d3   :  { %8218 = vmatprep.mubr.msk.bf16.mxu1 %vm4280_vm0, %v9832_v63  ;;  %v9868_v63 = vld [vmem:[%s13314_s2 + $0x220] ss:$8 sps:$4 sm:$0xff]  }
 0x4da   :  { %4610 = vmatmul.mubr.bf16.gmra.mrb[92].mxu1 %v9834_v16 }
 0x4db   :  { %8219 = vmatprep.mubr.msk.bf16.mxu1 %vm4280_vm0, %v9835_v15  ;;  %v9869_v15 = vld [vmem:[%s13314_s2 + $0x234] ss:$8 sps:$4 sm:$0xff]  }
 0x4e2   :  { %4618 = vmatmul.mubr.bf16.gmra.mrb[96].mxu1 %v9837_v62 }
 0x4e3   :  { %8220 = vmatprep.mubr.msk.bf16.mxu1 %vm4280_vm0, %v9838_v35 }
 0x4ea   :  { %4626 = vmatmul.mubr.bf16.gmra.mrb[100].mxu1 %v9840_v58 }
 0x4eb   :  { %8221 = vmatprep.mubr.msk.bf16.mxu1 %vm4280_vm0, %v9841_v22 }
 0x4f2   :  { %4634 = vmatmul.mubr.bf16.gmra.mrb[104].mxu1 %v9843_v47  ;;  %v9871_v47 = vld [vmem:[%s13314_s2 + $0x230] ss:$8 sps:$4 sm:$0xff]  }
 0x4f3   :  { %8222 = vmatprep.mubr.msk.bf16.mxu1 %vm4280_vm0, %v9844_v7 }
 0x4f5   :  { %v12404_v5 = vpop.f32.mrb[0].mxu1 }
 0x4f6   :  { %v4429_v34 = vpop.f32.mrb[1].mxu1 }
 0x4f7   :  { %v12409_v23 = vpop.f32.mrb[2].mxu1 }
 0x4f8   :  { %v4714_v31 = vpack.c.bf16 %v12409_v23, %v12404_v5  ;;  %v4432_v52 = vpop.f32.mrb[3].mxu1  ;;  %v9874_v5 = vld [vmem:[%s13313_s4 + $0x30] sm:$0xff]  }
 0x4fa   :  { %4642 = vmatmul.mubr.bf16.gmra.mrb[108].mxu1 %v9846_v57 }
 0x4fb   :  { %8223 = vmatprep.mubr.msk.bf16.mxu1 %vm4280_vm0, %v9847_v46 }
 0x4fd   :  { %v12417_v27 = vpop.f32.mrb[4].mxu1 }
 0x4fe   :  { %v4437_v1 = vpop.f32.mrb[5].mxu1 }
 0x4ff   :  { %v12422_v32 = vpop.f32.mrb[6].mxu1 }
 0x500   :  { %v4715_v13 = vpack.c.bf16 %v12422_v32, %v12417_v27  ;;  %v4440_v61 = vpop.f32.mrb[7].mxu1 }
 0x501   :  { %v9873_v61 = vld [vmem:[%s13313_s4 + $0x28] sm:$0xff]  }
 0x502   :  { %4650 = vmatmul.mubr.bf16.gmra.mrb[112].mxu1 %v9849_v14 }
 0x503   :  { %8224 = vmatprep.mubr.msk.bf16.mxu1 %vm4280_vm0, %v9850_v30 }
 0x505   :  { %v12430_v19 = vpop.f32.mrb[8].mxu1 }
 0x506   :  { %v4445_v28 = vpop.f32.mrb[9].mxu1 }
 0x507   :  { %v12435_v38 = vpop.f32.mrb[10].mxu1 }
 0x508   :  { %v4716_v43 = vpack.c.bf16 %v12435_v38, %v12430_v19  ;;  %v4448_v6 = vpop.f32.mrb[11].mxu1 }
 0x50a   :  { %4658 = vmatmul.mubr.bf16.gmra.mrb[116].mxu1 %v9853_v49 }
 0x50b   :  { %8225 = vmatprep.mubr.msk.bf16.mxu1 %vm4280_vm0, %v9854_v3  ;;  %v9875_v3 = vld [vmem:[%s13313_s4 + $0x38] sm:$0xff]  }
 0x50d   :  { %v12443_v59 = vpop.f32.mrb[12].mxu1 }
 0x50e   :  { %v4453_v17 = vpop.f32.mrb[13].mxu1 }
 0x50f   :  { %v12448_v44 = vpop.f32.mrb[14].mxu1 }
 0x510   :  { %v4717_v56 = vpack.c.bf16 %v12448_v44, %v12443_v59  ;;  %v4456_v37 = vpop.f32.mrb[15].mxu1 }
 0x512   :  { %4666 = vmatmul.mubr.bf16.gmra.mrb[120].mxu1 %v9856_v60 }
 0x513   :  { %8226 = vmatprep.mubr.msk.bf16.mxu1 %vm4280_vm0, %v9857_v0 }
 0x515   :  { %v4459_v51 = vpop.f32.mrb[16].mxu1 }
 0x516   :  { %v4461_v20 = vpop.f32.mrb[17].mxu1 }
 0x517   :  { %v4462_v48 = vpop.f32.mrb[18].mxu1 }
 0x518   :  { %v4718_v54 = vpack.c.bf16 %v4462_v48, %v4459_v51  ;;  %v4464_v45 = vpop.f32.mrb[19].mxu1  ;;  %v9878_v48 = vld [vmem:[%s13313_s4 + $0x50] sm:$0xff]  }
 0x51a   :  { %4674 = vmatmul.mubr.bf16.gmra.mrb[124].mxu1 %v9859_v29  ;;  %9195 = vmatprep.mubr.msk.bf16.mxu0 %vm4734_vm2, %v4718_v54  ;;  %v9877_v29 = vld [vmem:[%s13313_s4 + $0x48] sm:$0xff]  }
 0x51b   :  { %8227 = vmatprep.mubr.msk.bf16.mxu1 %vm4280_vm0, %v9860_v25 }
 0x51d   :  { %v4467_v50 = vpop.f32.mrb[20].mxu1 }
 0x51e   :  { %v4469_v41 = vpop.f32.mrb[21].mxu1 }
 0x51f   :  { %v4470_v42 = vpop.f32.mrb[22].mxu1 }
 0x520   :  { %v4719_v4 = vpack.c.bf16 %v4470_v42, %v4467_v50  ;;  %v4472_v8 = vpop.f32.mrb[23].mxu1 }
 0x522   :  { %4682 = vmatmul.mubr.bf16.gmra.mrb[128].mxu1 %v9862_v9  ;;  %9196 = vmatmul.mubr.msk.bf16.vlgmr.msra.gmra.mrb[144].mxu0 %vm4734_vm2, %v4719_v4 }
 0x523   :  { %8228 = vmatprep.mubr.msk.bf16.mxu1 %vm4280_vm0, %v9863_v36 }
 0x525   :  { %v4475_v55 = vpop.f32.mrb[24].mxu1 }
 0x526   :  { %v4477_v24 = vpop.f32.mrb[25].mxu1 }
 0x527   :  { %v4478_v40 = vpop.f32.mrb[26].mxu1 }
 0x528   :  { %v4720_v26 = vpack.c.bf16 %v4478_v40, %v4475_v55  ;;  %v4480_v21 = vpop.f32.mrb[27].mxu1 }
 0x52a   :  { %4690 = vmatmul.mubr.bf16.gmra.mrb[132].mxu1 %v9865_v39  ;;  %9199 = vmatprep.mubr.msk.bf16.mxu0 %vm4734_vm2, %v4720_v26 }
 0x52b   :  { %8229 = vmatprep.mubr.msk.bf16.mxu1 %vm4280_vm0, %v9866_v33 }
 0x52d   :  { %v4483_v53 = vpop.f32.mrb[28].mxu1 }
 0x52e   :  { %v4485_v12 = vpop.f32.mrb[29].mxu1 }
 0x52f   :  { %v4486_v16 = vpop.f32.mrb[30].mxu1 }
 0x530   :  { %v4721_v62 = vpack.c.bf16 %v4486_v16, %v4483_v53  ;;  %v4488_v35 = vpop.f32.mrb[31].mxu1  ;;  %v9879_v16 = vld [vmem:[%s13313_s4 + $0x58] sm:$0xff]  }
 0x532   :  { %4698 = vmatmul.mubr.bf16.gmra.mrb[136].mxu1 %v9868_v63  ;;  %9200 = vmatmul.mubr.msk.bf16.gmra.mrb[148].mxu0 %vm4734_vm2, %v4721_v62 }
 0x533   :  { %8230 = vmatprep.mubr.msk.bf16.mxu1 %vm4280_vm0, %v9869_v15  ;;  %7373 = vmatprep.mubr.bf16.mxu0 %v10085_v2  ;;  %v9880_v15 = vld [vmem:[%s13313_s4 + $0x60] sm:$0xff]  }
 0x535   :  { %v4491_v58 = vpop.f32.mrb[32].mxu1 }
 0x536   :  { %v4493_v22 = vpop.f32.mrb[33].mxu1 }
 0x537   :  { %v4494_v7 = vpop.f32.mrb[34].mxu1 }
 0x538   :  { %v4901_v34 = vpack.c.bf16 %v4494_v7, %v4491_v58  ;;  %v4496_v57 = vpop.f32.mrb[35].mxu1 }
 0x53a   :  { %4706 = vmatmul.mubr.bf16.gmra.mrb[140].mxu1 %v9871_v47 }
 0x53b   :  { %9207 = vmatprep.mubr.msk.bf16.mxu1 %vm4734_vm2, %v4714_v31 }
 0x53d   :  { %v4499_v46 = vpop.f32.mrb[36].mxu1 }
 0x53e   :  { %v4501_v52 = vpop.f32.mrb[37].mxu1 }
 0x53f   :  { %v4502_v1 = vpop.f32.mrb[38].mxu1 }
 0x540   :  { %v4902_v14 = vpack.c.bf16 %v4502_v1, %v4499_v46  ;;  %v4504_v30 = vpop.f32.mrb[39].mxu1 }
 0x542   :  { %9208 = vmatmul.mubr.msk.bf16.vlgmr.msra.gmra.mrb[144].mxu1 %vm4734_vm2, %v4715_v13 }
 0x543   :  { %9211 = vmatprep.mubr.msk.bf16.mxu1 %vm4734_vm2, %v4716_v43  ;;  %9216 = vmatpush3.bf16.msra.mxu1 %v12365_v11  ;;  %v9876_v43 = vld [vmem:[%s13313_s4 + $0x40] sm:$0xff]  }
 0x544   :  { %9217 = vmatprep.subr.bf16.mxu1 %v9873_v61 }
 0x545   :  { %v4507_v23 = vpop.f32.mrb[40].mxu1 }
 0x546   :  { %v4509_v31 = vpop.f32.mrb[41].mxu1 }
 0x547   :  { %v4510_v28 = vpop.f32.mrb[42].mxu1  ;;  %9218 = vmatpush3.bf16.msra.mxu1 %v9873_v61 }
 0x548   :  { %v4903_v49 = vpack.c.bf16 %v4510_v28, %v4507_v23  ;;  %v4512_v27 = vpop.f32.mrb[43].mxu1  ;;  %9227 = vmatprep.subr.bf16.mxu1 %v9874_v5 }
 0x54a   :  { %9212 = vmatmul.mubr.msk.bf16.gmra.mrb[148].mxu1 %vm4734_vm2, %v4717_v56 }
 0x54b   :  { %9219 = vmatprep.mubr.msk.bf16.mxu1 %vm4734_vm2, %v4901_v34 }
 0x54d   :  { %v4515_v11 = vpop.f32.mrb[44].mxu1 }
 0x54e   :  { %v4517_v32 = vpop.f32.mrb[45].mxu1 }
 0x54f   :  { %v4518_v13 = vpop.f32.mrb[46].mxu1  ;;  %v9882_v32 = vld [vmem:[%s13313_s4 + $0x70] sm:$0xff]  }
 0x550   :  { %v4904_v19 = vpack.c.bf16 %v4518_v13, %v4515_v11  ;;  %v4520_v38 = vpop.f32.mrb[47].mxu1  ;;  %v9881_v11 = vld [vmem:[%s13313_s4 + $0x68] sm:$0xff]  }
 0x552   :  { %9220 = vmatmul.mubr.msk.bf16.vlgmr.msra.gmra.mrb[144].mxu1 %vm4734_vm2, %v4902_v14 }
 0x553   :  { %9223 = vmatprep.mubr.msk.bf16.mxu1 %vm4734_vm2, %v4903_v49  ;;  %9228 = vmatpush3.bf16.msra.mxu1 %v9874_v5 }
 0x554   :  { %9229 = vmatprep.subr.bf16.mxu1 %v9875_v3 }
 0x555   :  { %v4523_v6 = vpop.f32.mrb[48].mxu1 }
 0x556   :  { %v4525_v59 = vpop.f32.mrb[49].mxu1 }
 0x557   :  { %v4526_v17 = vpop.f32.mrb[50].mxu1  ;;  %9230 = vmatpush3.bf16.msra.mxu1 %v9875_v3 }
 0x558   :  { %v5002_v60 = vpack.c.bf16 %v4526_v17, %v4523_v6  ;;  %v4528_v44 = vpop.f32.mrb[51].mxu1  ;;  %9239 = vmatprep.subr.bf16.mxu1 %v9876_v43 }
 0x55a   :  { %9224 = vmatmul.mubr.msk.bf16.gmra.mrb[148].mxu1 %vm4734_vm2, %v4904_v19 }
 0x55b   :  { %9231 = vmatprep.mubr.msk.bf16.mxu1 %vm4734_vm2, %v5002_v60 }
 0x55d   :  { %v4531_v0 = vpop.f32.mrb[52].mxu1 }
 0x55e   :  { %v4533_v56 = vpop.f32.mrb[53].mxu1 }
 0x55f   :  { %v4534_v37 = vpop.f32.mrb[54].mxu1 }
 0x560   :  { %v5003_v51 = vpack.c.bf16 %v4534_v37, %v4531_v0  ;;  %v4536_v20 = vpop.f32.mrb[55].mxu1 }
 0x562   :  { %9232 = vmatmul.mubr.msk.bf16.vlgmr.msra.gmra.mrb[144].mxu1 %vm4734_vm2, %v5003_v51 }
 0x563   :  { %9240 = vmatpush3.bf16.msra.mxu1 %v9876_v43 }
 0x564   :  { %9241 = vmatprep.subr.bf16.mxu1 %v9877_v29 }
 0x565   :  { %v4539_v25 = vpop.f32.mrb[56].mxu1 }
 0x566   :  { %v4541_v54 = vpop.f32.mrb[57].mxu1 }
 0x567   :  { %v4542_v45 = vpop.f32.mrb[58].mxu1  ;;  %9242 = vmatpush3.bf16.msra.mxu1 %v9877_v29 }
 0x568   :  { %v5004_v50 = vpack.c.bf16 %v4542_v45, %v4539_v25  ;;  %v4544_v41 = vpop.f32.mrb[59].mxu1  ;;  %9251 = vmatprep.subr.bf16.mxu1 %v9878_v48 }
 0x569   :  { %v9884_v41 = vld [vmem:[%s13313_s4 + $0x80] sm:$0xff]  }
 0x56a   :  { %9235 = vmatprep.mubr.msk.bf16.mxu1 %vm4734_vm2, %v5004_v50  ;;  %v9883_v50 = vld [vmem:[%s13313_s4 + $0x78] sm:$0xff]  }
 0x56d   :  { %v4547_v9 = vpop.f32.mrb[60].mxu1 }
 0x56e   :  { %v4549_v42 = vpop.f32.mrb[61].mxu1 }
 0x56f   :  { %v4550_v36 = vpop.f32.mrb[62].mxu1 }
 0x570   :  { %v5005_v4 = vpack.c.bf16 %v4550_v36, %v4547_v9  ;;  %v4552_v8 = vpop.f32.mrb[63].mxu1 }
 0x572   :  { %9236 = vmatmul.mubr.msk.bf16.gmra.mrb[148].mxu1 %vm4734_vm2, %v5005_v4 }
 0x575   :  { %v4555_v55 = vpop.f32.mrb[64].mxu1 }
 0x576   :  { %v4557_v24 = vpop.f32.mrb[65].mxu1 }
 0x577   :  { %v4558_v39 = vpop.f32.mrb[66].mxu1 }
 0x578   :  { %v5103_v40 = vpack.c.bf16 %v4558_v39, %v4555_v55  ;;  %v4560_v33 = vpop.f32.mrb[67].mxu1 }
 0x57a   :  { %9243 = vmatprep.mubr.msk.bf16.mxu1 %vm4734_vm2, %v5103_v40 }
 0x57d   :  { %v4563_v26 = vpop.f32.mrb[68].mxu1 }
 0x57e   :  { %v4565_v21 = vpop.f32.mrb[69].mxu1 }
 0x57f   :  { %v4566_v53 = vpop.f32.mrb[70].mxu1 }
 0x580   :  { %v5104_v12 = vpack.c.bf16 %v4566_v53, %v4563_v26  ;;  %v4568_v63 = vpop.f32.mrb[71].mxu1 }
 0x582   :  { %9244 = vmatmul.mubr.msk.bf16.vlgmr.msra.gmra.mrb[144].mxu1 %vm4734_vm2, %v5104_v12 }
 0x583   :  { %9252 = vmatpush3.bf16.msra.mxu1 %v9878_v48 }
 0x584   :  { %9253 = vmatprep.subr.bf16.mxu1 %v9879_v16 }
 0x585   :  { %v4571_v62 = vpop.f32.mrb[72].mxu1 }
 0x586   :  { %v4573_v35 = vpop.f32.mrb[73].mxu1 }
 0x587   :  { %v4574_v58 = vpop.f32.mrb[74].mxu1  ;;  %9254 = vmatpush3.bf16.msra.mxu1 %v9879_v16 }
 0x588   :  { %v5105_v22 = vpack.c.bf16 %v4574_v58, %v4571_v62  ;;  %v4576_v47 = vpop.f32.mrb[75].mxu1  ;;  %9263 = vmatprep.subr.bf16.mxu1 %v9880_v15 }
 0x58a   :  { %9247 = vmatprep.mubr.msk.bf16.mxu1 %vm4734_vm2, %v5105_v22  ;;  %v9885_v22 = vld [vmem:[%s13313_s4 + $0x88] sm:$0xff]  }
 0x58d   :  { %v4579_v7 = vpop.f32.mrb[76].mxu1 }
 0x58e   :  { %v4581_v34 = vpop.f32.mrb[77].mxu1 }
 0x58f   :  { %v4582_v57 = vpop.f32.mrb[78].mxu1 }
 0x590   :  { %v5106_v46 = vpack.c.bf16 %v4582_v57, %v4579_v7  ;;  %v4584_v52 = vpop.f32.mrb[79].mxu1 }
 0x592   :  { %9248 = vmatmul.mubr.msk.bf16.gmra.mrb[148].mxu1 %vm4734_vm2, %v5106_v46 }
 0x595   :  { %v4587_v1 = vpop.f32.mrb[80].mxu1 }
 0x596   :  { %v4589_v14 = vpop.f32.mrb[81].mxu1 }
 0x597   :  { %v4590_v30 = vpop.f32.mrb[82].mxu1 }
 0x598   :  { %v5204_v61 = vpack.c.bf16 %v4590_v30, %v4587_v1  ;;  %v4592_v5 = vpop.f32.mrb[83].mxu1 }
 0x59a   :  { %9255 = vmatprep.mubr.msk.bf16.mxu1 %vm4734_vm2, %v5204_v61 }
 0x59d   :  { %v4595_v23 = vpop.f32.mrb[84].mxu1 }
 0x59e   :  { %v4597_v31 = vpop.f32.mrb[85].mxu1 }
 0x59f   :  { %v4598_v28 = vpop.f32.mrb[86].mxu1 }
 0x5a0   :  { %v5205_v49 = vpack.c.bf16 %v4598_v28, %v4595_v23  ;;  %v4600_v27 = vpop.f32.mrb[87].mxu1 }
 0x5a2   :  { %9256 = vmatmul.mubr.msk.bf16.vlgmr.msra.gmra.mrb[144].mxu1 %vm4734_vm2, %v5205_v49 }
 0x5a3   :  { %9264 = vmatpush3.bf16.msra.mxu1 %v9880_v15 }
 0x5a4   :  { %9265 = vmatprep.subr.bf16.mxu1 %v9881_v11 }
 0x5a5   :  { %v4603_v13 = vpop.f32.mrb[88].mxu1 }
 0x5a6   :  { %v4605_v19 = vpop.f32.mrb[89].mxu1 }
 0x5a7   :  { %v4606_v38 = vpop.f32.mrb[90].mxu1  ;;  %9266 = vmatpush3.bf16.msra.mxu1 %v9881_v11 }
 0x5a8   :  { %v5206_v3 = vpack.c.bf16 %v4606_v38, %v4603_v13  ;;  %v4608_v43 = vpop.f32.mrb[91].mxu1  ;;  %9275 = vmatprep.subr.bf16.mxu1 %v9882_v32 }
 0x5aa   :  { %9259 = vmatprep.mubr.msk.bf16.mxu1 %vm4734_vm2, %v5206_v3 }
 0x5ad   :  { %v4611_v6 = vpop.f32.mrb[92].mxu1 }
 0x5ae   :  { %v4613_v59 = vpop.f32.mrb[93].mxu1 }
 0x5af   :  { %v4614_v17 = vpop.f32.mrb[94].mxu1 }
 0x5b0   :  { %v5207_v60 = vpack.c.bf16 %v4614_v17, %v4611_v6  ;;  %v4616_v44 = vpop.f32.mrb[95].mxu1 }
 0x5b2   :  { %9260 = vmatmul.mubr.msk.bf16.gmra.mrb[148].mxu1 %vm4734_vm2, %v5207_v60 }
 0x5b5   :  { %v4619_v0 = vpop.f32.mrb[96].mxu1 }
 0x5b6   :  { %v4621_v56 = vpop.f32.mrb[97].mxu1 }
 0x5b7   :  { %v4622_v37 = vpop.f32.mrb[98].mxu1 }
 0x5b8   :  { %v5305_v51 = vpack.c.bf16 %v4622_v37, %v4619_v0  ;;  %v4624_v20 = vpop.f32.mrb[99].mxu1 }
 0x5ba   :  { %9267 = vmatprep.mubr.msk.bf16.mxu1 %vm4734_vm2, %v5305_v51 }
 0x5bd   :  { %v4627_v29 = vpop.f32.mrb[100].mxu1 }
 0x5be   :  { %v4629_v48 = vpop.f32.mrb[101].mxu1 }
 0x5bf   :  { %v4630_v25 = vpop.f32.mrb[102].mxu1 }
 0x5c0   :  { %v5306_v54 = vpack.c.bf16 %v4630_v25, %v4627_v29  ;;  %v4632_v45 = vpop.f32.mrb[103].mxu1 }
 0x5c2   :  { %9268 = vmatmul.mubr.msk.bf16.vlgmr.msra.gmra.mrb[144].mxu1 %vm4734_vm2, %v5306_v54 }
 0x5c3   :  { %9276 = vmatpush3.bf16.msra.mxu1 %v9882_v32 }
 0x5c4   :  { %9277 = vmatprep.subr.bf16.mxu1 %v9883_v50 }
 0x5c5   :  { %v4635_v9 = vpop.f32.mrb[104].mxu1 }
 0x5c6   :  { %v4637_v42 = vpop.f32.mrb[105].mxu1 }
 0x5c7   :  { %v4638_v36 = vpop.f32.mrb[106].mxu1  ;;  %9278 = vmatpush3.bf16.msra.mxu1 %v9883_v50  ;;  %v9886_v50 = vld [vmem:[%s13313_s4 + $0xb0] sm:$0xff]   ;;  %v12586_v42 = vsub.s32 1, %v12121_v10 }
 0x5c8   :  { %v5307_v4 = vpack.c.bf16 %v4638_v36, %v4635_v9  ;;  %v4640_v8 = vpop.f32.mrb[107].mxu1  ;;  %9287 = vmatprep.subr.bf16.mxu1 %v9884_v41  ;;  %v9887_v9 = vld [vmem:[%s13313_s4 + $0xb8] sm:$0xff]   ;;  %v9888_v36 = vld [vmem:[%s13313_s4 + $0xc0] sm:$0xff]  }
 0x5ca   :  { %9271 = vmatprep.mubr.msk.bf16.mxu1 %vm4734_vm2, %v5307_v4  ;;  %v35_v4 = vld [vmem:[%s13315_s8 + $0x10] sm:$0xff] }
 0x5cb   :  { %v12595_v8 = vrot.slane %v35_v4, %v12586_v42  ;;  %v9912_v4 = vld [vmem:[%s13313_s4 + $0x160] sm:$0xff]  }
 0x5cd   :  { %v4643_v55 = vpop.f32.mrb[108].mxu1 }
 0x5ce   :  { %v4645_v24 = vpop.f32.mrb[109].mxu1 }
 0x5cf   :  { %v4646_v39 = vpop.f32.mrb[110].mxu1 }
 0x5d0   :  { %v5308_v40 = vpack.c.bf16 %v4646_v39, %v4643_v55  ;;  %v4648_v33 = vpop.f32.mrb[111].mxu1  ;;  %v9889_v55 = vld [vmem:[%s13313_s4 + $0xc8] sm:$0xff]  }
 0x5d2   :  { %9272 = vmatmul.mubr.msk.bf16.gmra.mrb[148].mxu1 %vm4734_vm2, %v5308_v40 }
 0x5d5   :  { %v4651_v26 = vpop.f32.mrb[112].mxu1 }
 0x5d6   :  { %v4653_v21 = vpop.f32.mrb[113].mxu1 }
 0x5d7   :  { %v4654_v53 = vpop.f32.mrb[114].mxu1 }
 0x5d8   :  { %v5406_v12 = vpack.c.bf16 %v4654_v53, %v4651_v26  ;;  %v4656_v63 = vpop.f32.mrb[115].mxu1 }
 0x5da   :  { %9279 = vmatprep.mubr.msk.bf16.mxu1 %vm4734_vm2, %v5406_v12 }
 0x5dd   :  { %v4659_v16 = vpop.f32.mrb[116].mxu1 }
 0x5de   :  { %v4661_v15 = vpop.f32.mrb[117].mxu1 }
 0x5df   :  { %v4662_v62 = vpop.f32.mrb[118].mxu1 }
 0x5e0   :  { %v5407_v35 = vpack.c.bf16 %v4662_v62, %v4659_v16  ;;  %v4664_v58 = vpop.f32.mrb[119].mxu1 }
 0x5e2   :  { %9280 = vmatmul.mubr.msk.bf16.vlgmr.msra.gmra.mrb[144].mxu1 %vm4734_vm2, %v5407_v35 }
 0x5e3   :  { %9288 = vmatpush3.bf16.msra.mxu1 %v9884_v41  ;;  %v10086_v41 = vmov 0.0  }
 0x5e4   :  { %9289 = vmatprep.subr.bf16.mxu1 %v9885_v22  ;;  %7057 = vst.msk [vmem:[#allocation2] sm:$0xff] %vm5650_vm4, %v10086_v41  ;;  %7058 = vst.msk [vmem:[#allocation2 + $0x8] sm:$0xff] %vm5650_vm4, %v10086_v41 }
 0x5e5   :  { %v4667_v47 = vpop.f32.mrb[120].mxu1  ;;  %7059 = vst.msk [vmem:[#allocation2 + $0x10] sm:$0xff] %vm5650_vm4, %v10086_v41  ;;  %7060 = vst.msk [vmem:[#allocation2 + $0x18] sm:$0xff] %vm5650_vm4, %v10086_v41 }
 0x5e6   :  { %v4669_v7 = vpop.f32.mrb[121].mxu1  ;;  %7061 = vst.msk [vmem:[#allocation2 + $0x20] sm:$0xff] %vm5650_vm4, %v10086_v41  ;;  %7062 = vst.msk [vmem:[#allocation2 + $0x28] sm:$0xff] %vm5650_vm4, %v10086_v41 }
 0x5e7   :  { %v4670_v34 = vpop.f32.mrb[122].mxu1  ;;  %9290 = vmatpush3.bf16.msra.mxu1 %v9885_v22  ;;  %7063 = vst.msk [vmem:[#allocation2 + $0x30] sm:$0xff] %vm5650_vm4, %v10086_v41  ;;  %7064 = vst.msk [vmem:[#allocation2 + $0x38] sm:$0xff] %vm5650_vm4, %v10086_v41 }
 0x5e8   :  { %v5408_v57 = vpack.c.bf16 %v4670_v34, %v4667_v47  ;;  %v4672_v46 = vpop.f32.mrb[123].mxu1  ;;  %9299 = vmatprep.subr.bf16.mxu1 %v10086_v41 }
 0x5ea   :  { %9283 = vmatprep.mubr.msk.bf16.mxu1 %vm4734_vm2, %v5408_v57  ;;  %v12623_v57 = vld [vmem:[%s13315_s8] sm:$0xff] }
 0x5eb   :  { %v5617_v46 = vrot.slane %v12623_v57, %v12586_v42 }
 0x5ed   :  { %v4675_v52 = vpop.f32.mrb[124].mxu1 }
 0x5ee   :  { %v4677_v1 = vpop.f32.mrb[125].mxu1 }
 0x5ef   :  { %v4678_v14 = vpop.f32.mrb[126].mxu1 }
 0x5f0   :  { %v5409_v30 = vpack.c.bf16 %v4678_v14, %v4675_v52  ;;  %v4680_v61 = vpop.f32.mrb[127].mxu1 }
 0x5f2   :  { %9284 = vmatmul.mubr.msk.bf16.gmra.mrb[148].mxu1 %vm4734_vm2, %v5409_v30 }
 0x5f5   :  { %v4683_v5 = vpop.f32.mrb[128].mxu1  ;;  %v9197_v23 = vpop.f32.mrb[144].mxu0 }
 0x5f6   :  { %v4685_v31 = vpop.f32.mrb[129].mxu1  ;;  %v4781_v28 = vpop.f32.mrb[145].mxu0 }
 0x5f7   :  { %v4686_v49 = vpop.f32.mrb[130].mxu1  ;;  %v9198_v27 = vpop.f32.mrb[146].mxu0 }
 0x5f8   :  { %v5507_v11 = vpack.c.bf16 %v4686_v49, %v4683_v5  ;;  %v4688_v32 = vpop.f32.mrb[131].mxu1  ;;  %v4784_v13 = vpop.f32.mrb[147].mxu0  ;;  %v9890_v49 = vld [vmem:[%s13313_s4 + $0x90] sm:$0xff]  }
 0x5f9   :  { %v9892_v32 = vld [vmem:[%s13313_s4 + $0xa0] sm:$0xff]  }
 0x5fa   :  { %9291 = vmatprep.mubr.msk.bf16.mxu1 %vm4734_vm2, %v5507_v11  ;;  %v9891_v11 = vld [vmem:[%s13313_s4 + $0x98] sm:$0xff]  }
 0x5fd   :  { %v4691_v19 = vpop.f32.mrb[132].mxu1 }
 0x5fe   :  { %v4693_v38 = vpop.f32.mrb[133].mxu1 }
 0x5ff   :  { %v4694_v3 = vpop.f32.mrb[134].mxu1  ;;  %v9895_v38 = vld [vmem:[%s13313_s4 + $0xd8] sm:$0xff]  }
 0x600   :  { %v5508_v43 = vpack.c.bf16 %v4694_v3, %v4691_v19  ;;  %v4696_v6 = vpop.f32.mrb[135].mxu1  ;;  %v9894_v19 = vld [vmem:[%s13313_s4 + $0xd0] sm:$0xff]   ;;  %v9896_v3 = vld [vmem:[%s13313_s4 + $0xe0] sm:$0xff]  }
 0x601   :  { %v9898_v6 = vld [vmem:[%s13313_s4 + $0xf0] sm:$0xff]  }
 0x602   :  { %9292 = vmatmul.mubr.msk.bf16.vlgmr.msra.gmra.mrb[144].mxu1 %vm4734_vm2, %v5508_v43  ;;  %v9897_v43 = vld [vmem:[%s13313_s4 + $0xe8] sm:$0xff]  }
 0x603   :  { %9300 = vmatpush3.bf16.msra.mxu1 %v9886_v50  ;;  %v9910_v50 = vld [vmem:[%s13313_s4 + $0x150] sm:$0xff]  }
 0x604   :  { %9301 = vmatprep.subr.bf16.mxu1 %v10086_v41 }
 0x605   :  { %v4699_v59 = vpop.f32.mrb[136].mxu1  ;;  %v9201_v17 = vpop.f32.mrb[148].mxu0 }
 0x606   :  { %v4701_v60 = vpop.f32.mrb[137].mxu1  ;;  %v4797_v44 = vpop.f32.mrb[149].mxu0 }
 0x607   :  { %v4702_v0 = vpop.f32.mrb[138].mxu1  ;;  %v9202_v56 = vpop.f32.mrb[150].mxu0  ;;  %9302 = vmatpush3.bf16.msra.mxu1 %v9887_v9  ;;  %v9900_v60 = vld [vmem:[%s13313_s4 + $0x100] sm:$0xff]  }
 0x608   :  { %v5509_v37 = vpack.c.bf16 %v4702_v0, %v4699_v59  ;;  %v4704_v51 = vpop.f32.mrb[139].mxu1  ;;  %v4800_v20 = vpop.f32.mrb[151].mxu0  ;;  %9303 = vmatprep.subr.bf16.mxu1 %v10086_v41  ;;  %v9902_v0 = vld [vmem:[%s13313_s4 + $0x110] sm:$0xff]  }
 0x609   :  { %v9904_v51 = vld [vmem:[%s13313_s4 + $0x120] sm:$0xff]  }
 0x60a   :  { %9295 = vmatprep.mubr.msk.bf16.mxu1 %vm4734_vm2, %v5509_v37  ;;  %v9903_v37 = vld [vmem:[%s13313_s4 + $0x118] sm:$0xff]  }
 0x60b   :  { %9304 = vmatpush3.bf16.msra.mxu1 %v9888_v36  ;;  %v9911_v36 = vld [vmem:[%s13313_s4 + $0x158] sm:$0xff]  }
 0x60c   :  { %9305 = vmatprep.subr.bf16.mxu1 %v10086_v41 }
 0x60d   :  { %v4707_v29 = vpop.f32.mrb[140].mxu1 }
 0x60e   :  { %v4709_v48 = vpop.f32.mrb[141].mxu1 }
 0x60f   :  { %v4710_v25 = vpop.f32.mrb[142].mxu1  ;;  %9306 = vmatpush3.bf16.msra.mxu1 %v9889_v55  ;;  %v9913_v55 = vld [vmem:[%s13313_s4 + $0x168] sm:$0xff]  }
 0x610   :  { %v5510_v54 = vpack.c.bf16 %v4710_v25, %v4707_v29  ;;  %v4712_v45 = vpop.f32.mrb[143].mxu1  ;;  %9311 = vmatprep.subr.bf16.mxu1 %v10086_v41  ;;  %v9906_v29 = vld [vmem:[%s13313_s4 + $0x130] sm:$0xff]   ;;  %v9907_v25 = vld [vmem:[%s13313_s4 + $0x138] sm:$0xff]  }
 0x611   :  { %v9909_v45 = vld [vmem:[%s13313_s4 + $0x148] sm:$0xff]  }
 0x612   :  { %9296 = vmatmul.mubr.msk.bf16.gmra.mrb[148].mxu1 %vm4734_vm2, %v5510_v54  ;;  %v9908_v54 = vld [vmem:[%s13313_s4 + $0x140] sm:$0xff]  }
 0x613   :  { %9307 = vmatprep.mubr.msk.bf16.mxu1 %vm10087_vm3, %v10086_v41 }
 0x6d5   :  { %v9293_v24 = vpop.f32.mrb[144].mxu1 }
 0x6d6   :  { %v9483_v39 = vadd.f32 %v9293_v24, %v9197_v23  ;;  %v5569_v40 = vpop.f32.mrb[145].mxu1  ;;  %v9914_v24 = vld [vmem:[%s13313_s4 + $0x170] sm:$0xff]  }
 0x6d7   :  { %v9484_v33 = vadd.f32 %v5569_v40, %v4781_v28  ;;  %v9294_v26 = vpop.f32.mrb[146].mxu1  ;;  %v9915_v40 = vld [vmem:[%s13313_s4 + $0x178] sm:$0xff]  }
 0x6d8   :  { %v9485_v21 = vadd.f32 %v9294_v26, %v9198_v27  ;;  %v5572_v53 = vpop.f32.mrb[147].mxu1  ;;  %v9917_v26 = vld [vmem:[%s13313_s4 + $0x188] sm:$0xff]  }
 0x6d9   :  { %v5608_v12 = vmax.f32 %v9484_v33, %v9483_v39  ;;  %v9486_v63 = vadd.f32 %v5572_v53, %v4784_v13  ;;  %v9893_v13 = vld [vmem:[%s13313_s4 + $0xa8] sm:$0xff]   ;;  %v9916_v33 = vld [vmem:[%s13313_s4 + $0x180] sm:$0xff]  }
 0x6db   :  { %v5609_v16 = vmax.f32 %v9486_v63, %v9485_v21  ;;  %v9918_v21 = vld [vmem:[%s13313_s4 + $0x190] sm:$0xff]   ;;  %v9920_v63 = vld [vmem:[%s13313_s4 + $0x1a0] sm:$0xff]  }
 0x6e5   :  { %v9297_v15 = vpop.f32.mrb[148].mxu1 }
 0x6e6   :  { %v9487_v62 = vadd.f32 %v9297_v15, %v9201_v17  ;;  %v5585_v35 = vpop.f32.mrb[149].mxu1  ;;  %v9899_v17 = vld [vmem:[%s13313_s4 + $0xf8] sm:$0xff]  }
 0x6e7   :  { %v9488_v58 = vadd.f32 %v5585_v35, %v4797_v44  ;;  %v9298_v22 = vpop.f32.mrb[150].mxu1  ;;  %v9901_v44 = vld [vmem:[%s13313_s4 + $0x108] sm:$0xff]  }
 0x6e8   :  { %v9489_v47 = vadd.f32 %v9298_v22, %v9202_v56  ;;  %v5588_v7 = vpop.f32.mrb[151].mxu1  ;;  %v9924_v35 = vld [vmem:[%s13316_s6 + $0x4] ss:$8 sps:$4 sm:$0xff]   ;;  %v9927_v22 = vld [vmem:[%s13316_s6 + $0x14] ss:$8 sps:$4 sm:$0xff]  }
 0x6e9   :  { %v5610_v34 = vmax.f32 %v9488_v58, %v9487_v62  ;;  %v9490_v52 = vadd.f32 %v5588_v7, %v4800_v20  ;;  %v9905_v20 = vld [vmem:[%s13313_s4 + $0x128] sm:$0xff]   ;;  %v9925_v58 = vld [vmem:[%s13316_s6 + $0x10] ss:$8 sps:$4 sm:$0xff]  }
 0x6ea   :  { %v9922_v62 = vld [vmem:[%s13316_s6] ss:$8 sps:$4 sm:$0xff]  }
 0x6eb   :  { %v5612_v1 = vmax.f32 %v5608_v12, %v5610_v34  ;;  %v5611_v14 = vmax.f32 %v9490_v52, %v9489_v47  ;;  %v9919_v12 = vld [vmem:[%s13313_s4 + $0x198] sm:$0xff]   ;;  %v9930_v47 = vld [vmem:[%s13316_s6 + $0x24] ss:$8 sps:$4 sm:$0xff]   ;;  %v9928_v34 = vld [vmem:[%s13316_s6 + $0x20] ss:$8 sps:$4 sm:$0xff]  }
 0x6ed   :  { %v5618_v30 = vadd.f32 %v5617_v46, %v5612_v1  ;;  %v5613_v61 = vmax.f32 %v5609_v16, %v5611_v14  ;;  %v9921_v16 = vld [vmem:[%s13313_s4 + $0x1a8] sm:$0xff]   ;;  %v9933_v14 = vld [vmem:[%s13316_s6 + $0x34] ss:$8 sps:$4 sm:$0xff]  }
 0x6ef   :  { %v5619_v5 = vadd.f32 %v5617_v46, %v5613_v61  ;;  %v5620_v23 = vmax.f32 %v5618_v30, 0.0  ;;  %v9931_v30 = vld [vmem:[%s13316_s6 + $0x30] ss:$8 sps:$4 sm:$0xff]   ;;  %v9934_v61 = vld [vmem:[%s13317_s5 + $0x40] sm:$0xff]  }
 0x6f1   :  { %v5621_v31 = vmax.f32 %v5619_v5, 0.0 }
 0x6f3   :  { %v12627_v28 = vpack.c.bf16 %v5621_v31, %v5620_v23 }
 0x6f5   :  { %v12633_v27 = vshrl.u32 %v12627_v28, 16  ;;  %v5761_v59 = vrot.slane %v12627_v28, 1  ;;  %v5899_v48 = vrot.slane %v12627_v28, 2  ;;  %v6037_v39 = vrot.slane %v12627_v28, 3 }
 0x6f6   :  { %v6175_v15 = vrot.slane %v12627_v28, 4 }
 0x6f7   :  { %9308 = vmatmul.mubr.msk.bf16.vlgmr.msra.gmra.mrb[152].mxu1 %vm5650_vm4, %v12633_v27  ;;  %v5830_v56 = vrot.slane %v12633_v27, 1  ;;  %v5968_v9 = vrot.slane %v12633_v27, 2  ;;  %v6106_v53 = vrot.slane %v12633_v27, 3 }
 0x6f8   :  { %9312 = vmatpush3.bf16.msra.mxu1 %v9890_v49  ;;  %9319 = vmatprep.mubr.msk.bf16.mxu1 %vm10087_vm3, %v10086_v41 }
 0x6f9   :  { %9313 = vmatprep.subr.bf16.mxu1 %v10086_v41 }
 0x6fc   :  { %9314 = vmatpush3.bf16.msra.mxu1 %v9891_v11 }
 0x6fd   :  { %9315 = vmatprep.subr.bf16.mxu1 %v10086_v41 }
 0x700   :  { %9316 = vmatpush3.bf16.msra.mxu1 %v9892_v32 }
 0x701   :  { %9317 = vmatprep.subr.bf16.mxu1 %v10086_v41 }
 0x704   :  { %9318 = vmatpush3.bf16.msra.mxu1 %v9893_v13 }
 0x705   :  { %9323 = vmatprep.subr.bf16.mxu1 %v10086_v41 }
 0x707   :  { %9320 = vmatmul.mubr.msk.bf16.vlgmr.msra.gmra.mrb[156].mxu1 %vm5650_vm4, %v12627_v28 }
 0x708   :  { %9324 = vmatpush3.bf16.msra.mxu1 %v9894_v19  ;;  %9331 = vmatprep.mubr.msk.bf16.mxu1 %vm10087_vm3, %v10086_v41 }
 0x709   :  { %9325 = vmatprep.subr.bf16.mxu1 %v10086_v41 }
 0x70c   :  { %9326 = vmatpush3.bf16.msra.mxu1 %v9895_v38 }
 0x70d   :  { %9327 = vmatprep.subr.bf16.mxu1 %v10086_v41 }
 0x710   :  { %9328 = vmatpush3.bf16.msra.mxu1 %v9896_v3 }
 0x711   :  { %9329 = vmatprep.subr.bf16.mxu1 %v10086_v41 }
 0x714   :  { %9330 = vmatpush3.bf16.msra.mxu1 %v9897_v43 }
 0x715   :  { %9335 = vmatprep.subr.bf16.mxu1 %v10086_v41 }
 0x717   :  { %9332 = vmatmul.mubr.msk.bf16.vlgmr.msra.gmra.mrb[160].mxu1 %vm5650_vm4, %v5761_v59 }
 0x718   :  { %9336 = vmatpush3.bf16.msra.mxu1 %v9898_v6  ;;  %9343 = vmatprep.mubr.msk.bf16.mxu1 %vm10087_vm3, %v10086_v41 }
 0x719   :  { %9337 = vmatprep.subr.bf16.mxu1 %v10086_v41 }
 0x71c   :  { %9338 = vmatpush3.bf16.msra.mxu1 %v9899_v17 }
 0x71d   :  { %9339 = vmatprep.subr.bf16.mxu1 %v10086_v41 }
 0x720   :  { %9340 = vmatpush3.bf16.msra.mxu1 %v9900_v60 }
 0x721   :  { %9341 = vmatprep.subr.bf16.mxu1 %v10086_v41 }
 0x724   :  { %9342 = vmatpush3.bf16.msra.mxu1 %v9901_v44 }
 0x725   :  { %9347 = vmatprep.subr.bf16.mxu1 %v10086_v41 }
 0x727   :  { %9344 = vmatmul.mubr.msk.bf16.vlgmr.msra.gmra.mrb[164].mxu1 %vm5650_vm4, %v5830_v56 }
 0x728   :  { %9348 = vmatpush3.bf16.msra.mxu1 %v9902_v0  ;;  %9355 = vmatprep.mubr.msk.bf16.mxu1 %vm10087_vm3, %v10086_v41 }
 0x729   :  { %9349 = vmatprep.subr.bf16.mxu1 %v10086_v41 }
 0x72c   :  { %9350 = vmatpush3.bf16.msra.mxu1 %v9903_v37 }
 0x72d   :  { %9351 = vmatprep.subr.bf16.mxu1 %v10086_v41 }
 0x730   :  { %9352 = vmatpush3.bf16.msra.mxu1 %v9904_v51 }
 0x731   :  { %9353 = vmatprep.subr.bf16.mxu1 %v10086_v41 }
 0x734   :  { %9354 = vmatpush3.bf16.msra.mxu1 %v9905_v20 }
 0x735   :  { %9359 = vmatprep.subr.bf16.mxu1 %v10086_v41 }
 0x737   :  { %9356 = vmatmul.mubr.msk.bf16.vlgmr.msra.gmra.mrb[168].mxu1 %vm5650_vm4, %v5899_v48 }
 0x738   :  { %9360 = vmatpush3.bf16.msra.mxu1 %v9906_v29  ;;  %9367 = vmatprep.mubr.msk.bf16.mxu1 %vm10087_vm3, %v10086_v41 }
 0x739   :  { %9361 = vmatprep.subr.bf16.mxu1 %v10086_v41 }
 0x73c   :  { %9362 = vmatpush3.bf16.msra.mxu1 %v9907_v25 }
 0x73d   :  { %9363 = vmatprep.subr.bf16.mxu1 %v10086_v41 }
 0x740   :  { %9364 = vmatpush3.bf16.msra.mxu1 %v9908_v54 }
 0x741   :  { %9365 = vmatprep.subr.bf16.mxu1 %v10086_v41 }
 0x744   :  { %9366 = vmatpush3.bf16.msra.mxu1 %v9909_v45 }
 0x745   :  { %9371 = vmatprep.subr.bf16.mxu1 %v10086_v41 }
 0x747   :  { %9368 = vmatmul.mubr.msk.bf16.vlgmr.msra.gmra.mrb[172].mxu1 %vm5650_vm4, %v5968_v9 }
 0x748   :  { %9372 = vmatpush3.bf16.msra.mxu1 %v9910_v50  ;;  %9379 = vmatprep.mubr.msk.bf16.mxu1 %vm10087_vm3, %v10086_v41 }
 0x749   :  { %9373 = vmatprep.subr.bf16.mxu1 %v10086_v41 }
 0x74c   :  { %9374 = vmatpush3.bf16.msra.mxu1 %v9911_v36 }
 0x74d   :  { %9375 = vmatprep.subr.bf16.mxu1 %v10086_v41 }
 0x750   :  { %9376 = vmatpush3.bf16.msra.mxu1 %v9912_v4 }
 0x751   :  { %9377 = vmatprep.subr.bf16.mxu1 %v10086_v41 }
 0x754   :  { %9378 = vmatpush3.bf16.msra.mxu1 %v9913_v55 }
 0x755   :  { %9383 = vmatprep.subr.bf16.mxu1 %v10086_v41 }
 0x757   :  { %9380 = vmatmul.mubr.msk.bf16.vlgmr.msra.gmra.mrb[176].mxu1 %vm5650_vm4, %v6037_v39 }
 0x758   :  { %9384 = vmatpush3.bf16.msra.mxu1 %v9914_v24  ;;  %9391 = vmatprep.mubr.msk.bf16.mxu1 %vm10087_vm3, %v10086_v41 }
 0x759   :  { %9385 = vmatprep.subr.bf16.mxu1 %v10086_v41 }
 0x75c   :  { %9386 = vmatpush3.bf16.msra.mxu1 %v9915_v40  ;;  %v6245_v40 = vrot.slane %v12623_v57, 2 }
 0x75d   :  { %9387 = vmatprep.subr.bf16.mxu1 %v10086_v41 }
 0x760   :  { %9388 = vmatpush3.bf16.msra.mxu1 %v9916_v33 }
 0x761   :  { %9389 = vmatprep.subr.bf16.mxu1 %v10086_v41 }
 0x764   :  { %9390 = vmatpush3.bf16.msra.mxu1 %v9917_v26 }
 0x765   :  { %9395 = vmatprep.subr.bf16.mxu1 %v10086_v41 }
 0x767   :  { %9392 = vmatmul.mubr.msk.bf16.vlgmr.msra.gmra.mrb[180].mxu1 %vm5650_vm4, %v6106_v53 }
 0x768   :  { %9396 = vmatpush3.bf16.msra.mxu1 %v9918_v21  ;;  %9403 = vmatprep.mubr.msk.bf16.mxu1 %vm10087_vm3, %v10086_v41 }
 0x769   :  { %9397 = vmatprep.subr.bf16.mxu1 %v10086_v41 }
 0x76c   :  { %9398 = vmatpush3.bf16.msra.mxu1 %v9919_v12 }
 0x76d   :  { %9399 = vmatprep.subr.bf16.mxu1 %v10086_v41 }
 0x770   :  { %9400 = vmatpush3.bf16.msra.mxu1 %v9920_v63 }
 0x771   :  { %9401 = vmatprep.subr.bf16.mxu1 %v10086_v41 }
 0x774   :  { %9402 = vmatpush3.bf16.msra.mxu1 %v9921_v16 }
 0x775   :  { %6306 = vmatprep.subr.bf16.mxu1 %v9924_v35  ;;  %v9936_v35 = vld [vmem:[%s13317_s5 + $0x48] sm:$0xff]  }
 0x777   :  { %9404 = vmatmul.mubr.msk.bf16.vlgmr.msra.gmra.mrb[184].mxu1 %vm5650_vm4, %v6175_v15  ;;  %v9935_v15 = vld [vmem:[%s13317_s5] sm:$0xff]  }
 0x778   :  { %6338 = vmatprep.mubr.bf16.mxu1 %v10085_v2  ;;  %6307 = vmatpush1.bf16.msra.mxu1 %v9922_v62 }
 0x779   :  { %6308 = vmatprep.subr.bf16.mxu1 %v9927_v22  ;;  %v9938_v22 = vld [vmem:[%s13317_s5 + $0x50] sm:$0xff]  }
 0x77c   :  { %6309 = vmatpush1.bf16.msra.mxu1 %v9925_v58  ;;  %v9937_v58 = vld [vmem:[%s13317_s5 + $0x8] sm:$0xff]  }
 0x77d   :  { %6310 = vmatprep.subr.bf16.mxu1 %v9930_v47  ;;  %v9939_v47 = vld [vmem:[%s13317_s5 + $0x10] sm:$0xff]  }
 0x780   :  { %6311 = vmatpush1.bf16.msra.mxu1 %v9928_v34  ;;  %v9941_v34 = vld [vmem:[%s13317_s5 + $0x18] sm:$0xff]  }
 0x781   :  { %6312 = vmatprep.subr.bf16.mxu1 %v9933_v14  ;;  %v9945_v14 = vld [vmem:[%s13317_s5 + $0x28] sm:$0xff]  }
 0x784   :  { %6313 = vmatpush1.bf16.msra.mxu1 %v9931_v30  ;;  %v9946_v30 = vld [vmem:[%s13317_s5 + $0x70] sm:$0xff]  }
 0x785   :  { %8717 = vmatprep.subr.bf16.mxu1 %v9934_v61  ;;  %v9947_v61 = vld [vmem:[%s13317_s5 + $0x30] sm:$0xff]  }
 0x7ca   :  { %v5688_v7 = vpop.f32.mrb[152].mxu1 }
 0x7cb   :  { %v9309_v46 = vpop.f32.mrb[153].mxu1 }
 0x7cc   :  { %v5691_v52 = vpop.f32.mrb[154].mxu1  ;;  %v9942_v46 = vld [vmem:[%s13317_s5 + $0x60] sm:$0xff]  }
 0x7cd   :  { %v9310_v1 = vpop.f32.mrb[155].mxu1  ;;  %v9943_v52 = vld [vmem:[%s13317_s5 + $0x20] sm:$0xff]  }
 0x7ce   :  { %v9944_v1 = vld [vmem:[%s13317_s5 + $0x68] sm:$0xff]  }
 0x7da   :  { %v5754_v5 = vpop.f32.mrb[156].mxu1 }
 0x7db   :  { %v5755_v23 = vadd.f32 %v5754_v5, %v5688_v7  ;;  %v9321_v31 = vpop.f32.mrb[157].mxu1  ;;  %v9940_v7 = vld [vmem:[%s13317_s5 + $0x58] sm:$0xff]  }
 0x7dc   :  { %v5757_v28 = vpop.f32.mrb[158].mxu1  ;;  %v9948_v5 = vld [vmem:[%s13317_s5 + $0x78] sm:$0xff]   ;;  %v34_v31 = vld [vmem:[%s13315_s8 + $0x8] sm:$0xff] }
 0x7dd   :  { %v9322_v49 = vpop.f32.mrb[159].mxu1  ;;  %v6299_v28 = vrot.slane %v12623_v57, 3 }
 0x7de   :  { %v6300_v49 = vrot.slane %v34_v31, 3 }
 0x7ea   :  { %v5823_v27 = vpop.f32.mrb[160].mxu1 }
 0x7eb   :  { %v5829_v11 = vadd.f32 %v5823_v27, %v5755_v23  ;;  %v9333_v32 = vpop.f32.mrb[161].mxu1  ;;  %v9949_v23 = vld [vmem:[%s13317_s5 + $0x38] sm:$0xff]  }
 0x7ec   :  { %v5826_v13 = vpop.f32.mrb[162].mxu1 }
 0x7ed   :  { %v9334_v19 = vpop.f32.mrb[163].mxu1 }
 0x7fa   :  { %v5892_v38 = vpop.f32.mrb[164].mxu1 }
 0x7fb   :  { %v5898_v3 = vadd.f32 %v5892_v38, %v5829_v11  ;;  %v9345_v43 = vpop.f32.mrb[165].mxu1 }
 0x7fc   :  { %v5895_v6 = vpop.f32.mrb[166].mxu1 }
 0x7fd   :  { %v9346_v59 = vpop.f32.mrb[167].mxu1 }
 0x7fe   :  { %v9950_v59 = vld [vmem:[%s13317_s5 + $0x80] sm:$0xff]  }
 0x80a   :  { %v5961_v17 = vpop.f32.mrb[168].mxu1 }
 0x80b   :  { %v5967_v60 = vadd.f32 %v5961_v17, %v5898_v3  ;;  %v9357_v44 = vpop.f32.mrb[169].mxu1 }
 0x80c   :  { %v5964_v0 = vpop.f32.mrb[170].mxu1  ;;  %v9952_v44 = vld [vmem:[%s13317_s5 + $0x90] sm:$0xff]  }
 0x80d   :  { %v9358_v56 = vpop.f32.mrb[171].mxu1  ;;  %v9953_v0 = vld [vmem:[%s13317_s5 + $0x98] sm:$0xff]  }
 0x80e   :  { %v9954_v56 = vld [vmem:[%s13317_s5 + $0xa0] sm:$0xff]  }
 0x81a   :  { %v6030_v37 = vpop.f32.mrb[172].mxu1 }
 0x81b   :  { %v6036_v51 = vadd.f32 %v6030_v37, %v5967_v60  ;;  %v9369_v20 = vpop.f32.mrb[173].mxu1  ;;  %v9951_v60 = vld [vmem:[%s13317_s5 + $0x88] sm:$0xff]  }
 0x81c   :  { %v6033_v29 = vpop.f32.mrb[174].mxu1  ;;  %v9955_v37 = vld [vmem:[%s13317_s5 + $0xa8] sm:$0xff]   ;;  %v9957_v20 = vld [vmem:[%s13317_s5 + $0xb8] sm:$0xff]  }
 0x81d   :  { %v9370_v48 = vpop.f32.mrb[175].mxu1 }
 0x81e   :  { %v6479_v48 = vrot.slane %v12623_v57, 4 }
 0x82a   :  { %v6099_v25 = vpop.f32.mrb[176].mxu1 }
 0x82b   :  { %v6105_v54 = vadd.f32 %v6099_v25, %v6036_v51  ;;  %v9381_v45 = vpop.f32.mrb[177].mxu1  ;;  %v9956_v51 = vld [vmem:[%s13317_s5 + $0xb0] sm:$0xff]  }
 0x82c   :  { %v6102_v50 = vpop.f32.mrb[178].mxu1 }
 0x82d   :  { %v9382_v9 = vpop.f32.mrb[179].mxu1 }
 0x83a   :  { %v6168_v36 = vpop.f32.mrb[180].mxu1 }
 0x83b   :  { %v6174_v4 = vadd.f32 %v6168_v36, %v6105_v54  ;;  %v9393_v55 = vpop.f32.mrb[181].mxu1  ;;  %v9958_v36 = vld [vmem:[%s13317_s5 + $0xc0] sm:$0xff]  }
 0x83c   :  { %v6171_v24 = vpop.f32.mrb[182].mxu1  ;;  %v9959_v55 = vld [vmem:[%s13317_s5 + $0xc8] sm:$0xff]  }
 0x83d   :  { %v9394_v39 = vpop.f32.mrb[183].mxu1  ;;  %v9960_v24 = vld [vmem:[%s13317_s5 + $0xd0] sm:$0xff]  }
 0x83e   :  { %v9961_v39 = vld [vmem:[%s13317_s5 + $0xd8] sm:$0xff]  }
 0x84a   :  { %v6237_v33 = vpop.f32.mrb[184].mxu1 }
 0x84b   :  { %v6243_v26 = vadd.f32 %v6237_v33, %v6174_v4  ;;  %v9405_v21 = vpop.f32.mrb[185].mxu1  ;;  %v9963_v33 = vld [vmem:[%s13317_s5 + $0xe8] sm:$0xff]  }
 0x84c   :  { %v6240_v53 = vpop.f32.mrb[186].mxu1  ;;  %v9965_v21 = vld [vmem:[%s13317_s5 + $0xf8] sm:$0xff]  }
 0x84d   :  { %v6247_v12 = vadd.f32 %v6245_v40, %v6243_v26  ;;  %v9406_v63 = vpop.f32.mrb[187].mxu1  ;;  %v9962_v40 = vld [vmem:[%s13317_s5 + $0xe0] sm:$0xff]   ;;  %v9964_v26 = vld [vmem:[%s13317_s5 + $0xf0] sm:$0xff]  }
 0x84e   :  { %v6748_v53 = vld [vmem:[%s13318_s7] sm:$0xf] }
 0x84f   :  { %v6248_v16 = vmax.f32 %v6247_v12, 0.0  ;;  %v6586_v12 = vrot.slane %v12623_v57, 5 }
 0x851   :  { %v6257_v62 = vpack.c.bf16 %v6248_v16, %v6248_v16 }
 0x853   :  { %8338 = vmatmul.mubr.msk.bf16.vlgmr.msra.gmra.mrb[188].mxu1 %vm5650_vm4, %v6257_v62  ;;  %v6741_v62 = vld [vmem:[%s13319_s1 + $0x8] sm:$0xff] }
 0x854   :  { %8718 = vmatpush3.bf16.msra.mxu1 %v9935_v15 }
 0x855   :  { %8719 = vmatprep.subr.bf16.mxu1 %v9936_v35 }
 0x858   :  { %8720 = vmatpush3.bf16.msra.mxu1 %v9937_v58 }
 0x859   :  { %8721 = vmatprep.subr.bf16.mxu1 %v9938_v22 }
 0x85c   :  { %8722 = vmatpush3.bf16.msra.mxu1 %v9939_v47 }
 0x85d   :  { %8723 = vmatprep.subr.bf16.mxu1 %v9940_v7 }
 0x860   :  { %8724 = vmatpush3.bf16.msra.mxu1 %v9941_v34  ;;  %v6771_v34 = vsel %vm4389_vm1, %v6748_v53, 0 }
 0x861   :  { %8725 = vmatprep.subr.bf16.mxu1 %v9942_v46  ;;  %v6742_v46 = vld [vmem:[%s13319_s1 + $0x10] sm:$0xff] }
 0x864   :  { %8726 = vmatpush3.bf16.msra.mxu1 %v9943_v52  ;;  %v6743_v52 = vld [vmem:[%s13319_s1 + $0x18] sm:$0xff] }
 0x865   :  { %8727 = vmatprep.subr.bf16.mxu1 %v9944_v1  ;;  %v6744_v1 = vld [vmem:[%s13319_s1 + $0x20] sm:$0xff] }
 0x868   :  { %8728 = vmatpush3.bf16.msra.mxu1 %v9945_v14  ;;  %v6745_v14 = vld [vmem:[%s13319_s1 + $0x28] sm:$0xff] }
 0x869   :  { %8729 = vmatprep.subr.bf16.mxu1 %v9946_v30  ;;  %v6750_v30 = vpack.c.bf16 %v6743_v52, %v6742_v46 }
 0x86c   :  { %8730 = vmatpush3.bf16.msra.mxu1 %v9947_v61  ;;  %v6751_v61 = vpack.c.bf16 %v6745_v14, %v6744_v1 }
 0x86d   :  { %8731 = vmatprep.subr.bf16.mxu1 %v9948_v5  ;;  %v6746_v5 = vld [vmem:[%s13319_s1 + $0x30] sm:$0xff] }
 0x870   :  { %8732 = vmatpush3.bf16.msra.mxu1 %v9949_v23  ;;  %v6747_v23 = vld [vmem:[%s13319_s1 + $0x38] sm:$0xff] }
 0x871   :  { %9407 = vmatprep.subr.bf16.mxu1 %v10086_v41  ;;  %v6752_v31 = vpack.c.bf16 %v6747_v23, %v6746_v5 }
 0x926   :  { %v6340_v27 = vpop.f32.mrb[188].mxu1 }
 0x927   :  { %v6341_v11 = vadd.f32 %v6340_v27, %v6299_v28  ;;  %v6342_v32 = vpop.f32.mrb[189].mxu1  ;;  %v9966_v28 = vld [vmem:[%s13318_s7 + $0x4] sm:$0xff]  }
 0x928   :  { %v6343_v13 = vadd.f32 %v6342_v32, %v6300_v49  ;;  %v6344_v19 = vpop.f32.mrb[190].mxu1  ;;  %v9969_v49 = vld [vmem:[%s13316_s6 + $0x44] ss:$8 sps:$4 sm:$0xff]   ;;  %v6755_v32 = vsub.s32 7, %v12121_v10 }
 0x929   :  { %v6347_v38 = vmax.f32 %v6341_v11, 0.0  ;;  %v6345_v3 = vpop.f32.mrb[191].mxu1 }
 0x92a   :  { %v6348_v43 = vmax.f32 %v6343_v13, 0.0 }
 0x92b   :  { %v6381_v17 = vpack.c.bf16 %v6347_v38, %v6347_v38  ;;  %v6756_v38 = vrot.slane %v12623_v57, %v6755_v32  ;;  %v9967_v57 = vld [vmem:[%s13316_s6 + $0x40] ss:$8 sps:$4 sm:$0xff]  }
 0x92c   :  { %v6382_v6 = vpack.c.bf16 %v6348_v43, %v6348_v43 }
 0x92e   :  { %6513 = vmatprep.mubr.bf16.mxu1 %v6382_v6 }
 0x92f   :  { %6514 = vmatmul.mubr.bf16.vlgmr.msra.gmra.mrb[192].mxu1 %v6381_v17 }
 0x930   :  { %9408 = vmatpush3.bf16.msra.mxu1 %v9950_v59  ;;  %9423 = vmatprep.mubr.msk.bf16.mxu1 %vm10087_vm3, %v10086_v41 }
 0x931   :  { %9409 = vmatprep.subr.bf16.mxu1 %v10086_v41 }
 0x934   :  { %9410 = vmatpush3.bf16.msra.mxu1 %v9951_v60 }
 0x935   :  { %9411 = vmatprep.subr.bf16.mxu1 %v10086_v41 }
 0x938   :  { %9412 = vmatpush3.bf16.msra.mxu1 %v9952_v44 }
 0x939   :  { %9413 = vmatprep.subr.bf16.mxu1 %v10086_v41 }
 0x93c   :  { %9414 = vmatpush3.bf16.msra.mxu1 %v9953_v0 }
 0x93d   :  { %9415 = vmatprep.subr.bf16.mxu1 %v10086_v41 }
 0x940   :  { %9416 = vmatpush3.bf16.msra.mxu1 %v9954_v56 }
 0x941   :  { %9417 = vmatprep.subr.bf16.mxu1 %v10086_v41 }
 0x944   :  { %9418 = vmatpush3.bf16.msra.mxu1 %v9955_v37 }
 0x945   :  { %9419 = vmatprep.subr.bf16.mxu1 %v10086_v41 }
 0x948   :  { %9420 = vmatpush3.bf16.msra.mxu1 %v9956_v51 }
 0x949   :  { %9421 = vmatprep.subr.bf16.mxu1 %v10086_v41 }
 0x94c   :  { %9422 = vmatpush3.bf16.msra.mxu1 %v9957_v20 }
 0x94d   :  { %9427 = vmatprep.subr.bf16.mxu1 %v10086_v41 }
 0xa02   :  { %v8733_v29 = vpop.f32.mrb[192].mxu1 }
 0xa03   :  { %v8734_v25 = vpop.f32.mrb[193].mxu1 }
 0xa04   :  { %v8735_v54 = vadd.f32 %v8734_v25, %v8733_v29  ;;  %v8736_v45 = vpop.f32.mrb[194].mxu1 }
 0xa05   :  { %v8737_v50 = vpop.f32.mrb[195].mxu1 }
 0xa06   :  { %v6516_v9 = vadd.f32 %v8735_v54, %v6479_v48 }
 0xa08   :  { %v6537_v4 = vpack.c.bf16 %v6516_v9, %v6516_v9 }
 0xa0a   :  { %9424 = vmatmul.mubr.bf16.vlgmr.msra.gmra.mrb[196].mxu1 %v6537_v4 }
 0xa0b   :  { %9428 = vmatpush3.bf16.msra.mxu1 %v9958_v36  ;;  %9443 = vmatprep.mubr.msk.bf16.mxu1 %vm10087_vm3, %v10086_v41 }
 0xa0c   :  { %9429 = vmatprep.subr.bf16.mxu1 %v10086_v41 }
 0xa0f   :  { %9430 = vmatpush3.bf16.msra.mxu1 %v9959_v55 }
 0xa10   :  { %9431 = vmatprep.subr.bf16.mxu1 %v10086_v41 }
 0xa13   :  { %9432 = vmatpush3.bf16.msra.mxu1 %v9960_v24 }
 0xa14   :  { %9433 = vmatprep.subr.bf16.mxu1 %v10086_v41 }
 0xa17   :  { %9434 = vmatpush3.bf16.msra.mxu1 %v9961_v39 }
 0xa18   :  { %9435 = vmatprep.subr.bf16.mxu1 %v10086_v41 }
 0xa1b   :  { %9436 = vmatpush3.bf16.msra.mxu1 %v9962_v40 }
 0xa1c   :  { %9437 = vmatprep.subr.bf16.mxu1 %v10086_v41 }
 0xa1f   :  { %9438 = vmatpush3.bf16.msra.mxu1 %v9963_v33 }
 0xa20   :  { %9439 = vmatprep.subr.bf16.mxu1 %v10086_v41 }
 0xa23   :  { %9440 = vmatpush3.bf16.msra.mxu1 %v9964_v26 }
 0xa24   :  { %9441 = vmatprep.subr.bf16.mxu1 %v10086_v41  ;;  %v6740_v41 = vld [vmem:[%s13319_s1] sm:$0xff] }
 0xa25   :  { %v6749_v47 = vpack.c.bf16 %v6741_v62, %v6740_v41  ;;  %v13023_v41 = vld [vmem:[%s13316_s6 + $0x70] ss:$8 sps:$4 sm:$0xff]   ;;  %v13028_v62 = vld [vmem:[%s13316_s6 + $0x84] ss:$8 sps:$4 sm:$0xff]  }
 0xa27   :  { %9442 = vmatpush3.bf16.msra.mxu1 %v9965_v21 }
 0xa28   :  { %9547 = vmatprep.subr.msk.bf16.mxu1 %vm4389_vm1, %v6748_v53  ;;  %v12992_v53 = vld [vmem:[%s13316_s6 + $0x54] ss:$8 sps:$4 sm:$0xff]  }
 0xa29   :  { %7341 = vmatprep.subr.bf16.mxu0 %v12992_v53 }
 0xadd   :  { %v6622_v63 = vpop.f32.mrb[196].mxu1 }
 0xade   :  { %v6623_v16 = vadd.f32 %v6622_v63, %v6586_v12  ;;  %v9425_v15 = vpop.f32.mrb[197].mxu1  ;;  %v12998_v12 = vld [vmem:[%s13316_s6 + $0x50] ss:$8 sps:$4 sm:$0xff]   ;;  %v13005_v63 = vld [vmem:[%s13316_s6 + $0x64] ss:$8 sps:$4 sm:$0xff]  }
 0xadf   :  { %v6625_v35 = vpop.f32.mrb[198].mxu1  ;;  %7342 = vmatpush1.bf16.msra.mxu0 %v12998_v12  ;;  %v13016_v15 = vld [vmem:[%s13316_s6 + $0x74] ss:$8 sps:$4 sm:$0xff]  }
 0xae0   :  { %v6628_v58 = vmax.f32 %v6623_v16, 0.0  ;;  %v9426_v22 = vpop.f32.mrb[199].mxu1  ;;  %v13010_v16 = vld [vmem:[%s13316_s6 + $0x60] ss:$8 sps:$4 sm:$0xff]   ;;  %7343 = vmatprep.subr.bf16.mxu0 %v13005_v63 }
 0xae1   :  { %v13035_v35 = vld [vmem:[%s13316_s6 + $0x80] ss:$8 sps:$4 sm:$0xff]  }
 0xae2   :  { %v6645_v7 = vpack.c.bf16 %v6628_v58, %v6628_v58  ;;  %v13042_v58 = vld [vmem:[%s13315_s8 + $0x10] sm:$0xff] }
 0xae3   :  { %7344 = vmatpush1.bf16.msra.mxu0 %v13010_v16  ;;  %v6855_v22 = vrot.slane %v13042_v58, %v12128_v18 }
 0xae4   :  { %9444 = vmatmul.mubr.bf16.vlgmr.msra.gmra.mrb[200].mxu1 %v6645_v7  ;;  %7345 = vmatprep.subr.bf16.mxu0 %v13016_v15 }
 0xae5   :  { %9448 = vmatpush3.bf16.msra.mxu1 %v6771_v34  ;;  %9449 = vmatprep.mubr.msk.bf16.mxu1 %vm6757_vm5, %v6749_v47 }
 0xae6   :  { %9457 = vmatprep.subr.bf16.mxu1 %v9966_v28 }
 0xae7   :  { %7346 = vmatpush1.bf16.msra.mxu0 %v13023_v41 }
 0xae8   :  { %7347 = vmatprep.subr.bf16.mxu0 %v13028_v62 }
 0xaeb   :  { %7348 = vmatpush1.bf16.msra.mxu0 %v13035_v35 }
 0xaec   :  { %9450 = vmatmul.mubr.msk.bf16.vlgmr.msra.gmra.mrb[204].mxu1 %vm6757_vm5, %v6750_v30  ;;  %7495 = vmatprep.subr.bf16.mxu0 %v12992_v53 }
 0xaed   :  { %9453 = vmatprep.mubr.msk.bf16.mxu1 %vm6757_vm5, %v6751_v61  ;;  %9458 = vmatpush3.bf16.msra.mxu1 %v9966_v28 }
 0xaee   :  { %6976 = vmatprep.subr.bf16.mxu1 %v9969_v49 }
 0xaf4   :  { %9454 = vmatmul.mubr.msk.bf16.gmra.mrb[208].mxu1 %vm6757_vm5, %v6752_v31 }
 0xbb7   :  { %v12977_v27 = vpop.f32.mrb[200].mxu1 }
 0xbb8   :  { %v9445_v11 = vpop.f32.mrb[201].mxu1 }
 0xbb9   :  { %v6733_v13 = vpop.f32.mrb[202].mxu1 }
 0xbba   :  { %v9446_v19 = vpop.f32.mrb[203].mxu1 }
 0xbbf   :  { %v9451_v3 = vpop.f32.mrb[204].mxu1 }
 0xbc0   :  { %v6816_v43 = vadd.f32 %v9451_v3, %v6756_v38  ;;  %v6807_v6 = vpop.f32.mrb[205].mxu1 }
 0xbc1   :  { %v6808_v59 = vadd.f32 %v6807_v6, %v6756_v38  ;;  %v9452_v17 = vpop.f32.mrb[206].mxu1 }
 0xbc2   :  { %v6819_v60 = vadd.f32 %v9452_v17, %v6756_v38  ;;  %v6810_v44 = vpop.f32.mrb[207].mxu1  ;;  %v6840_v56 = vmax.f32 %v6816_v43, 0.0  ;;  %v10084_v43 = vld [vmem:[%s13315_s8] sm:$0xff] }
 0xbc3   :  { %v6811_v0 = vadd.f32 %v6810_v44, %v6756_v38  ;;  %v6838_v51 = vmax.f32 %v6808_v59, 0.0  ;;  %v6694_v6 = vrot.slane %v10084_v43, 6 }
 0xbc4   :  { %v6841_v37 = vmax.f32 %v6819_v60, 0.0 }
 0xbc5   :  { %v6839_v20 = vmax.f32 %v6811_v0, 0.0  ;;  %v6731_v59 = vadd.f32 %v12977_v27, %v6694_v6  ;;  %v36_v27 = vld [vmem:[%s13315_s8 + $0x18] sm:$0xff]  ;;  %s10088_s8 = smov 64  }
 0xbc6   :  { %v6849_v29 = vpack.c.bf16 %v6841_v37, %v6840_v56  ;;  %v6953_v44 = vrot.slane %v36_v27, %v12586_v42 }
 0xbc7   :  { %v6848_v48 = vpack.c.bf16 %v6839_v20, %v6838_v51  ;;  %v9455_v25 = vpop.f32.mrb[208].mxu1  ;;  %v13067_v17 = vrot.slane %v6731_v59, %v12128_v18 }
 0xbc8   :  { %v6832_v54 = vadd.f32 %v9455_v25, %v6756_v38  ;;  %v6823_v45 = vpop.f32.mrb[209].mxu1 }
 0xbc9   :  { %v6824_v50 = vadd.f32 %v6823_v45, %v6756_v38  ;;  %9459 = vmatprep.mubr.msk.bf16.mxu1 %vm6862_vm6, %v6848_v48  ;;  %v9456_v9 = vpop.f32.mrb[210].mxu1  ;;  %v7065_v60 = vpack.c.bf16 %v13067_v17, %v13067_v17 }
 0xbca   :  { %v6844_v36 = vmax.f32 %v6832_v54, 0.0  ;;  %v6835_v4 = vadd.f32 %v9456_v9, %v6756_v38  ;;  %9460 = vmatmul.mubr.msk.bf16.vlgmr.msra.gmra.mrb[212].mxu1 %vm6862_vm6, %v6849_v29  ;;  %v6826_v55 = vpop.f32.mrb[211].mxu1 }
 0xbcb   :  { %v6842_v24 = vmax.f32 %v6824_v50, 0.0  ;;  %v6827_v39 = vadd.f32 %v6826_v55, %v6756_v38  ;;  %6977 = vmatpush1.bf16.msra.mxu1 %v9967_v57 }
 0xbcc   :  { %v6845_v40 = vmax.f32 %v6835_v4, 0.0  ;;  %7109 = vmatprep.subr.bf16.mxu1 %v12992_v53 }
 0xbcd   :  { %v6843_v33 = vmax.f32 %v6827_v39, 0.0 }
 0xbce   :  { %v6851_v26 = vpack.c.bf16 %v6845_v40, %v6844_v36 }
 0xbcf   :  { %v6850_v21 = vpack.c.bf16 %v6843_v33, %v6842_v24 }
 0xbd1   :  { %9463 = vmatprep.mubr.msk.bf16.mxu1 %vm6862_vm6, %v6850_v21 }
 0xbd2   :  { %9464 = vmatmul.mubr.msk.bf16.gmra.mrb[216].mxu1 %vm6862_vm6, %v6851_v26 }
 0xbd3   :  { %7008 = vmatprep.mubr.bf16.mxu1 %v10085_v2 }
 0xc9d   :  { %v9461_v47 = vpop.f32.mrb[212].mxu1 }
 0xc9e   :  { %v6909_v7 = vpop.f32.mrb[213].mxu1  ;;  %v6918_v46 = vadd.f32 %v9461_v47, %v6855_v22 }
 0xc9f   :  { %v9462_v34 = vpop.f32.mrb[214].mxu1  ;;  %v6910_v14 = vadd.f32 %v6909_v7, %v6855_v22 }
 0xca0   :  { %v6921_v52 = vadd.f32 %v9462_v34, %v6855_v22  ;;  %v6912_v1 = vpop.f32.mrb[215].mxu1 }
 0xca1   :  { %v6913_v30 = vadd.f32 %v6912_v1, %v6855_v22 }
 0xca2   :  { %v6943_v61 = vpack.c.bf16 %v6921_v52, %v6918_v46 }
 0xca3   :  { %v6942_v5 = vpack.c.bf16 %v6913_v30, %v6910_v14 }
 0xca5   :  { %8382 = vmatmul.mubr.msk.bf16.vlgmr.msra.gmra.mrb[220].mxu1 %vm6862_vm6, %v6942_v5  ;;  %v9465_v23 = vpop.f32.mrb[216].mxu1 }
 0xca6   :  { %7110 = vmatpush1.bf16.msra.mxu1 %v12998_v12  ;;  %v6934_v31 = vadd.f32 %v9465_v23, %v6855_v22  ;;  %v6925_v28 = vpop.f32.mrb[217].mxu1  ;;  %7018 = vmatprep.mubr.bf16.mxu1 %v10085_v2 }
 0xca7   :  { %v6926_v49 = vadd.f32 %v6925_v28, %v6855_v22  ;;  %v9466_v11 = vpop.f32.mrb[218].mxu1  ;;  %7111 = vmatprep.subr.bf16.mxu1 %v13005_v63 }
 0xca8   :  { %v6937_v32 = vadd.f32 %v9466_v11, %v6855_v22  ;;  %v6928_v13 = vpop.f32.mrb[219].mxu1 }
 0xca9   :  { %v6929_v19 = vadd.f32 %v6928_v13, %v6855_v22 }
 0xcaa   :  { %v6945_v38 = vpack.c.bf16 %v6937_v32, %v6934_v31  ;;  %7112 = vmatpush1.bf16.msra.mxu1 %v13010_v16 }
 0xcab   :  { %v6944_v3 = vpack.c.bf16 %v6929_v19, %v6926_v49  ;;  %7113 = vmatprep.subr.bf16.mxu1 %v13016_v15 }
 0xcad   :  { %8383 = vmatmul.mubr.msk.bf16.gmra.mrb[224].mxu1 %vm6862_vm6, %v6943_v61 }
 0xcae   :  { %7028 = vmatprep.mubr.bf16.mxu1 %v10085_v2  ;;  %7114 = vmatpush1.bf16.msra.mxu1 %v13023_v41 }
 0xcaf   :  { %7115 = vmatprep.subr.bf16.mxu1 %v13028_v62 }
 0xcb2   :  { %7116 = vmatpush1.bf16.msra.mxu1 %v13035_v35 }
 0xcb3   :  { %7187 = vmatprep.subr.bf16.mxu1 %v12992_v53 }
 0xcb5   :  { %8384 = vmatmul.mubr.msk.bf16.gmra.mrb[228].mxu1 %vm6862_vm6, %v6944_v3 }
 0xcb6   :  { %7038 = vmatprep.mubr.bf16.mxu1 %v10085_v2 }
 0xcbd   :  { %8385 = vmatmul.mubr.msk.bf16.gmra.mrb[232].mxu1 %vm6862_vm6, %v6945_v38 }
 0xcbe   :  { %7141 = vmatprep.mubr.bf16.mxu1 %v10085_v2 }
 0xcc5   :  { %8394 = vmatmul.mubr.msk.bf16.vlgmr.msra.gmra.mrb[236].mxu1 %vm5650_vm4, %v7065_v60 }
 0xcc6   :  { %7188 = vmatpush1.bf16.msra.mxu1 %v12998_v12  ;;  %7219 = vmatprep.mubr.bf16.mxu1 %v10085_v2 }
 0xcc7   :  { %7189 = vmatprep.subr.bf16.mxu1 %v13005_v63 }
 0xcca   :  { %7190 = vmatpush1.bf16.msra.mxu1 %v13010_v16 }
 0xccb   :  { %7191 = vmatprep.subr.bf16.mxu1 %v13016_v15 }
 0xcce   :  { %7192 = vmatpush1.bf16.msra.mxu1 %v13023_v41 }
 0xccf   :  { %7193 = vmatprep.subr.bf16.mxu1 %v13028_v62 }
 0xcd2   :  { %7194 = vmatpush1.bf16.msra.mxu1 %v13035_v35 }
 0xcd3   :  { %7264 = vmatprep.subr.bf16.mxu1 %v12992_v53 }
 0xd78   :  { %v7010_v0 = vpop.f32.mrb[220].mxu1 }
 0xd79   :  { %v7011_v56 = vadd.f32 %v7010_v0, %v12595_v8  ;;  %v7012_v37 = vpop.f32.mrb[221].mxu1 }
 0xd7a   :  { %v7013_v51 = vadd.f32 %v7012_v37, %v6953_v44  ;;  %v7014_v20 = vpop.f32.mrb[222].mxu1 }
 0xd7b   :  { %v13087_v29 = vadd.f32 %v7014_v20, %v12595_v8  ;;  %v7016_v48 = vpop.f32.mrb[223].mxu1 }
 0xd7c   :  { %v13089_v25 = vadd.f32 %v7016_v48, %v6953_v44 }
 0xd80   :  { %v7020_v57 = vpop.f32.mrb[224].mxu1 }
 0xd81   :  { %v13092_v54 = vadd.f32 %v7020_v57, %v12595_v8  ;;  %v7022_v45 = vpop.f32.mrb[225].mxu1 }
 0xd82   :  { %v13094_v50 = vadd.f32 %v7022_v45, %v6953_v44  ;;  %v7024_v42 = vpop.f32.mrb[226].mxu1 }
 0xd83   :  { %v13097_v9 = vadd.f32 %v7024_v42, %v12595_v8  ;;  %v7026_v36 = vpop.f32.mrb[227].mxu1 }
 0xd84   :  { %v13099_v4 = vadd.f32 %v7026_v36, %v6953_v44 }
 0xd88   :  { %v7030_v55 = vpop.f32.mrb[228].mxu1 }
 0xd89   :  { %v13102_v24 = vadd.f32 %v7030_v55, %v12595_v8  ;;  %v7032_v39 = vpop.f32.mrb[229].mxu1 }
 0xd8a   :  { %v13104_v40 = vadd.f32 %v7032_v39, %v6953_v44  ;;  %v7034_v33 = vpop.f32.mrb[230].mxu1 }
 0xd8b   :  { %v13107_v26 = vadd.f32 %v7034_v33, %v12595_v8  ;;  %v7036_v21 = vpop.f32.mrb[231].mxu1 }
 0xd8c   :  { %v13109_v22 = vadd.f32 %v7036_v21, %v6953_v44 }
 0xd90   :  { %v7040_v47 = vpop.f32.mrb[232].mxu1 }
 0xd91   :  { %v13112_v7 = vadd.f32 %v7040_v47, %v12595_v8  ;;  %v7042_v34 = vpop.f32.mrb[233].mxu1 }
 0xd92   :  { %v13114_v46 = vadd.f32 %v7042_v34, %v6953_v44  ;;  %v7044_v52 = vpop.f32.mrb[234].mxu1 }
 0xd93   :  { %v13117_v1 = vadd.f32 %v7044_v52, %v12595_v8  ;;  %v7046_v14 = vpop.f32.mrb[235].mxu1 }
 0xd94   :  { %v13119_v30 = vadd.f32 %v7046_v14, %v6953_v44 }
 0xd98   :  { %v7143_v61 = vpop.f32.mrb[236].mxu1 }
 0xd99   :  { %v7150_v5 = vadd.f32 %v7143_v61, %v7011_v56  ;;  %v7145_v23 = vpop.f32.mrb[237].mxu1 }
 0xd9a   :  { %v7151_v31 = vadd.f32 %v7145_v23, %v7013_v51  ;;  %v7147_v28 = vpop.f32.mrb[238].mxu1 }
 0xd9b   :  { %v7152_v49 = vsub.f32 0.0, %v7150_v5  ;;  %v7148_v11 = vpop.f32.mrb[239].mxu1 }
 0xd9c   :  { %v7153_v43 = vsub.f32 0.0, %v7151_v31 }
 0xd9d   :  { %v7154_v32 = vmul.f32 1.442695, %v7152_v49 }
 0xd9e   :  { %v7156_v6 = vmul.f32 1.442695, %v7153_v43 }
 0xd9f   :  { %9986 = vpow2.f32 %v7154_v32 }
 0xda0   :  { %9988 = vtanh.f32 %v7151_v31 }
 0xda9   :  { %v9987_v13 = vpop.eup %9986 }
 0xdaa   :  { %v7158_v19 = vadd.f32 1.0, %v9987_v13  ;;  %v9989_v38 = vpop.eup %9988 }
 0xdac   :  { %9990 = vrcp.f32 %v7158_v19 }
 0xdad   :  { %9992 = vpow2.f32 %v7156_v6 }
 0xdb6   :  { %v9991_v3 = vpop.eup %9990 }
 0xdb7   :  { %v7166_v8 = vmul.f32 %v9991_v3, %v9989_v38  ;;  %v9993_v59 = vpop.eup %9992  ;;  %v7165_v27 = vmul.f32 %v9991_v3, %v13067_v17 }
 0xdb8   :  { %v7159_v60 = vadd.f32 1.0, %v9993_v59 }
 0xdb9   :  { %7168 = vrot.lane.b32.xlu0 %v7166_v8, %s10088_s8 }
 0xdba   :  { %9994 = vrcp.f32 %v7159_v60 }
 0xdc4   :  { %v9995_v56 = vpop.eup %9994 }
 0xe2b   :  { %v7169_v44 = vpop.permute.xlu0 %7168 }
 0xe2c   :  { %v7171_v0 = vadd.f32 %v7169_v44, %v7165_v27 }
 0xe2e   :  { %9996 = vtanh.f32 %v7171_v0 }
 0xe38   :  { %v9997_v37 = vpop.eup %9996 }
 0xe39   :  { %v13123_v51 = vmul.f32 %v9997_v37, %v9995_v56 }
 0xe3b   :  { %v7180_v20 = vpack.c.bf16 %v13123_v51, %v13123_v51 }
 0xe3d   :  { %7182 = vrot.lane.b32.xlu0 %v7180_v20, %s10088_s8 }
 0xeaf   :  { %v7183_v48 = vpop.permute.xlu0 %7182 }
 0xeb0   :  { %8395 = vmatmul.mubr.msk.bf16.vlgmr.msra.gmra.mrb[240].mxu1 %vm5650_vm4, %v7183_v48 }
 0xeb1   :  { %7265 = vmatpush1.bf16.msra.mxu1 %v12998_v12  ;;  %7296 = vmatprep.mubr.bf16.mxu1 %v10085_v2 }
 0xeb2   :  { %7266 = vmatprep.subr.bf16.mxu1 %v13005_v63 }
 0xeb5   :  { %7267 = vmatpush1.bf16.msra.mxu1 %v13010_v16 }
 0xeb6   :  { %7268 = vmatprep.subr.bf16.mxu1 %v13016_v15 }
 0xeb9   :  { %7269 = vmatpush1.bf16.msra.mxu1 %v13023_v41 }
 0xeba   :  { %7270 = vmatprep.subr.bf16.mxu1 %v13028_v62 }
 0xebd   :  { %7271 = vmatpush1.bf16.msra.mxu1 %v13035_v35 }
 0xebe   :  { %7418 = vmatprep.subr.bf16.mxu1 %v12992_v53 }
 0xf83   :  { %v7221_v17 = vpop.f32.mrb[240].mxu1 }
 0xf84   :  { %v7228_v57 = vadd.f32 %v7221_v17, %v13087_v29  ;;  %v7223_v45 = vpop.f32.mrb[241].mxu1 }
 0xf85   :  { %v7229_v42 = vadd.f32 %v7223_v45, %v13089_v25  ;;  %v7225_v36 = vpop.f32.mrb[242].mxu1 }
 0xf86   :  { %v7230_v55 = vsub.f32 0.0, %v7228_v57  ;;  %v7226_v39 = vpop.f32.mrb[243].mxu1 }
 0xf87   :  { %v7231_v61 = vsub.f32 0.0, %v7229_v42 }
 0xf88   :  { %v7232_v33 = vmul.f32 1.442695, %v7230_v55 }
 0xf89   :  { %v7234_v5 = vmul.f32 1.442695, %v7231_v61 }
 0xf8a   :  { %9998 = vpow2.f32 %v7232_v33 }
 0xf8b   :  { %10000 = vtanh.f32 %v7229_v42 }
 0xf94   :  { %v9999_v21 = vpop.eup %9998 }
 0xf95   :  { %v7236_v47 = vadd.f32 1.0, %v9999_v21  ;;  %v10001_v34 = vpop.eup %10000 }
 0xf97   :  { %10002 = vrcp.f32 %v7236_v47 }
 0xf98   :  { %10004 = vpow2.f32 %v7234_v5 }
 0xfa1   :  { %v10003_v52 = vpop.eup %10002 }
 0xfa2   :  { %v7244_v14 = vmul.f32 %v10003_v52, %v10001_v34  ;;  %v10005_v29 = vpop.eup %10004  ;;  %v7243_v25 = vmul.f32 %v10003_v52, %v7171_v0 }
 0xfa3   :  { %v7237_v23 = vadd.f32 1.0, %v10005_v29 }
 0xfa4   :  { %7246 = vrot.lane.b32.xlu1 %v7244_v14, %s10088_s8 }
 0xfa5   :  { %10006 = vrcp.f32 %v7237_v23 }
 0xfaf   :  { %v10007_v49 = vpop.eup %10006 }
0x1016   :  { %v7247_v31 = vpop.permute.xlu1 %7246 }
0x1017   :  { %v7249_v28 = vadd.f32 %v7247_v31, %v7243_v25 }
0x1019   :  { %10008 = vtanh.f32 %v7249_v28 }
0x1023   :  { %v10009_v11 = vpop.eup %10008 }
0x1024   :  { %v13141_v32 = vmul.f32 %v10009_v11, %v10007_v49 }
0x1026   :  { %v7257_v13 = vpack.c.bf16 %v13141_v32, %v13141_v32 }
0x1028   :  { %7259 = vrot.lane.b32.xlu1 %v7257_v13, %s10088_s8 }
0x109a   :  { %v7260_v19 = vpop.permute.xlu1 %7259 }
0x109b   :  { %8396 = vmatmul.mubr.msk.bf16.vlgmr.msra.gmra.mrb[244].mxu1 %vm5650_vm4, %v7260_v19 }
0x109c   :  { %7419 = vmatpush1.bf16.msra.mxu1 %v12998_v12  ;;  %7450 = vmatprep.mubr.bf16.mxu1 %v10085_v2 }
0x109d   :  { %7420 = vmatprep.subr.bf16.mxu1 %v13005_v63 }
0x10a0   :  { %7421 = vmatpush1.bf16.msra.mxu1 %v13010_v16 }
0x10a1   :  { %7422 = vmatprep.subr.bf16.mxu1 %v13016_v15 }
0x10a4   :  { %7423 = vmatpush1.bf16.msra.mxu1 %v13023_v41 }
0x10a5   :  { %7424 = vmatprep.subr.bf16.mxu1 %v13028_v62 }
0x10a8   :  { %7425 = vmatpush1.bf16.msra.mxu1 %v13035_v35 }
0x10a9   :  { %7572 = vmatprep.subr.bf16.mxu1 %v12992_v53 }
0x116e   :  { %v7298_v38 = vpop.f32.mrb[244].mxu1 }
0x116f   :  { %v7305_v3 = vadd.f32 %v7298_v38, %v13092_v54  ;;  %v7300_v8 = vpop.f32.mrb[245].mxu1 }
0x1170   :  { %v7306_v43 = vadd.f32 %v7300_v8, %v13094_v50  ;;  %v7302_v6 = vpop.f32.mrb[246].mxu1 }
0x1171   :  { %v7307_v59 = vsub.f32 0.0, %v7305_v3  ;;  %v7303_v60 = vpop.f32.mrb[247].mxu1 }
0x1172   :  { %v7308_v48 = vsub.f32 0.0, %v7306_v43 }
0x1173   :  { %v7309_v27 = vmul.f32 1.442695, %v7307_v59 }
0x1174   :  { %v7311_v17 = vmul.f32 1.442695, %v7308_v48 }
0x1175   :  { %10010 = vpow2.f32 %v7309_v27 }
0x1176   :  { %10012 = vtanh.f32 %v7306_v43 }
0x117f   :  { %v10011_v44 = vpop.eup %10010 }
0x1180   :  { %v7313_v0 = vadd.f32 1.0, %v10011_v44  ;;  %v10013_v56 = vpop.eup %10012 }
0x1182   :  { %10014 = vrcp.f32 %v7313_v0 }
0x1183   :  { %10016 = vpow2.f32 %v7311_v17 }
0x118c   :  { %v10015_v37 = vpop.eup %10014 }
0x118d   :  { %v7321_v20 = vmul.f32 %v10015_v37, %v10013_v56  ;;  %v10017_v54 = vpop.eup %10016  ;;  %v7320_v50 = vmul.f32 %v10015_v37, %v7249_v28 }
0x118e   :  { %v7314_v57 = vadd.f32 1.0, %v10017_v54 }
0x118f   :  { %7323 = vrot.lane.b32.xlu0 %v7321_v20, %s10088_s8 }
0x1190   :  { %10018 = vrcp.f32 %v7314_v57 }
0x119a   :  { %v10019_v36 = vpop.eup %10018 }
0x1201   :  { %v7324_v45 = vpop.permute.xlu0 %7323 }
0x1202   :  { %v7326_v42 = vadd.f32 %v7324_v45, %v7320_v50 }
0x1204   :  { %10020 = vtanh.f32 %v7326_v42 }
0x120e   :  { %v10021_v55 = vpop.eup %10020 }
0x120f   :  { %v13159_v39 = vmul.f32 %v10021_v55, %v10019_v36 }
0x1211   :  { %v7334_v33 = vpack.c.bf16 %v13159_v39, %v13159_v39 }
0x1213   :  { %7336 = vrot.lane.b32.xlu1 %v7334_v33, %s10088_s8 }
0x1285   :  { %v7337_v21 = vpop.permute.xlu1 %7336 }
0x1286   :  { %8397 = vmatmul.mubr.msk.bf16.vlgmr.msra.gmra.mrb[152].mxu0 %vm5650_vm4, %v7337_v21 }
0x1287   :  { %7496 = vmatpush1.bf16.msra.mxu0 %v12998_v12  ;;  %7527 = vmatprep.mubr.bf16.mxu0 %v10085_v2 }
0x1288   :  { %7497 = vmatprep.subr.bf16.mxu0 %v13005_v63 }
0x128b   :  { %7498 = vmatpush1.bf16.msra.mxu0 %v13010_v16 }
0x128c   :  { %7499 = vmatprep.subr.bf16.mxu0 %v13016_v15 }
0x128f   :  { %7500 = vmatpush1.bf16.msra.mxu0 %v13023_v41 }
0x1290   :  { %7501 = vmatprep.subr.bf16.mxu0 %v13028_v62 }
0x1293   :  { %7502 = vmatpush1.bf16.msra.mxu0 %v13035_v35 }
0x1294   :  { %7649 = vmatprep.subr.bf16.mxu0 %v12992_v53 }
0x1359   :  { %v7375_v47 = vpop.f32.mrb[152].mxu0 }
0x135a   :  { %v7382_v34 = vadd.f32 %v7375_v47, %v13097_v9  ;;  %v7377_v52 = vpop.f32.mrb[153].mxu0 }
0x135b   :  { %v7383_v14 = vadd.f32 %v7377_v52, %v13099_v4  ;;  %v7379_v61 = vpop.f32.mrb[154].mxu0 }
0x135c   :  { %v7384_v5 = vsub.f32 0.0, %v7382_v34  ;;  %v7380_v29 = vpop.f32.mrb[155].mxu0 }
0x135d   :  { %v7385_v53 = vsub.f32 0.0, %v7383_v14 }
0x135e   :  { %v7386_v23 = vmul.f32 1.442695, %v7384_v5 }
0x135f   :  { %v7388_v13 = vmul.f32 1.442695, %v7385_v53 }
0x1360   :  { %10022 = vpow2.f32 %v7386_v23 }
0x1361   :  { %10024 = vtanh.f32 %v7383_v14 }
0x136a   :  { %v10023_v25 = vpop.eup %10022 }
0x136b   :  { %v7390_v31 = vadd.f32 1.0, %v10023_v25  ;;  %v10025_v28 = vpop.eup %10024 }
0x136d   :  { %10026 = vrcp.f32 %v7390_v31 }
0x136e   :  { %10028 = vpow2.f32 %v7388_v13 }
0x1377   :  { %v10027_v49 = vpop.eup %10026 }
0x1378   :  { %v7398_v11 = vmul.f32 %v10027_v49, %v10025_v28  ;;  %v10029_v9 = vpop.eup %10028  ;;  %v7397_v4 = vmul.f32 %v10027_v49, %v7326_v42 }
0x1379   :  { %v7391_v19 = vadd.f32 1.0, %v10029_v9 }
0x137a   :  { %7400 = vrot.lane.b32.xlu0 %v7398_v11, %s10088_s8 }
0x137b   :  { %10030 = vrcp.f32 %v7391_v19 }
0x1385   :  { %v10031_v8 = vpop.eup %10030 }
0x13ec   :  { %v7401_v38 = vpop.permute.xlu0 %7400 }
0x13ed   :  { %v7403_v3 = vadd.f32 %v7401_v38, %v7397_v4 }
0x13ef   :  { %10032 = vtanh.f32 %v7403_v3 }
0x13f9   :  { %v10033_v43 = vpop.eup %10032 }
0x13fa   :  { %v13177_v6 = vmul.f32 %v10033_v43, %v10031_v8 }
0x13fc   :  { %v7411_v59 = vpack.c.bf16 %v13177_v6, %v13177_v6 }
0x13fe   :  { %7413 = vrot.lane.b32.xlu1 %v7411_v59, %s10088_s8 }
0x1470   :  { %v7414_v60 = vpop.permute.xlu1 %7413 }
0x1471   :  { %8398 = vmatmul.mubr.msk.bf16.vlgmr.msra.gmra.mrb[248].mxu1 %vm5650_vm4, %v7414_v60 }
0x1472   :  { %7573 = vmatpush1.bf16.msra.mxu1 %v12998_v12  ;;  %7604 = vmatprep.mubr.bf16.mxu1 %v10085_v2 }
0x1473   :  { %7574 = vmatprep.subr.bf16.mxu1 %v13005_v63 }
0x1476   :  { %7575 = vmatpush1.bf16.msra.mxu1 %v13010_v16 }
0x1477   :  { %7576 = vmatprep.subr.bf16.mxu1 %v13016_v15 }
0x147a   :  { %7577 = vmatpush1.bf16.msra.mxu1 %v13023_v41 }
0x147b   :  { %7578 = vmatprep.subr.bf16.mxu1 %v13028_v62 }
0x147e   :  { %7579 = vmatpush1.bf16.msra.mxu1 %v13035_v35 }
0x1544   :  { %v7452_v27 = vpop.f32.mrb[248].mxu1 }
0x1545   :  { %v7459_v44 = vadd.f32 %v7452_v27, %v13102_v24  ;;  %v7454_v0 = vpop.f32.mrb[249].mxu1 }
0x1546   :  { %v7460_v56 = vadd.f32 %v7454_v0, %v13104_v40  ;;  %v7456_v37 = vpop.f32.mrb[250].mxu1 }
0x1547   :  { %v7461_v20 = vsub.f32 0.0, %v7459_v44  ;;  %v7457_v48 = vpop.f32.mrb[251].mxu1 }
0x1548   :  { %v7462_v36 = vsub.f32 0.0, %v7460_v56 }
0x1549   :  { %v7463_v17 = vmul.f32 1.442695, %v7461_v20 }
0x154a   :  { %v7465_v55 = vmul.f32 1.442695, %v7462_v36 }
0x154b   :  { %10034 = vpow2.f32 %v7463_v17 }
0x154c   :  { %10036 = vtanh.f32 %v7460_v56 }
0x1555   :  { %v10035_v54 = vpop.eup %10034 }
0x1556   :  { %v7467_v57 = vadd.f32 1.0, %v10035_v54  ;;  %v10037_v50 = vpop.eup %10036 }
0x1558   :  { %10038 = vrcp.f32 %v7467_v57 }
0x1559   :  { %10040 = vpow2.f32 %v7465_v55 }
0x1562   :  { %v10039_v45 = vpop.eup %10038 }
0x1563   :  { %v7475_v42 = vmul.f32 %v10039_v45, %v10037_v50  ;;  %v10041_v24 = vpop.eup %10040  ;;  %v7474_v40 = vmul.f32 %v10039_v45, %v7403_v3 }
0x1564   :  { %v7468_v33 = vadd.f32 1.0, %v10041_v24 }
0x1565   :  { %7477 = vrot.lane.b32.xlu0 %v7475_v42, %s10088_s8 }
0x1566   :  { %10042 = vrcp.f32 %v7468_v33 }
0x1570   :  { %v10043_v34 = vpop.eup %10042 }
0x15d7   :  { %v7478_v21 = vpop.permute.xlu0 %7477 }
0x15d8   :  { %v7480_v47 = vadd.f32 %v7478_v21, %v7474_v40 }
0x15da   :  { %10044 = vtanh.f32 %v7480_v47 }
0x15e4   :  { %v10045_v52 = vpop.eup %10044 }
0x15e5   :  { %v13194_v14 = vmul.f32 %v10045_v52, %v10043_v34 }
0x15e7   :  { %v7488_v61 = vpack.c.bf16 %v13194_v14, %v13194_v14 }
0x15e9   :  { %7490 = vrot.lane.b32.xlu1 %v7488_v61, %s10088_s8 }
0x165b   :  { %v7491_v5 = vpop.permute.xlu1 %7490 }
0x165c   :  { %8399 = vmatmul.mubr.msk.bf16.vlgmr.msra.gmra.mrb[156].mxu0 %vm5650_vm4, %v7491_v5 }
0x165d   :  { %7650 = vmatpush1.bf16.msra.mxu0 %v12998_v12  ;;  %7681 = vmatprep.mubr.bf16.mxu0 %v10085_v2 }
0x165e   :  { %7651 = vmatprep.subr.bf16.mxu0 %v13005_v63 }
0x1661   :  { %7652 = vmatpush1.bf16.msra.mxu0 %v13010_v16 }
0x1662   :  { %7653 = vmatprep.subr.bf16.mxu0 %v13016_v15 }
0x1665   :  { %7654 = vmatpush1.bf16.msra.mxu0 %v13023_v41 }
0x1666   :  { %7655 = vmatprep.subr.bf16.mxu0 %v13028_v62 }
0x1669   :  { %7656 = vmatpush1.bf16.msra.mxu0 %v13035_v35 }
0x172f   :  { %v7529_v29 = vpop.f32.mrb[156].mxu0 }
0x1730   :  { %v7536_v23 = vadd.f32 %v7529_v29, %v13107_v26  ;;  %v7531_v25 = vpop.f32.mrb[157].mxu0 }
0x1731   :  { %v7537_v12 = vadd.f32 %v7531_v25, %v13109_v22  ;;  %v7533_v31 = vpop.f32.mrb[158].mxu0 }
0x1732   :  { %v7538_v2 = vsub.f32 0.0, %v7536_v23  ;;  %v7534_v28 = vpop.f32.mrb[159].mxu0 }
0x1733   :  { %v7539_v35 = vsub.f32 0.0, %v7537_v12 }
0x1734   :  { %v7540_v63 = vmul.f32 1.442695, %v7538_v2 }
0x1735   :  { %v7542_v11 = vmul.f32 1.442695, %v7539_v35 }
0x1736   :  { %10046 = vpow2.f32 %v7540_v63  ;;  %v9982_v63 = vld [vmem:[%s13311_s3 + $0x40] sm:$0xff]  }
0x1737   :  { %10048 = vtanh.f32 %v7537_v12  ;;  %9467 = vmatprep.subr.bf16.mxu1 %v9982_v63 }
0x1740   :  { %v10047_v16 = vpop.eup %10046 }
0x1741   :  { %v7544_v49 = vadd.f32 1.0, %v10047_v16  ;;  %v10049_v15 = vpop.eup %10048 }
0x1743   :  { %10050 = vrcp.f32 %v7544_v49 }
0x1744   :  { %10052 = vpow2.f32 %v7542_v11 }
0x174d   :  { %v10051_v41 = vpop.eup %10050 }
0x174e   :  { %v7552_v62 = vmul.f32 %v10051_v41, %v10049_v15  ;;  %v10053_v26 = vpop.eup %10052  ;;  %v7551_v22 = vmul.f32 %v10051_v41, %v7480_v47  ;;  %v9985_v41 = vld [vmem:[%s13311_s3 + $0x58] sm:$0xff]  }
0x174f   :  { %v7545_v53 = vadd.f32 1.0, %v10053_v26 }
0x1750   :  { %7554 = vrot.lane.b32.xlu0 %v7552_v62, %s10088_s8 }
0x1751   :  { %10054 = vrcp.f32 %v7545_v53 }
0x175b   :  { %v10055_v19 = vpop.eup %10054 }
0x17c2   :  { %v7555_v13 = vpop.permute.xlu0 %7554 }
0x17c3   :  { %v7557_v9 = vadd.f32 %v7555_v13, %v7551_v22 }
0x17c5   :  { %10056 = vtanh.f32 %v7557_v9 }
0x17cf   :  { %v10057_v4 = vpop.eup %10056 }
0x17d0   :  { %v13211_v38 = vmul.f32 %v10057_v4, %v10055_v19 }
0x17d2   :  { %v7565_v3 = vpack.c.bf16 %v13211_v38, %v13211_v38 }
0x17d4   :  { %7567 = vrot.lane.b32.xlu1 %v7565_v3, %s10088_s8 }
0x1846   :  { %v7568_v8 = vpop.permute.xlu1 %7567 }
0x1847   :  { %8400 = vmatmul.mubr.msk.bf16.vlgmr.msra.gmra.mrb[252].mxu1 %vm5650_vm4, %v7568_v8 }
0x1848   :  { %9468 = vmatpush3.bf16.msra.mxu1 %v9982_v63 }
0x191a   :  { %v7606_v43 = vpop.f32.mrb[252].mxu1 }
0x191b   :  { %v7613_v59 = vadd.f32 %v7606_v43, %v13112_v7  ;;  %v7608_v60 = vpop.f32.mrb[253].mxu1 }
0x191c   :  { %v7614_v27 = vadd.f32 %v7608_v60, %v13114_v46  ;;  %v7610_v44 = vpop.f32.mrb[254].mxu1 }
0x191d   :  { %v7615_v0 = vsub.f32 0.0, %v7613_v59  ;;  %v7611_v56 = vpop.f32.mrb[255].mxu1 }
0x191e   :  { %v7616_v50 = vsub.f32 0.0, %v7614_v27 }
0x191f   :  { %v7617_v37 = vmul.f32 1.442695, %v7615_v0 }
0x1920   :  { %v7619_v45 = vmul.f32 1.442695, %v7616_v50 }
0x1921   :  { %10058 = vpow2.f32 %v7617_v37 }
0x1922   :  { %10060 = vtanh.f32 %v7614_v27 }
0x192b   :  { %v10059_v20 = vpop.eup %10058 }
0x192c   :  { %v7621_v48 = vadd.f32 1.0, %v10059_v20  ;;  %v10061_v17 = vpop.eup %10060 }
0x192e   :  { %10062 = vrcp.f32 %v7621_v48 }
0x192f   :  { %10064 = vpow2.f32 %v7619_v45 }
0x1938   :  { %v10063_v54 = vpop.eup %10062 }
0x1939   :  { %v7629_v57 = vmul.f32 %v10063_v54, %v10061_v17  ;;  %v10065_v7 = vpop.eup %10064  ;;  %v7628_v46 = vmul.f32 %v10063_v54, %v7557_v9  ;;  %v7741_v54 = vsub.s32 2, %v12121_v10 }
0x193a   :  { %v7622_v42 = vadd.f32 1.0, %v10065_v7 }
0x193b   :  { %7631 = vrot.lane.b32.xlu0 %v7629_v57, %s10088_s8  ;;  %v7852_v57 = vld [vmem:[%s13311_s3 + $0x60] sm:$0x1]  ;;  %v7742_v50 = vrot.slane %v13042_v58, %v7741_v54 }
0x193c   :  { %10066 = vrcp.f32 %v7622_v42  ;;  %v7853_v45 = vunpack.c.l.bf16 %v7852_v57 }
0x1946   :  { %v10067_v24 = vpop.eup %10066 }
0x19ad   :  { %v7632_v36 = vpop.permute.xlu0 %7631 }
0x19ae   :  { %v7634_v55 = vadd.f32 %v7632_v36, %v7628_v46 }
0x19b0   :  { %10068 = vtanh.f32 %v7634_v55 }
0x19ba   :  { %v10069_v33 = vpop.eup %10068 }
0x19bb   :  { %v7636_v40 = vmul.f32 %v10069_v33, %v10067_v24  ;;  %v7857_v24 = vrot.slane %v7853_v45, %v12128_v18 }
0x19bd   :  { %v7642_v21 = vpack.c.bf16 %v7636_v40, %v7636_v40 }
0x19bf   :  { %7644 = vrot.lane.b32.xlu1 %v7642_v21, %s10088_s8 }
0x19c3   :  { %7175 = vrot.lane.b32.xlu1 %v13123_v51, %s10088_s8 }
0x19c7   :  { %7330 = vrot.lane.b32.xlu1 %v13159_v39, %s10088_s8 }
0x19cb   :  { %7484 = vrot.lane.b32.xlu1 %v13194_v14, %s10088_s8 }
0x19cf   :  { %7638 = vrot.lane.b32.xlu1 %v7636_v40, %s10088_s8 }
0x1a31   :  { %v7645_v47 = vpop.permute.xlu1 %7644 }
0x1a32   :  { %8401 = vmatmul.mubr.msk.bf16.vlgmr.msra.gmra.mrb[160].mxu0 %vm5650_vm4, %v7645_v47 }
0x1a35   :  { %v7176_v34 = vpop.permute.xlu1 %7175 }
0x1a36   :  { %7179 = vst.msk [vmem:[#allocation2] sm:$0xf] %vm7178_vm7, %v7176_v34 }
0x1a39   :  { %v7331_v52 = vpop.permute.xlu1 %7330 }
0x1a3a   :  { %7333 = vst.msk [vmem:[#allocation2 + $0x10] sm:$0xf] %vm7178_vm7, %v7331_v52 }
0x1a3d   :  { %v7485_v61 = vpop.permute.xlu1 %7484  ;;  %v7719_v4 = vld [vmem:[#allocation2] sm:$0xff] }
0x1a3e   :  { %7487 = vst.msk [vmem:[#allocation2 + $0x20] sm:$0xf] %vm7178_vm7, %v7485_v61 }
0x1a41   :  { %v7639_v51 = vpop.permute.xlu1 %7638  ;;  %v7721_v59 = vld [vmem:[#allocation2 + $0x10] sm:$0xff] }
0x1a42   :  { %7641 = vst.msk [vmem:[#allocation2 + $0x30] sm:$0xf] %vm7178_vm7, %v7639_v51 }
0x1a45   :  { %v7723_v44 = vld [vmem:[#allocation2 + $0x20] sm:$0xff] }
0x1a49   :  { %v7725_v20 = vld [vmem:[#allocation2 + $0x30] sm:$0xff] }
0x1b05   :  { %v7683_v39 = vpop.f32.mrb[160].mxu0 }
0x1b06   :  { %v7690_v14 = vadd.f32 %v7683_v39, %v13117_v1  ;;  %v7685_v5 = vpop.f32.mrb[161].mxu0  ;;  %v9983_v1 = vld [vmem:[%s13311_s3 + $0x48] sm:$0xff]  }
0x1b07   :  { %v7691_v29 = vadd.f32 %v7685_v5, %v13119_v30  ;;  %v7687_v23 = vpop.f32.mrb[162].mxu0  ;;  %9469 = vmatprep.subr.bf16.mxu1 %v9983_v1  ;;  %v9984_v30 = vld [vmem:[%s13311_s3 + $0x50] sm:$0xff]  }
0x1b08   :  { %v7692_v25 = vsub.f32 0.0, %v7690_v14  ;;  %v7688_v12 = vpop.f32.mrb[163].mxu0  ;;  %9470 = vmatpush3.bf16.msra.mxu1 %v9983_v1 }
0x1b09   :  { %9471 = vmatprep.subr.bf16.mxu1 %v9984_v30  ;;  %v7693_v62 = vsub.f32 0.0, %v7691_v29 }
0x1b0a   :  { %v7694_v31 = vmul.f32 1.442695, %v7692_v25 }
0x1b0b   :  { %v7696_v35 = vmul.f32 1.442695, %v7693_v62 }
0x1b0c   :  { %10070 = vpow2.f32 %v7694_v31  ;;  %9472 = vmatpush3.bf16.msra.mxu1 %v9984_v30 }
0x1b0d   :  { %10072 = vtanh.f32 %v7691_v29  ;;  %9473 = vmatprep.subr.bf16.mxu1 %v9985_v41 }
0x1b10   :  { %9474 = vmatpush3.bf16.msra.mxu1 %v9985_v41 }
0x1b16   :  { %v10071_v2 = vpop.eup %10070 }
0x1b17   :  { %v7698_v28 = vadd.f32 1.0, %v10071_v2  ;;  %v10073_v16 = vpop.eup %10072 }
0x1b19   :  { %10074 = vrcp.f32 %v7698_v28 }
0x1b1a   :  { %10076 = vpow2.f32 %v7696_v35 }
0x1b23   :  { %v10075_v49 = vpop.eup %10074 }
0x1b24   :  { %v7706_v15 = vmul.f32 %v10075_v49, %v10073_v16  ;;  %v10077_v11 = vpop.eup %10076  ;;  %v7705_v53 = vmul.f32 %v10075_v49, %v7634_v55 }
0x1b25   :  { %v7699_v26 = vadd.f32 1.0, %v10077_v11 }
0x1b26   :  { %7708 = vrot.lane.b32.xlu0 %v7706_v15, %s10088_s8 }
0x1b27   :  { %10078 = vrcp.f32 %v7699_v26 }
0x1b2a   :  { %7253 = vrot.lane.b32.xlu0 %v13141_v32, %s10088_s8 }
0x1b2e   :  { %7407 = vrot.lane.b32.xlu0 %v13177_v6, %s10088_s8 }
0x1b31   :  { %v10079_v6 = vpop.eup %10078 }
0x1b32   :  { %7561 = vrot.lane.b32.xlu0 %v13211_v38, %s10088_s8 }
0x1b98   :  { %v7709_v22 = vpop.permute.xlu0 %7708 }
0x1b99   :  { %v7711_v13 = vadd.f32 %v7709_v22, %v7705_v53 }
0x1b9b   :  { %10080 = vtanh.f32 %v7711_v13 }
0x1b9c   :  { %v7254_v9 = vpop.permute.xlu0 %7253 }
0x1b9d   :  { %7256 = vst.msk [vmem:[#allocation2 + $0x8] sm:$0xf] %vm7178_vm7, %v7254_v9 }
0x1ba0   :  { %v7408_v32 = vpop.permute.xlu0 %7407 }
0x1ba1   :  { %7410 = vst.msk [vmem:[#allocation2 + $0x18] sm:$0xf] %vm7178_vm7, %v7408_v32 }
0x1ba4   :  { %v7562_v19 = vpop.permute.xlu0 %7561  ;;  %v7720_v38 = vld [vmem:[#allocation2 + $0x8] sm:$0xff] }
0x1ba5   :  { %v10081_v3 = vpop.eup %10080  ;;  %7564 = vst.msk [vmem:[#allocation2 + $0x28] sm:$0xf] %vm7178_vm7, %v7562_v19  ;;  %v7735_v8 = vpack.c.bf16 %v7720_v38, %v7719_v4 }
0x1ba6   :  { %v7713_v43 = vmul.f32 %v10081_v3, %v10079_v6  ;;  %v7892_v6 = vsub.s32 3, %v12121_v10 }
0x1ba7   :  { %9475 = vmatprep.mubr.msk.bf16.mxu1 %vm5650_vm4, %v7735_v8 }
0x1ba8   :  { %v7722_v60 = vld [vmem:[#allocation2 + $0x18] sm:$0xff]  ;;  %7715 = vrot.lane.b32.xlu0 %v7713_v43, %s10088_s8  ;;  %v7893_v19 = vrot.slane %v13042_v58, %v7892_v6 }
0x1ba9   :  { %v7736_v27 = vpack.c.bf16 %v7722_v60, %v7721_v59 }
0x1bab   :  { %9476 = vmatmul.mubr.msk.bf16.vlgmr.msra.gmra.mrb[0].mxu1 %vm5650_vm4, %v7736_v27 }
0x1bac   :  { %v7724_v0 = vld [vmem:[#allocation2 + $0x28] sm:$0xff] }
0x1bad   :  { %v7737_v56 = vpack.c.bf16 %v7724_v0, %v7723_v44 }
0x1baf   :  { %9479 = vmatprep.mubr.msk.bf16.mxu1 %vm5650_vm4, %v7737_v56 }
0x1c1a   :  { %v7716_v37 = vpop.permute.xlu0 %7715 }
0x1c1b   :  { %7718 = vst.msk [vmem:[#allocation2 + $0x38] sm:$0xf] %vm7178_vm7, %v7716_v37 }
0x1c22   :  { %v7726_v48 = vld [vmem:[#allocation2 + $0x38] sm:$0xff] }
0x1c23   :  { %v7738_v17 = vpack.c.bf16 %v7726_v48, %v7725_v20 }
0x1c25   :  { %9480 = vmatmul.mubr.msk.bf16.gmra.mrb[4].mxu1 %vm5650_vm4, %v7738_v17 }
0x1c7e   :  { %v9477_v7 = vpop.f32.mrb[0].mxu1 }
0x1c7f   :  { %v7813_v42 = vpop.f32.mrb[1].mxu1  ;;  %v7822_v46 = vadd.f32 %v9477_v7, %v7742_v50 }
0x1c80   :  { %v7814_v36 = vadd.f32 %v7813_v42, %v7742_v50  ;;  %v9478_v55 = vpop.f32.mrb[2].mxu1 }
0x1c81   :  { %v7825_v33 = vadd.f32 %v9478_v55, %v7742_v50  ;;  %v7816_v40 = vpop.f32.mrb[3].mxu1  ;;  %v7846_v52 = vmax.f32 %v7822_v46, 0.0 }
0x1c82   :  { %v7844_v21 = vmax.f32 %v7814_v36, 0.0  ;;  %v7817_v47 = vadd.f32 %v7816_v40, %v7742_v50 }
0x1c83   :  { %v7847_v34 = vmax.f32 %v7825_v33, 0.0  ;;  %v7860_v23 = vmul.f32 %v7857_v24, %v7846_v52 }
0x1c84   :  { %v7845_v61 = vmax.f32 %v7817_v47, 0.0  ;;  %v7858_v51 = vmul.f32 %v7857_v24, %v7844_v21 }
0x1c85   :  { %v7861_v5 = vmul.f32 %v7857_v24, %v7847_v34  ;;  %v7872_v18 = vsel %vm4734_vm2, %v7860_v23, 0.0 }
0x1c86   :  { %v7866_v39 = vsel %vm4734_vm2, %v7858_v51, 0.0  ;;  %v7859_v14 = vmul.f32 %v7857_v24, %v7845_v61 }
0x1c87   :  { %7867 = vadd.xlane.f32.xlu1 %v7866_v39  ;;  %v7875_v25 = vsel %vm4734_vm2, %v7861_v5, 0.0 }
0x1c88   :  { %v7869_v29 = vsel %vm4734_vm2, %v7859_v14, 0.0 }
0x1c89   :  { %7870 = vadd.xlane.f32.xlu0 %v7869_v29 }
0x1c8b   :  { %7876 = vadd.xlane.f32.xlu1 %v7875_v25 }
0x1c8d   :  { %7873 = vadd.xlane.f32.xlu0 %v7872_v18 }
0x1cf8   :  { %v9481_v12 = vpop.f32.mrb[4].mxu1 }
0x1cf9   :  { %v7838_v31 = vadd.f32 %v9481_v12, %v7742_v50  ;;  %v7829_v2 = vpop.f32.mrb[5].mxu1 }
0x1cfa   :  { %v7830_v28 = vadd.f32 %v7829_v2, %v7742_v50  ;;  %v9482_v63 = vpop.f32.mrb[6].mxu1 }
0x1cfb   :  { %v7841_v1 = vadd.f32 %v9482_v63, %v7742_v50  ;;  %v7832_v30 = vpop.f32.mrb[7].mxu1  ;;  %v7850_v16 = vmax.f32 %v7838_v31, 0.0 }
0x1cfc   :  { %v7848_v49 = vmax.f32 %v7830_v28, 0.0  ;;  %v7833_v15 = vadd.f32 %v7832_v30, %v7742_v50 }
0x1cfd   :  { %v7851_v41 = vmax.f32 %v7841_v1, 0.0  ;;  %v7864_v53 = vmul.f32 %v7857_v24, %v7850_v16 }
0x1cfe   :  { %v7849_v62 = vmax.f32 %v7833_v15, 0.0  ;;  %v7862_v35 = vmul.f32 %v7857_v24, %v7848_v49 }
0x1cff   :  { %v7865_v13 = vmul.f32 %v7857_v24, %v7851_v41  ;;  %v7884_v9 = vsel %vm4734_vm2, %v7864_v53, 0.0 }
0x1d00   :  { %v7878_v11 = vsel %vm4734_vm2, %v7862_v35, 0.0  ;;  %v7863_v26 = vmul.f32 %v7857_v24, %v7849_v62 }
0x1d01   :  { %7879 = vadd.xlane.f32.xlu0 %v7878_v11  ;;  %v7887_v32 = vsel %vm4734_vm2, %v7865_v13, 0.0 }
0x1d02   :  { %v7881_v22 = vsel %vm4734_vm2, %v7863_v26, 0.0 }
0x1d03   :  { %7882 = vadd.xlane.f32.xlu1 %v7881_v22 }
0x1d05   :  { %7885 = vadd.xlane.f32.xlu0 %v7884_v9 }
0x1d07   :  { %7888 = vadd.xlane.f32.xlu1 %v7887_v32 }
0x1d14   :  { %v7868_v4 = vpop.xlane.xlu1 %7867 }
0x1d15   :  { %v7894_v38 = vadd.f32 %v7893_v19, %v7868_v4 }
0x1d16   :  { %v7871_v3 = vpop.xlane.xlu0 %7870 }
0x1d17   :  { %7903 = vst.msk [vmem:[%s13320_s9] sm:$0xff] %vm7902_vm8, %v7894_v38  ;;  %v7895_v8 = vadd.f32 %v7893_v19, %v7871_v3 }
0x1d18   :  { %v7877_v43 = vpop.xlane.xlu1 %7876 }
0x1d19   :  { %7904 = vst.msk [vmem:[%s13320_s9 + $0x8] sm:$0xff] %vm7902_vm8, %v7895_v8  ;;  %v7897_v59 = vadd.f32 %v7893_v19, %v7877_v43 }
0x1d1a   :  { %v7874_v10 = vpop.xlane.xlu0 %7873 }
0x1d1b   :  { %7906 = vst.msk [vmem:[%s13320_s9 + $0x18] sm:$0xff] %vm7902_vm8, %v7897_v59  ;;  %v7896_v58 = vadd.f32 %v7893_v19, %v7874_v10 }
0x1d1d   :  { %7905 = vst.msk [vmem:[%s13320_s9 + $0x10] sm:$0xff] %vm7902_vm8, %v7896_v58 }
0x1d8e   :  { %v7880_v60 = vpop.xlane.xlu0 %7879 }
0x1d8f   :  { %v7898_v27 = vadd.f32 %v7893_v19, %v7880_v60 }
0x1d90   :  { %v7883_v44 = vpop.xlane.xlu1 %7882 }
0x1d91   :  { %7907 = vst.msk [vmem:[%s13320_s9 + $0x20] sm:$0xff] %vm7902_vm8, %v7898_v27  ;;  %v7899_v0 = vadd.f32 %v7893_v19, %v7883_v44 }
0x1d92   :  { %v7886_v56 = vpop.xlane.xlu0 %7885 }
0x1d93   :  { %7908 = vst.msk [vmem:[%s13320_s9 + $0x28] sm:$0xff] %vm7902_vm8, %v7899_v0  ;;  %v7900_v37 = vadd.f32 %v7893_v19, %v7886_v56 }
0x1d94   :  { %v7889_v20 = vpop.xlane.xlu1 %7888 }
0x1d95   :  { %7909 = vst.msk [vmem:[%s13320_s9 + $0x30] sm:$0xff] %vm7902_vm8, %v7900_v37  ;;  %v7901_v48 = vadd.f32 %v7893_v19, %v7889_v20 }
0x1d97   :  { %7910 = vst.msk [vmem:[%s13320_s9 + $0x38] sm:$0xff] %vm7902_vm8, %v7901_v48 }

</bundles_post_ra>
